<compile_context>
chip_gen: v5e
topology: v5e:2x2
jax: 0.10.0
libtpu: 0.0.40
codegen_flags: <defaults>
</compile_context>

<pallas_src>
import functools

import jax
import jax.numpy as jnp
from jax.experimental import pallas as pl
from jax.experimental.pallas import tpu as pltpu


def _round_up(x, m):
    return ((x + m - 1) // m) * m


_VMEM_CAP = None


def _vmem_capacity_bytes():
    """Per-core VMEM capacity; conservative 64 MiB fallback (v7x)."""
    global _VMEM_CAP
    if _VMEM_CAP is None:
        try:
            _VMEM_CAP = int(pltpu.get_tpu_info().vmem_capacity_bytes)
        except Exception:
            _VMEM_CAP = 64 * 1024 * 1024
    return _VMEM_CAP


# ---------------------------------------------------------------------------
# Kernels
# ---------------------------------------------------------------------------

def _agg_kernel(a_ref, z_ref, *rest, apply_relu, fuse_w, resident, tk):
    """acc += A_tile @ Z_tile; at last k: out = (acc @ W) + b (+relu).

    fuse_w:   whether the per-layer weight matmul is fused into the epilogue.
    resident: Z is a full (n_pad, fz) VMEM-resident block sliced with pl.ds,
              otherwise a streamed (tk, fz) block.
    """
    if fuse_w:
        w_ref, b_ref, o_ref, acc_ref = rest
    else:
        b_ref, o_ref, acc_ref = rest

    k = pl.program_id(1)

    @pl.when(k == 0)
    def _():
        acc_ref[...] = jnp.zeros_like(acc_ref)

    if resident:
        start = pl.multiple_of(k * tk, tk)
        z_blk = z_ref[pl.ds(start, tk), :]
    else:
        z_blk = z_ref[...]

    acc_ref[...] += jnp.dot(a_ref[...], z_blk,
                            preferred_element_type=jnp.float32)

    @pl.when(k == pl.num_programs(1) - 1)
    def _():
        if fuse_w:
            out = jnp.dot(acc_ref[...].astype(jnp.bfloat16), w_ref[...],
                          preferred_element_type=jnp.float32) + b_ref[...]
        else:
            out = acc_ref[...] + b_ref[...]
        if apply_relu:
            out = jnp.maximum(out, 0.0)
        o_ref[...] = out.astype(o_ref.dtype)


def _xw_kernel(x_ref, w_ref, o_ref):
    """Row-tiled Z = X @ W (bf16 in, f32 acc, bf16 out)."""
    o_ref[...] = jnp.dot(x_ref[...], w_ref[...],
                         preferred_element_type=jnp.float32).astype(o_ref.dtype)


# ---------------------------------------------------------------------------
# pallas_call wrappers
# ---------------------------------------------------------------------------

def _row_transform(x_p, w_bf16, tm):
    """Z = X @ W, tiled over row blocks.  x_p: [Np, Fin_p] bf16 -> [Np, Fout_p] bf16."""
    n_pad, fin_p = x_p.shape
    fout_p = w_bf16.shape[1]
    return pl.pallas_call(
        _xw_kernel,
        out_shape=jax.ShapeDtypeStruct((n_pad, fout_p), jnp.bfloat16),
        grid=(n_pad // tm,),
        in_specs=[
            pl.BlockSpec((tm, fin_p), lambda i: (i, 0)),
            pl.BlockSpec((fin_p, fout_p), lambda i: (0, 0)),
        ],
        out_specs=pl.BlockSpec((tm, fout_p), lambda i: (i, 0)),
        compiler_params=pltpu.CompilerParams(
            dimension_semantics=("parallel",)),
    )(x_p, w_bf16)


def _aggregate(a_pad, z, w_p, b_p, apply_relu, tm, tk):
    """out = A_pad @ z (@ w_p if given) + b_p (+relu); bf16 padded output."""
    n_pad = a_pad.shape[0]
    fz = z.shape[1]
    fout_p = b_p.shape[1]
    grid = (n_pad // tm, n_pad // tk)

    vmem_cap = _vmem_capacity_bytes()
    # Keep Z fully resident in VMEM if (double-buffered) it fits ~1/3 of VMEM.
    z_bytes = n_pad * fz * z.dtype.itemsize
    resident = (2 * z_bytes) <= (vmem_cap // 3)

    a_spec = pl.BlockSpec((tm, tk), lambda i, k: (i, k))
    if resident:
        z_spec = pl.BlockSpec((n_pad, fz), lambda i, k: (0, 0))
    else:
        z_spec = pl.BlockSpec((tk, fz), lambda i, k: (k, 0))
    b_spec = pl.BlockSpec((1, fout_p), lambda i, k: (0, 0))
    out_spec = pl.BlockSpec((tm, fout_p), lambda i, k: (i, 0))

    fuse_w = w_p is not None
    kernel = functools.partial(_agg_kernel, apply_relu=apply_relu,
                               fuse_w=fuse_w, resident=resident, tk=tk)

    if fuse_w:
        in_specs = [a_spec, z_spec,
                    pl.BlockSpec((fz, fout_p), lambda i, k: (0, 0)),
                    b_spec]
        args = (a_pad, z, w_p, b_p)
    else:
        in_specs = [a_spec, z_spec, b_spec]
        args = (a_pad, z, b_p)

    vmem_limit = min(vmem_cap * 3 // 4, 112 * 1024 * 1024)

    return pl.pallas_call(
        kernel,
        out_shape=jax.ShapeDtypeStruct((n_pad, fout_p), jnp.bfloat16),
        grid=grid,
        in_specs=in_specs,
        out_specs=out_spec,
        scratch_shapes=[pltpu.VMEM((tm, fz), jnp.float32)],
        compiler_params=pltpu.CompilerParams(
            dimension_semantics=("parallel", "arbitrary"),
            vmem_limit_bytes=vmem_limit),
    )(*args)


def gcn_layer(a_pad, h_p, w, b, apply_relu, tm, tk):
    """One GraphConv(norm='both') layer on padded bf16 layout.

    h_p: (n_pad, fin_p) bf16, padded columns zero.
    Returns (n_pad, fout_p) bf16, padded columns zero.
    """
    fin, fout = w.shape
    fin_p = h_p.shape[1]
    fout_p = _round_up(fout, 128)

    w_p = jnp.zeros((fin_p, fout_p), jnp.bfloat16).at[:fin, :fout].set(
        w.astype(jnp.bfloat16))
    b_p = jnp.zeros((1, fout_p), jnp.float32).at[:, :fout].set(
        b.reshape(1, fout).astype(jnp.float32))

    if fout_p < fin_p:
        # Transform first (X @ W): the N^2 contraction runs on the narrow width.
        z = _row_transform(h_p, w_p, tm)
        return _aggregate(a_pad, z, None, b_p, apply_relu, tm, tk)
    # Aggregate first (A @ X); weight, bias, relu fused into the epilogue.
    return _aggregate(a_pad, h_p, w_p, b_p, apply_relu, tm, tk)


def gcn_forward(a_norm, x, params):
    """Mirrors GCN.forward: relu on all layers except the last."""
    n = a_norm.shape[0]
    in_dim = x.shape[1]

    tk = 256
    n_pad = _round_up(n, tk)
    # Larger row tile amortizes per-grid-step overhead, but keep >=2 row blocks
    # so megacore sharding of grid axis 0 has work for both TensorCores.
    if n_pad % 512 == 0 and n_pad // 512 >= 2:
        tm = 512
    else:
        tm = tk

    fin_p = _round_up(in_dim, 128)

    # Pad adjacency and features once (zero padding keeps the math exact).
    a_pad = jnp.zeros((n_pad, n_pad), jnp.bfloat16).at[:n, :n].set(
        a_norm.astype(jnp.bfloat16))
    h = jnp.zeros((n_pad, fin_p), jnp.bfloat16).at[:n, :in_dim].set(
        x.astype(jnp.bfloat16))

    n_layers = len(params)
    for i, (w, b) in enumerate(params):
        h = gcn_layer(a_pad, h, w, b,
                      apply_relu=(i < n_layers - 1), tm=tm, tk=tk)

    out_dim = params[-1][0].shape[1]
    return h[:n, :out_dim].astype(jnp.float32)


# ---------------------------------------------------------------------------
# Plain-JAX glue: params + graph construction
# ---------------------------------------------------------------------------

def init_gcn_params(key, in_dim, hid_dim, out_dim, n_layers):
    """Deterministic init matching GraphConv shapes: Xavier-uniform W, zero b."""
    if n_layers == 1:
        dims = [(in_dim, hid_dim)]  # mirrors module: single conv in_dim->hid_dim
    else:
        dims = [(in_dim, hid_dim)]
        for _ in range(n_layers - 2):
            dims.append((hid_dim, hid_dim))
        dims.append((hid_dim, out_dim))
    params = []
    for (fin, fout) in dims:
        key, sub = jax.random.split(key)
        limit = (6.0 / (fin + fout)) ** 0.5
        w = jax.random.uniform(sub, (fin, fout), jnp.float32, -limit, limit)
        b = jnp.zeros((1, fout), jnp.float32)
        params.append((w, b))
    return params


def build_normalized_adjacency(key, n_nodes, edge_prob=0.3):
    """Dense symmetric adjacency with self-loops, D^{-1/2} A D^{-1/2} norm."""
    mask = jax.random.bernoulli(key, edge_prob, (n_nodes, n_nodes))
    a = jnp.asarray(mask, jnp.float32)
    a = jnp.maximum(a, a.T)                                    # undirected
    a = jnp.maximum(a, jnp.eye(n_nodes, dtype=jnp.float32))    # self-loops
    deg = jnp.maximum(a.sum(axis=1), 1.0)                      # DGL clamps at 1
    d_inv_sqrt = 1.0 / jnp.sqrt(deg)
    return a * d_inv_sqrt[:, None] * d_inv_sqrt[None, :]


if __name__ == "__main__":
    key = jax.random.PRNGKey(0)
    k_graph, k_feat, k_param = jax.random.split(key, 3)

    # N=300 exercises the tiled k-reduction (grid 2x2 after padding to 512);
    # hid_dim=256 exercises both associativity paths (fused-W and pre-transform).
    n_nodes, in_dim, hid_dim, out_dim, n_layers = 300, 8, 256, 16, 3

    a_norm = build_normalized_adjacency(k_graph, n_nodes)
    x = jax.random.normal(k_feat, (n_nodes, in_dim), jnp.float32)
    params = init_gcn_params(k_param, in_dim, hid_dim, out_dim, n_layers)

    fwd = jax.jit(gcn_forward)
    out = fwd(a_norm, x, params)
    jax.block_until_ready(out)

    # Pure-JAX f32 reference of the same math (kernel uses bf16 operands with
    # f32 accumulation, so compare with a loose relative tolerance).
    ref = x
    for i, (w, b) in enumerate(params):
        ref = a_norm @ ref @ w + b
        if i < n_layers - 1:
            ref = jnp.maximum(ref, 0.0)

    assert out.shape == (n_nodes, out_dim)
    rel_err = float(jnp.max(jnp.abs(out - ref)) / (jnp.max(jnp.abs(ref)) + 1e-6))
    assert rel_err < 5e-2, f"relative max error too large: {rel_err}"

    print("KERNEL_OK")
</pallas_src>

<mosaic_0001>
module attributes {stable_mosaic.version = 11 : i64} {
  func.func @_agg_kernel(%arg0: i32, %arg1: i32, %arg2: memref<256x256xbf16, #tpu.memory_space<vmem>>, %arg3: memref<512x128xbf16, #tpu.memory_space<vmem>>, %arg4: memref<128x256xbf16, #tpu.memory_space<vmem>>, %arg5: memref<1x256xf32, #tpu.memory_space<vmem>>, %arg6: memref<256x256xbf16, #tpu.memory_space<vmem>>, %arg7: memref<256x128xf32, #tpu.memory_space<vmem>>) attributes {dimension_semantics = [#tpu.dimension_semantics<parallel>, #tpu.dimension_semantics<arbitrary>], iteration_bounds = array<i64: 2, 2>, scalar_prefetch = 0 : i64, scratch_operands = 1 : i64, tpu.core_type = #tpu.core_type<tc>, window_params = [{transform_indices = @transform_0, window_bounds = array<i64: 256, 256>}, {pipeline_mode = #tpu.pipeline_mode<synchronous>, transform_indices = @transform_1, window_bounds = array<i64: 512, 128>}, {pipeline_mode = #tpu.pipeline_mode<synchronous>, transform_indices = @transform_2, window_bounds = array<i64: 128, 256>}, {pipeline_mode = #tpu.pipeline_mode<synchronous>, transform_indices = @transform_3, window_bounds = array<i64: 1, 256>}, {transform_indices = @transform_4, window_bounds = array<i64: 256, 256>}]} {
    %c0_i32 = arith.constant 0 : i32
    %0 = arith.cmpi eq, %arg1, %c0_i32 : i32
    %1 = arith.extui %0 : i1 to i32
    %c0_i32_0 = arith.constant 0 : i32
    %2 = arith.cmpi ne, %1, %c0_i32_0 : i32
    scf.if %2 {
      %cst_8 = arith.constant 0.000000e+00 : f32
      %15 = vector.broadcast %cst_8 : f32 to vector<256x128xf32>
      %c0_9 = arith.constant 0 : index
      %c0_10 = arith.constant 0 : index
      %16 = vector.load %arg7[%c0_9, %c0_10] : memref<256x128xf32, #tpu.memory_space<vmem>>, vector<256x128xf32>
      tpu.vector_store %arg7[%c0_9, %c0_10], %15 {strides = array<i32>} : memref<256x128xf32, #tpu.memory_space<vmem>>, vector<256x128xf32>,
    } else {
    }
    %c256_i32 = arith.constant 256 : i32
    %3 = arith.muli %arg1, %c256_i32 : i32
    %4 = tpu.assume_multiple %3, 256 : i32
    %5 = arith.index_cast %4 : i32 to index
    %c0 = arith.constant 0 : index
    %6 = vector.load %arg3[%5, %c0] : memref<512x128xbf16, #tpu.memory_space<vmem>>, vector<256x128xbf16>
    %c0_1 = arith.constant 0 : index
    %c0_2 = arith.constant 0 : index
    %7 = vector.load %arg7[%c0_1, %c0_2] : memref<256x128xf32, #tpu.memory_space<vmem>>, vector<256x128xf32>
    %c0_3 = arith.constant 0 : index
    %c0_4 = arith.constant 0 : index
    %8 = vector.load %arg2[%c0_3, %c0_4] : memref<256x256xbf16, #tpu.memory_space<vmem>>, vector<256x256xbf16>
    %cst = arith.constant dense<0.000000e+00> : vector<256x128xf32>
    %9 = tpu.matmul %8, %6, %cst {dimension_numbers = #tpu.dot_dimension_numbers<[1], [0], [0], [1], [0, 0, 1, 1], [], []>} : vector<256x256xbf16>, vector<256x128xbf16>, vector<256x128xf32> -> vector<256x128xf32>
    %10 = arith.addf %7, %9 : vector<256x128xf32>
    %c0_5 = arith.constant 0 : index
    %c0_6 = arith.constant 0 : index
    %11 = vector.load %arg7[%c0_5, %c0_6] : memref<256x128xf32, #tpu.memory_space<vmem>>, vector<256x128xf32>
    tpu.vector_store %arg7[%c0_5, %c0_6], %10 {strides = array<i32>} : memref<256x128xf32, #tpu.memory_space<vmem>>, vector<256x128xf32>,
    %c1_i32 = arith.constant 1 : i32
    %12 = arith.cmpi eq, %arg1, %c1_i32 : i32
    %13 = arith.extui %12 : i1 to i32
    %c0_i32_7 = arith.constant 0 : i32
    %14 = arith.cmpi ne, %13, %c0_i32_7 : i32
    scf.if %14 {
      %c0_8 = arith.constant 0 : index
      %c0_9 = arith.constant 0 : index
      %15 = vector.load %arg7[%c0_8, %c0_9] : memref<256x128xf32, #tpu.memory_space<vmem>>, vector<256x128xf32>
      %16 = arith.truncf %15 : vector<256x128xf32> to vector<256x128xbf16>
      %c0_10 = arith.constant 0 : index
      %c0_11 = arith.constant 0 : index
      %17 = vector.load %arg4[%c0_10, %c0_11] : memref<128x256xbf16, #tpu.memory_space<vmem>>, vector<128x256xbf16>
      %cst_12 = arith.constant dense<0.000000e+00> : vector<256x256xf32>
      %18 = tpu.matmul %16, %17, %cst_12 {dimension_numbers = #tpu.dot_dimension_numbers<[1], [0], [0], [1], [0, 0, 1, 1], [], []>} : vector<256x128xbf16>, vector<128x256xbf16>, vector<256x256xf32> -> vector<256x256xf32>
      %c0_13 = arith.constant 0 : index
      %c0_14 = arith.constant 0 : index
      %19 = vector.load %arg5[%c0_13, %c0_14] : memref<1x256xf32, #tpu.memory_space<vmem>>, vector<1x256xf32>
      %20 = vector.broadcast %19 : vector<1x256xf32> to vector<256x256xf32>
      %21 = arith.addf %18, %20 : vector<256x256xf32>
      %cst_15 = arith.constant 0.000000e+00 : f32
      %22 = vector.broadcast %cst_15 : f32 to vector<256x256xf32>
      %23 = arith.maximumf %21, %22 : vector<256x256xf32>
      %24 = arith.truncf %23 : vector<256x256xf32> to vector<256x256xbf16>
      %c0_16 = arith.constant 0 : index
      %c0_17 = arith.constant 0 : index
      %25 = vector.load %arg6[%c0_16, %c0_17] : memref<256x256xbf16, #tpu.memory_space<vmem>>, vector<256x256xbf16>
      tpu.vector_store %arg6[%c0_16, %c0_17], %24 {strides = array<i32>} : memref<256x256xbf16, #tpu.memory_space<vmem>>, vector<256x256xbf16>,
    } else {
    }
    return
  }
  func.func @transform_0(%arg0: i32, %arg1: i32) -> (i32, i32) {
    %c0_i32 = arith.constant 0 : i32
    return %arg0, %arg1 : i32, i32
  }
  func.func @transform_1(%arg0: i32, %arg1: i32) -> (i32, i32) {
    %c0_i32 = arith.constant 0 : i32
    %c0_i32_0 = arith.constant 0 : i32
    %c0_i32_1 = arith.constant 0 : i32
    return %c0_i32, %c0_i32_0 : i32, i32
  }
  func.func @transform_2(%arg0: i32, %arg1: i32) -> (i32, i32) {
    %c0_i32 = arith.constant 0 : i32
    %c0_i32_0 = arith.constant 0 : i32
    %c0_i32_1 = arith.constant 0 : i32
    return %c0_i32, %c0_i32_0 : i32, i32
  }
  func.func @transform_3(%arg0: i32, %arg1: i32) -> (i32, i32) {
    %c0_i32 = arith.constant 0 : i32
    %c0_i32_0 = arith.constant 0 : i32
    %c0_i32_1 = arith.constant 0 : i32
    return %c0_i32, %c0_i32_0 : i32, i32
  }
  func.func @transform_4(%arg0: i32, %arg1: i32) -> (i32, i32) {
    %c0_i32 = arith.constant 0 : i32
    %c0_i32_0 = arith.constant 0 : i32
    return %arg0, %c0_i32 : i32, i32
  }
}

module attributes {stable_mosaic.version = 11 : i64} {
  func.func @_agg_kernel(%arg0: i32, %arg1: i32, %arg2: memref<256x256xbf16, #tpu.memory_space<vmem>>, %arg3: memref<512x256xbf16, #tpu.memory_space<vmem>>, %arg4: memref<256x256xbf16, #tpu.memory_space<vmem>>, %arg5: memref<1x256xf32, #tpu.memory_space<vmem>>, %arg6: memref<256x256xbf16, #tpu.memory_space<vmem>>, %arg7: memref<256x256xf32, #tpu.memory_space<vmem>>) attributes {dimension_semantics = [#tpu.dimension_semantics<parallel>, #tpu.dimension_semantics<arbitrary>], iteration_bounds = array<i64: 2, 2>, scalar_prefetch = 0 : i64, scratch_operands = 1 : i64, tpu.core_type = #tpu.core_type<tc>, window_params = [{transform_indices = @transform_0, window_bounds = array<i64: 256, 256>}, {pipeline_mode = #tpu.pipeline_mode<synchronous>, transform_indices = @transform_1, window_bounds = array<i64: 512, 256>}, {pipeline_mode = #tpu.pipeline_mode<synchronous>, transform_indices = @transform_2, window_bounds = array<i64: 256, 256>}, {pipeline_mode = #tpu.pipeline_mode<synchronous>, transform_indices = @transform_3, window_bounds = array<i64: 1, 256>}, {transform_indices = @transform_4, window_bounds = array<i64: 256, 256>}]} {
    %c0_i32 = arith.constant 0 : i32
    %0 = arith.cmpi eq, %arg1, %c0_i32 : i32
    %1 = arith.extui %0 : i1 to i32
    %c0_i32_0 = arith.constant 0 : i32
    %2 = arith.cmpi ne, %1, %c0_i32_0 : i32
    scf.if %2 {
      %cst_8 = arith.constant 0.000000e+00 : f32
      %15 = vector.broadcast %cst_8 : f32 to vector<256x256xf32>
      %c0_9 = arith.constant 0 : index
      %c0_10 = arith.constant 0 : index
      %16 = vector.load %arg7[%c0_9, %c0_10] : memref<256x256xf32, #tpu.memory_space<vmem>>, vector<256x256xf32>
      tpu.vector_store %arg7[%c0_9, %c0_10], %15 {strides = array<i32>} : memref<256x256xf32, #tpu.memory_space<vmem>>, vector<256x256xf32>,
    } else {
    }
    %c256_i32 = arith.constant 256 : i32
    %3 = arith.muli %arg1, %c256_i32 : i32
    %4 = tpu.assume_multiple %3, 256 : i32
    %5 = arith.index_cast %4 : i32 to index
    %c0 = arith.constant 0 : index
    %6 = vector.load %arg3[%5, %c0] : memref<512x256xbf16, #tpu.memory_space<vmem>>, vector<256x256xbf16>
    %c0_1 = arith.constant 0 : index
    %c0_2 = arith.constant 0 : index
    %7 = vector.load %arg7[%c0_1, %c0_2] : memref<256x256xf32, #tpu.memory_space<vmem>>, vector<256x256xf32>
    %c0_3 = arith.constant 0 : index
    %c0_4 = arith.constant 0 : index
    %8 = vector.load %arg2[%c0_3, %c0_4] : memref<256x256xbf16, #tpu.memory_space<vmem>>, vector<256x256xbf16>
    %cst = arith.constant dense<0.000000e+00> : vector<256x256xf32>
    %9 = tpu.matmul %8, %6, %cst {dimension_numbers = #tpu.dot_dimension_numbers<[1], [0], [0], [1], [0, 0, 1, 1], [], []>} : vector<256x256xbf16>, vector<256x256xbf16>, vector<256x256xf32> -> vector<256x256xf32>
    %10 = arith.addf %7, %9 : vector<256x256xf32>
    %c0_5 = arith.constant 0 : index
    %c0_6 = arith.constant 0 : index
    %11 = vector.load %arg7[%c0_5, %c0_6] : memref<256x256xf32, #tpu.memory_space<vmem>>, vector<256x256xf32>
    tpu.vector_store %arg7[%c0_5, %c0_6], %10 {strides = array<i32>} : memref<256x256xf32, #tpu.memory_space<vmem>>, vector<256x256xf32>,
    %c1_i32 = arith.constant 1 : i32
    %12 = arith.cmpi eq, %arg1, %c1_i32 : i32
    %13 = arith.extui %12 : i1 to i32
    %c0_i32_7 = arith.constant 0 : i32
    %14 = arith.cmpi ne, %13, %c0_i32_7 : i32
    scf.if %14 {
      %c0_8 = arith.constant 0 : index
      %c0_9 = arith.constant 0 : index
      %15 = vector.load %arg7[%c0_8, %c0_9] : memref<256x256xf32, #tpu.memory_space<vmem>>, vector<256x256xf32>
      %16 = arith.truncf %15 : vector<256x256xf32> to vector<256x256xbf16>
      %c0_10 = arith.constant 0 : index
      %c0_11 = arith.constant 0 : index
      %17 = vector.load %arg4[%c0_10, %c0_11] : memref<256x256xbf16, #tpu.memory_space<vmem>>, vector<256x256xbf16>
      %cst_12 = arith.constant dense<0.000000e+00> : vector<256x256xf32>
      %18 = tpu.matmul %16, %17, %cst_12 {dimension_numbers = #tpu.dot_dimension_numbers<[1], [0], [0], [1], [0, 0, 1, 1], [], []>} : vector<256x256xbf16>, vector<256x256xbf16>, vector<256x256xf32> -> vector<256x256xf32>
      %c0_13 = arith.constant 0 : index
      %c0_14 = arith.constant 0 : index
      %19 = vector.load %arg5[%c0_13, %c0_14] : memref<1x256xf32, #tpu.memory_space<vmem>>, vector<1x256xf32>
      %20 = vector.broadcast %19 : vector<1x256xf32> to vector<256x256xf32>
      %21 = arith.addf %18, %20 : vector<256x256xf32>
      %cst_15 = arith.constant 0.000000e+00 : f32
      %22 = vector.broadcast %cst_15 : f32 to vector<256x256xf32>
      %23 = arith.maximumf %21, %22 : vector<256x256xf32>
      %24 = arith.truncf %23 : vector<256x256xf32> to vector<256x256xbf16>
      %c0_16 = arith.constant 0 : index
      %c0_17 = arith.constant 0 : index
      %25 = vector.load %arg6[%c0_16, %c0_17] : memref<256x256xbf16, #tpu.memory_space<vmem>>, vector<256x256xbf16>
      tpu.vector_store %arg6[%c0_16, %c0_17], %24 {strides = array<i32>} : memref<256x256xbf16, #tpu.memory_space<vmem>>, vector<256x256xbf16>,
    } else {
    }
    return
  }
  func.func @transform_0(%arg0: i32, %arg1: i32) -> (i32, i32) {
    %c0_i32 = arith.constant 0 : i32
    return %arg0, %arg1 : i32, i32
  }
  func.func @transform_1(%arg0: i32, %arg1: i32) -> (i32, i32) {
    %c0_i32 = arith.constant 0 : i32
    %c0_i32_0 = arith.constant 0 : i32
    %c0_i32_1 = arith.constant 0 : i32
    return %c0_i32, %c0_i32_0 : i32, i32
  }
  func.func @transform_2(%arg0: i32, %arg1: i32) -> (i32, i32) {
    %c0_i32 = arith.constant 0 : i32
    %c0_i32_0 = arith.constant 0 : i32
    %c0_i32_1 = arith.constant 0 : i32
    return %c0_i32, %c0_i32_0 : i32, i32
  }
  func.func @transform_3(%arg0: i32, %arg1: i32) -> (i32, i32) {
    %c0_i32 = arith.constant 0 : i32
    %c0_i32_0 = arith.constant 0 : i32
    %c0_i32_1 = arith.constant 0 : i32
    return %c0_i32, %c0_i32_0 : i32, i32
  }
  func.func @transform_4(%arg0: i32, %arg1: i32) -> (i32, i32) {
    %c0_i32 = arith.constant 0 : i32
    %c0_i32_0 = arith.constant 0 : i32
    return %arg0, %c0_i32 : i32, i32
  }
}

module attributes {stable_mosaic.version = 11 : i64} {
  func.func @_xw_kernel(%arg0: i32, %arg1: memref<256x256xbf16, #tpu.memory_space<vmem>>, %arg2: memref<256x128xbf16, #tpu.memory_space<vmem>>, %arg3: memref<256x128xbf16, #tpu.memory_space<vmem>>) attributes {dimension_semantics = [#tpu.dimension_semantics<parallel>], iteration_bounds = array<i64: 2>, scalar_prefetch = 0 : i64, scratch_operands = 0 : i64, tpu.core_type = #tpu.core_type<tc>, window_params = [{transform_indices = @transform_0, window_bounds = array<i64: 256, 256>}, {pipeline_mode = #tpu.pipeline_mode<synchronous>, transform_indices = @transform_1, window_bounds = array<i64: 256, 128>}, {transform_indices = @transform_2, window_bounds = array<i64: 256, 128>}]} {
    %c0 = arith.constant 0 : index
    %c0_0 = arith.constant 0 : index
    %0 = vector.load %arg1[%c0, %c0_0] : memref<256x256xbf16, #tpu.memory_space<vmem>>, vector<256x256xbf16>
    %c0_1 = arith.constant 0 : index
    %c0_2 = arith.constant 0 : index
    %1 = vector.load %arg2[%c0_1, %c0_2] : memref<256x128xbf16, #tpu.memory_space<vmem>>, vector<256x128xbf16>
    %cst = arith.constant dense<0.000000e+00> : vector<256x128xf32>
    %2 = tpu.matmul %0, %1, %cst {dimension_numbers = #tpu.dot_dimension_numbers<[1], [0], [0], [1], [0, 0, 1, 1], [], []>} : vector<256x256xbf16>, vector<256x128xbf16>, vector<256x128xf32> -> vector<256x128xf32>
    %3 = arith.truncf %2 : vector<256x128xf32> to vector<256x128xbf16>
    %c0_3 = arith.constant 0 : index
    %c0_4 = arith.constant 0 : index
    %4 = vector.load %arg3[%c0_3, %c0_4] : memref<256x128xbf16, #tpu.memory_space<vmem>>, vector<256x128xbf16>
    tpu.vector_store %arg3[%c0_3, %c0_4], %3 {strides = array<i32>} : memref<256x128xbf16, #tpu.memory_space<vmem>>, vector<256x128xbf16>,
    return
  }
  func.func @transform_0(%arg0: i32) -> (i32, i32) {
    %c0_i32 = arith.constant 0 : i32
    %c0_i32_0 = arith.constant 0 : i32
    return %arg0, %c0_i32 : i32, i32
  }
  func.func @transform_1(%arg0: i32) -> (i32, i32) {
    %c0_i32 = arith.constant 0 : i32
    %c0_i32_0 = arith.constant 0 : i32
    %c0_i32_1 = arith.constant 0 : i32
    return %c0_i32, %c0_i32_0 : i32, i32
  }
  func.func @transform_2(%arg0: i32) -> (i32, i32) {
    %c0_i32 = arith.constant 0 : i32
    %c0_i32_0 = arith.constant 0 : i32
    return %arg0, %c0_i32 : i32, i32
  }
}

module attributes {stable_mosaic.version = 11 : i64} {
  func.func @_agg_kernel(%arg0: i32, %arg1: i32, %arg2: memref<256x256xbf16, #tpu.memory_space<vmem>>, %arg3: memref<512x128xbf16, #tpu.memory_space<vmem>>, %arg4: memref<1x128xf32, #tpu.memory_space<vmem>>, %arg5: memref<256x128xbf16, #tpu.memory_space<vmem>>, %arg6: memref<256x128xf32, #tpu.memory_space<vmem>>) attributes {dimension_semantics = [#tpu.dimension_semantics<parallel>, #tpu.dimension_semantics<arbitrary>], iteration_bounds = array<i64: 2, 2>, scalar_prefetch = 0 : i64, scratch_operands = 1 : i64, tpu.core_type = #tpu.core_type<tc>, window_params = [{transform_indices = @transform_0, window_bounds = array<i64: 256, 256>}, {pipeline_mode = #tpu.pipeline_mode<synchronous>, transform_indices = @transform_1, window_bounds = array<i64: 512, 128>}, {pipeline_mode = #tpu.pipeline_mode<synchronous>, transform_indices = @transform_2, window_bounds = array<i64: 1, 128>}, {transform_indices = @transform_3, window_bounds = array<i64: 256, 128>}]} {
    %c0_i32 = arith.constant 0 : i32
    %0 = arith.cmpi eq, %arg1, %c0_i32 : i32
    %1 = arith.extui %0 : i1 to i32
    %c0_i32_0 = arith.constant 0 : i32
    %2 = arith.cmpi ne, %1, %c0_i32_0 : i32
    scf.if %2 {
      %cst_8 = arith.constant 0.000000e+00 : f32
      %15 = vector.broadcast %cst_8 : f32 to vector<256x128xf32>
      %c0_9 = arith.constant 0 : index
      %c0_10 = arith.constant 0 : index
      %16 = vector.load %arg6[%c0_9, %c0_10] : memref<256x128xf32, #tpu.memory_space<vmem>>, vector<256x128xf32>
      tpu.vector_store %arg6[%c0_9, %c0_10], %15 {strides = array<i32>} : memref<256x128xf32, #tpu.memory_space<vmem>>, vector<256x128xf32>,
    } else {
    }
    %c256_i32 = arith.constant 256 : i32
    %3 = arith.muli %arg1, %c256_i32 : i32
    %4 = tpu.assume_multiple %3, 256 : i32
    %5 = arith.index_cast %4 : i32 to index
    %c0 = arith.constant 0 : index
    %6 = vector.load %arg3[%5, %c0] : memref<512x128xbf16, #tpu.memory_space<vmem>>, vector<256x128xbf16>
    %c0_1 = arith.constant 0 : index
    %c0_2 = arith.constant 0 : index
    %7 = vector.load %arg6[%c0_1, %c0_2] : memref<256x128xf32, #tpu.memory_space<vmem>>, vector<256x128xf32>
    %c0_3 = arith.constant 0 : index
    %c0_4 = arith.constant 0 : index
    %8 = vector.load %arg2[%c0_3, %c0_4] : memref<256x256xbf16, #tpu.memory_space<vmem>>, vector<256x256xbf16>
    %cst = arith.constant dense<0.000000e+00> : vector<256x128xf32>
    %9 = tpu.matmul %8, %6, %cst {dimension_numbers = #tpu.dot_dimension_numbers<[1], [0], [0], [1], [0, 0, 1, 1], [], []>} : vector<256x256xbf16>, vector<256x128xbf16>, vector<256x128xf32> -> vector<256x128xf32>
    %10 = arith.addf %7, %9 : vector<256x128xf32>
    %c0_5 = arith.constant 0 : index
    %c0_6 = arith.constant 0 : index
    %11 = vector.load %arg6[%c0_5, %c0_6] : memref<256x128xf32, #tpu.memory_space<vmem>>, vector<256x128xf32>
    tpu.vector_store %arg6[%c0_5, %c0_6], %10 {strides = array<i32>} : memref<256x128xf32, #tpu.memory_space<vmem>>, vector<256x128xf32>,
    %c1_i32 = arith.constant 1 : i32
    %12 = arith.cmpi eq, %arg1, %c1_i32 : i32
    %13 = arith.extui %12 : i1 to i32
    %c0_i32_7 = arith.constant 0 : i32
    %14 = arith.cmpi ne, %13, %c0_i32_7 : i32
    scf.if %14 {
      %c0_8 = arith.constant 0 : index
      %c0_9 = arith.constant 0 : index
      %15 = vector.load %arg6[%c0_8, %c0_9] : memref<256x128xf32, #tpu.memory_space<vmem>>, vector<256x128xf32>
      %c0_10 = arith.constant 0 : index
      %c0_11 = arith.constant 0 : index
      %16 = vector.load %arg4[%c0_10, %c0_11] : memref<1x128xf32, #tpu.memory_space<vmem>>, vector<1x128xf32>
      %17 = vector.broadcast %16 : vector<1x128xf32> to vector<256x128xf32>
      %18 = arith.addf %15, %17 : vector<256x128xf32>
      %19 = arith.truncf %18 : vector<256x128xf32> to vector<256x128xbf16>
      %c0_12 = arith.constant 0 : index
      %c0_13 = arith.constant 0 : index
      %20 = vector.load %arg5[%c0_12, %c0_13] : memref<256x128xbf16, #tpu.memory_space<vmem>>, vector<256x128xbf16>
      tpu.vector_store %arg5[%c0_12, %c0_13], %19 {strides = array<i32>} : memref<256x128xbf16, #tpu.memory_space<vmem>>, vector<256x128xbf16>,
    } else {
    }
    return
  }
  func.func @transform_0(%arg0: i32, %arg1: i32) -> (i32, i32) {
    %c0_i32 = arith.constant 0 : i32
    return %arg0, %arg1 : i32, i32
  }
  func.func @transform_1(%arg0: i32, %arg1: i32) -> (i32, i32) {
    %c0_i32 = arith.constant 0 : i32
    %c0_i32_0 = arith.constant 0 : i32
    %c0_i32_1 = arith.constant 0 : i32
    return %c0_i32, %c0_i32_0 : i32, i32
  }
  func.func @transform_2(%arg0: i32, %arg1: i32) -> (i32, i32) {
    %c0_i32 = arith.constant 0 : i32
    %c0_i32_0 = arith.constant 0 : i32
    %c0_i32_1 = arith.constant 0 : i32
    return %c0_i32, %c0_i32_0 : i32, i32
  }
  func.func @transform_3(%arg0: i32, %arg1: i32) -> (i32, i32) {
    %c0_i32 = arith.constant 0 : i32
    %c0_i32_0 = arith.constant 0 : i32
    return %arg0, %c0_i32 : i32, i32
  }
}

</mosaic_0001>

<bundles_post_ra>
// kernel: gcn_forward.6
= control target key start
LH: loop header
LB: loop body
LE: loop exit
PB: predicated region body
PF: predicated region fallthrough
CT: control target
= control target key end

     0   :  { %s1163_s9 = smov 0   ;;  %s1316_s0 = inlined_call_operand.vmem [shape: bf16[512,256], index: 0, kind: input, shape index: {}]   ;;  %s1317_s1 = inlined_call_operand.vmem [shape: bf16[256,128], index: 1, kind: input, shape index: {}]   ;;  %s1318_s2 = inlined_call_operand.vmem [shape: bf16[512,128], index: 2, kind: output, shape index: {}]  }
   0x1 LB: > { %s768_s10 = sadd.s32 4294967295, %s1146_s9   ;;  %p772_p0 = scmp.ge.s32.totalorder %s1146_s9, 1  ;;  %s1146_s9 = sphi %s1163_s9, %s12_s9  }
   0x2   : > { %p114_p1 = scmp.lt.s32.totalorder %s1146_s9, 3 }
   0x4   : > { %p115_p2 = pnand %p772_p0, %p114_p1 }
   0x5   : > { %s773_s23 = sshll.u32 (!%p115_p2), %s768_s10, 5 }
   0x6   : > { %118 = sbr.rel (%p115_p2) target bundleno = 301 (0x12d), region = 28  ;;  %p138_p3 = scmp.lt.s32.totalorder (!%p115_p2), %s773_s23, 63 }
   0xb   : > { %v1012_v0 = vld [vmem:[%s1317_s1 + $0x38] sm:$0xff]  ;;  %v1011_v2 = vld [vmem:[%s1317_s1 + $0x30] sm:$0xff]  ;;  %v1010_v4 = vld [vmem:[%s1317_s1 + $0x28] sm:$0xff]  ;;  %s1320_s23 = smov (!%p138_p3, %s773_s23), 63 }
   0xc   : > { %v1020_v1 = vld [vmem:[%s1317_s1 + $0x78] sm:$0xff]  ;;  %470 = vmatpush.bf16.msra.mxu0 %v1012_v0  ;;  %1116 = vmatpush.bf16.msra.mxu2 %v1012_v0  ;;  %v1019_v3 = vld [vmem:[%s1317_s1 + $0x70] sm:$0xff]  ;;  %v1018_v5 = vld [vmem:[%s1317_s1 + $0x68] sm:$0xff]  ;;  %s972_s8 = sshll.u32 %s1320_s23, 3  ;;  %s777_s21 = sshll.u32 %s1320_s23, 2 }
   0xd   : > { %559 = vmatpush.bf16.msra.mxu1 %v1020_v1  ;;  %1124 = vmatpush.bf16.msra.mxu3 %v1020_v1  ;;  %v1009_v6 = vld [vmem:[%s1317_s1 + $0x20] sm:$0xff]  ;;  %v1008_v8 = vld [vmem:[%s1317_s1 + $0x18] sm:$0xff]  ;;  %v1007_v10 = vld [vmem:[%s1317_s1 + $0x10] sm:$0xff]  ;;  %s1216_s14 = scalar_lea.vmem %s1316_s0, %s972_s8  ;;  %s1295_s25 = scalar_lea.vmem %s1318_s2, %s777_s21 }
   0xe   : > { %v1017_v7 = vld [vmem:[%s1317_s1 + $0x60] sm:$0xff]  ;;  %v1016_v9 = vld [vmem:[%s1317_s1 + $0x58] sm:$0xff]  ;;  %v1015_v11 = vld [vmem:[%s1317_s1 + $0x50] sm:$0xff] }
   0xf   : > { %v1006_v12 = vld [vmem:[%s1317_s1 + $0x8] sm:$0xff]  ;;  %v1005_v14 = vld [vmem:[%s1317_s1] sm:$0xff]  ;;  %v788_v28 = vld [vmem:[%s1216_s14 + $0x10] sm:$0xf] }
  0x10   : > { %471 = vmatpush.bf16.msra.mxu0 %v1011_v2  ;;  %1117 = vmatpush.bf16.msra.mxu2 %v1011_v2  ;;  %v1014_v13 = vld [vmem:[%s1317_s1 + $0x48] sm:$0xff]  ;;  %v1013_v15 = vld [vmem:[%s1317_s1 + $0x40] sm:$0xff]  ;;  %v976_v29 = vld [vmem:[%s1216_s14 + $0x14] sm:$0xf0] }
  0x11   : > { %560 = vmatpush.bf16.msra.mxu1 %v1019_v3  ;;  %1125 = vmatpush.bf16.msra.mxu3 %v1019_v3  ;;  %v780_v16 = vld [vmem:[%s1216_s14] sm:$0xf]  ;;  %v974_v17 = vld [vmem:[%s1216_s14 + $0x4] sm:$0xf0]  ;;  %v973_v20 = vld [vmem:[%s1216_s14 + $0x4] sm:$0xf]  ;;  %v789_v36 = vor.u32 %v976_v29, %v788_v28 }
  0x12   : > { %v844_v18 = vld [vmem:[%s1216_s14 + $0x80] sm:$0xf]  ;;  %v990_v19 = vld [vmem:[%s1216_s14 + $0x84] sm:$0xf0]  ;;  %v782_v21 = vld [vmem:[%s1216_s14 + $0x8] sm:$0xf0]  ;;  %v781_v24 = vor.u32 %v974_v17, %v780_v16 }
  0x13   : > { %v989_v22 = vld [vmem:[%s1216_s14 + $0x84] sm:$0xf]  ;;  %v846_v23 = vld [vmem:[%s1216_s14 + $0x88] sm:$0xf0]  ;;  %v845_v25 = vor.u32 %v990_v19, %v844_v18  ;;  %v785_v26 = vor.u32 %v973_v20, %v782_v21  ;;  %v852_v30 = vld [vmem:[%s1216_s14 + $0x90] sm:$0xf] }
  0x14   : > { %472 = vmatpush.bf16.msra.mxu0 %v1010_v4  ;;  %1118 = vmatpush.bf16.msra.mxu2 %v1010_v4  ;;  %v849_v27 = vor.u32 %v989_v22, %v846_v23  ;;  %v992_v31 = vld [vmem:[%s1216_s14 + $0x94] sm:$0xf0]  ;;  %v975_v32 = vld [vmem:[%s1216_s14 + $0x14] sm:$0xf]  ;;  %v790_v33 = vld [vmem:[%s1216_s14 + $0x18] sm:$0xf0] }
  0x15   : > { %561 = vmatpush.bf16.msra.mxu1 %v1018_v5  ;;  %1126 = vmatpush.bf16.msra.mxu3 %v1018_v5  ;;  %v991_v34 = vld [vmem:[%s1216_s14 + $0x94] sm:$0xf]  ;;  %v854_v35 = vld [vmem:[%s1216_s14 + $0x98] sm:$0xf0]  ;;  %v853_v37 = vor.u32 %v992_v31, %v852_v30  ;;  %v793_v38 = vor.u32 %v975_v32, %v790_v33  ;;  %v796_v40 = vld [vmem:[%s1216_s14 + $0x20] sm:$0xf] }
  0x16   : > { %v857_v39 = vor.u32 %v991_v34, %v854_v35  ;;  %v978_v41 = vld [vmem:[%s1216_s14 + $0x24] sm:$0xf0]  ;;  %v860_v42 = vld [vmem:[%s1216_s14 + $0xa0] sm:$0xf]  ;;  %v977_v44 = vld [vmem:[%s1216_s14 + $0x24] sm:$0xf] }
  0x17   : > { %v994_v43 = vld [vmem:[%s1216_s14 + $0xa4] sm:$0xf0]  ;;  %v798_v45 = vld [vmem:[%s1216_s14 + $0x28] sm:$0xf0]  ;;  %v993_v46 = vld [vmem:[%s1216_s14 + $0xa4] sm:$0xf]  ;;  %v797_v48 = vor.u32 %v978_v41, %v796_v40 }
  0x18   : > { %473 = vmatpush.bf16.msra.mxu0 %v1009_v6  ;;  %1119 = vmatpush.bf16.msra.mxu2 %v1009_v6  ;;  %v862_v47 = vld [vmem:[%s1216_s14 + $0xa8] sm:$0xf0]  ;;  %v861_v49 = vor.u32 %v994_v43, %v860_v42  ;;  %v801_v50 = vor.u32 %v977_v44, %v798_v45  ;;  %v804_v52 = vld [vmem:[%s1216_s14 + $0x30] sm:$0xf]  ;;  %v980_v53 = vld [vmem:[%s1216_s14 + $0x34] sm:$0xf0] }
  0x19   : > { %562 = vmatpush.bf16.msra.mxu1 %v1017_v7  ;;  %1127 = vmatpush.bf16.msra.mxu3 %v1017_v7  ;;  %v865_v51 = vor.u32 %v993_v46, %v862_v47  ;;  %v868_v54 = vld [vmem:[%s1216_s14 + $0xb0] sm:$0xf]  ;;  %v996_v55 = vld [vmem:[%s1216_s14 + $0xb4] sm:$0xf0]  ;;  %v979_v56 = vld [vmem:[%s1216_s14 + $0x34] sm:$0xf]  ;;  %v805_v60 = vor.u32 %v980_v53, %v804_v52 }
  0x1a   : > { %v806_v57 = vld [vmem:[%s1216_s14 + $0x38] sm:$0xf0]  ;;  %v995_v58 = vld [vmem:[%s1216_s14 + $0xb4] sm:$0xf]  ;;  %v869_v61 = vor.u32 %v996_v55, %v868_v54  ;;  %v812_v0 = vld [vmem:[%s1216_s14 + $0x40] sm:$0xf] }
  0x1b   : > { %v870_v59 = vld [vmem:[%s1216_s14 + $0xb8] sm:$0xf0]  ;;  %v809_v62 = vor.u32 %v979_v56, %v806_v57  ;;  %v982_v1 = vld [vmem:[%s1216_s14 + $0x44] sm:$0xf0]  ;;  %v876_v2 = vld [vmem:[%s1216_s14 + $0xc0] sm:$0xf] }
  0x1c   : > { %474 = vmatpush.bf16.msra.mxu0 %v1008_v8  ;;  %1120 = vmatpush.bf16.msra.mxu2 %v1008_v8  ;;  %v873_v63 = vor.u32 %v995_v58, %v870_v59  ;;  %v998_v3 = vld [vmem:[%s1216_s14 + $0xc4] sm:$0xf0]  ;;  %v981_v4 = vld [vmem:[%s1216_s14 + $0x44] sm:$0xf]  ;;  %v814_v5 = vld [vmem:[%s1216_s14 + $0x48] sm:$0xf0]  ;;  %v813_v8 = vor.u32 %v982_v1, %v812_v0 }
  0x1d   : > { %563 = vmatpush.bf16.msra.mxu1 %v1016_v9  ;;  %1128 = vmatpush.bf16.msra.mxu3 %v1016_v9  ;;  %v997_v6 = vld [vmem:[%s1216_s14 + $0xc4] sm:$0xf]  ;;  %v878_v7 = vld [vmem:[%s1216_s14 + $0xc8] sm:$0xf0]  ;;  %v877_v9 = vor.u32 %v998_v3, %v876_v2  ;;  %v983_v16 = vld [vmem:[%s1216_s14 + $0x54] sm:$0xf] }
  0x1e   : > { %v822_v17 = vld [vmem:[%s1216_s14 + $0x58] sm:$0xf0]  ;;  %v999_v18 = vld [vmem:[%s1216_s14 + $0xd4] sm:$0xf]  ;;  %v985_v28 = vld [vmem:[%s1216_s14 + $0x64] sm:$0xf] }
  0x1f   : > { %v886_v19 = vld [vmem:[%s1216_s14 + $0xd8] sm:$0xf0]  ;;  %v825_v22 = vor.u32 %v983_v16, %v822_v17  ;;  %v830_v29 = vld [vmem:[%s1216_s14 + $0x68] sm:$0xf0]  ;;  %v1001_v30 = vld [vmem:[%s1216_s14 + $0xe4] sm:$0xf] }
  0x20   : > { %475 = vmatpush.bf16.msra.mxu0 %v1007_v10  ;;  %1121 = vmatpush.bf16.msra.mxu2 %v1007_v10  ;;  %v817_v10 = vor.u32 %v981_v4, %v814_v5  ;;  %v889_v23 = vor.u32 %v999_v18, %v886_v19  ;;  %v894_v31 = vld [vmem:[%s1216_s14 + $0xe8] sm:$0xf0]  ;;  %v833_v34 = vor.u32 %v985_v28, %v830_v29  ;;  %v987_v40 = vld [vmem:[%s1216_s14 + $0x74] sm:$0xf]  ;;  %v838_v41 = vld [vmem:[%s1216_s14 + $0x78] sm:$0xf0] }
  0x21   : > { %564 = vmatpush.bf16.msra.mxu1 %v1015_v11  ;;  %1129 = vmatpush.bf16.msra.mxu3 %v1015_v11  ;;  %v881_v11 = vor.u32 %v997_v6, %v878_v7  ;;  %v897_v35 = vor.u32 %v1001_v30, %v894_v31  ;;  %v1003_v42 = vld [vmem:[%s1216_s14 + $0xf4] sm:$0xf]  ;;  %v902_v43 = vld [vmem:[%s1216_s14 + $0xf8] sm:$0xf0]  ;;  %v841_v46 = vor.u32 %v987_v40, %v838_v41 }
  0x22   : > { %v905_v47 = vor.u32 %v1003_v42, %v902_v43 }
  0x24   : > { %476 = vmatpush.bf16.msra.mxu0 %v1006_v12  ;;  %1122 = vmatpush.bf16.msra.mxu2 %v1006_v12  ;;  %v820_v12 = vld [vmem:[%s1216_s14 + $0x50] sm:$0xf] }
  0x25   : > { %565 = vmatpush.bf16.msra.mxu1 %v1014_v13  ;;  %1130 = vmatpush.bf16.msra.mxu3 %v1014_v13  ;;  %v984_v13 = vld [vmem:[%s1216_s14 + $0x54] sm:$0xf0] }
  0x26   : > { %v821_v20 = vor.u32 %v984_v13, %v820_v12 }
  0x28   : > { %477 = vmatpush.bf16.msra.mxu0 %v1005_v14  ;;  %1123 = vmatpush.bf16.msra.mxu2 %v1005_v14  ;;  %v884_v14 = vld [vmem:[%s1216_s14 + $0xd0] sm:$0xf] }
  0x29   : > { %566 = vmatpush.bf16.msra.mxu1 %v1013_v15  ;;  %1131 = vmatpush.bf16.msra.mxu3 %v1013_v15  ;;  %v1000_v15 = vld [vmem:[%s1216_s14 + $0xd4] sm:$0xf0] }
  0x2a   : > { %v885_v21 = vor.u32 %v1000_v15, %v884_v14 }
  0x2b   : > { %478 = vmatmul.bf16.vlgmr.msra.gmra.mxu0 %v781_v24  ;;  %518 = vmatmul.bf16.vlgmr.msra.gmra.mxu2 %v845_v25  ;;  %v828_v24 = vld [vmem:[%s1216_s14 + $0x60] sm:$0xf]  ;;  %v986_v25 = vld [vmem:[%s1216_s14 + $0x64] sm:$0xf0] }
  0x2c   : > { %567 = vmatmul.bf16.vlgmr.msra.gmra.mxu1 %v785_v26  ;;  %607 = vmatmul.bf16.vlgmr.msra.gmra.mxu3 %v849_v27  ;;  %v892_v26 = vld [vmem:[%s1216_s14 + $0xe0] sm:$0xf]  ;;  %v1002_v27 = vld [vmem:[%s1216_s14 + $0xe4] sm:$0xf0]  ;;  %v829_v32 = vor.u32 %v986_v25, %v828_v24 }
  0x2d   : > { %v893_v33 = vor.u32 %v1002_v27, %v892_v26 }
  0x3b   : > { %483 = vmatmul.bf16.gmra.mxu0 %v789_v36  ;;  %523 = vmatmul.bf16.gmra.mxu2 %v853_v37  ;;  %v836_v36 = vld [vmem:[%s1216_s14 + $0x70] sm:$0xf]  ;;  %v988_v37 = vld [vmem:[%s1216_s14 + $0x74] sm:$0xf0] }
  0x3c   : > { %572 = vmatmul.bf16.gmra.mxu1 %v793_v38  ;;  %612 = vmatmul.bf16.gmra.mxu3 %v857_v39  ;;  %v900_v38 = vld [vmem:[%s1216_s14 + $0xf0] sm:$0xf]  ;;  %v1004_v39 = vld [vmem:[%s1216_s14 + $0xf4] sm:$0xf0]  ;;  %v837_v44 = vor.u32 %v988_v37, %v836_v36 }
  0x3d   : > { %v901_v45 = vor.u32 %v1004_v39, %v900_v38 }
  0x4b   : > { %488 = vmatmul.bf16.gmra.mxu0 %v797_v48  ;;  %528 = vmatmul.bf16.gmra.mxu2 %v861_v49 }
  0x4c   : > { %577 = vmatmul.bf16.gmra.mxu1 %v801_v50  ;;  %617 = vmatmul.bf16.gmra.mxu3 %v865_v51 }
  0x5b   : > { %493 = vmatmul.bf16.gmra.mxu0 %v805_v60  ;;  %533 = vmatmul.bf16.gmra.mxu2 %v869_v61 }
  0x5c   : > { %582 = vmatmul.bf16.gmra.mxu1 %v809_v62  ;;  %622 = vmatmul.bf16.gmra.mxu3 %v873_v63 }
  0x6b   : > { %498 = vmatmul.bf16.gmra.mxu0 %v813_v8  ;;  %538 = vmatmul.bf16.gmra.mxu2 %v877_v9 }
  0x6c   : > { %587 = vmatmul.bf16.gmra.mxu1 %v817_v10  ;;  %627 = vmatmul.bf16.gmra.mxu3 %v881_v11 }
  0x7b   : > { %503 = vmatmul.bf16.gmra.mxu0 %v821_v20  ;;  %543 = vmatmul.bf16.gmra.mxu2 %v885_v21 }
  0x7c   : > { %592 = vmatmul.bf16.gmra.mxu1 %v825_v22  ;;  %632 = vmatmul.bf16.gmra.mxu3 %v889_v23 }
  0x8b   : > { %508 = vmatmul.bf16.gmra.mxu0 %v829_v32  ;;  %548 = vmatmul.bf16.gmra.mxu2 %v893_v33 }
  0x8c   : > { %597 = vmatmul.bf16.gmra.mxu1 %v833_v34  ;;  %637 = vmatmul.bf16.gmra.mxu3 %v897_v35 }
  0x9b   : > { %513 = vmatmul.bf16.gmra.mxu0 %v837_v44  ;;  %553 = vmatmul.bf16.gmra.mxu2 %v901_v45 }
  0x9c   : > { %602 = vmatmul.bf16.gmra.mxu1 %v841_v46  ;;  %642 = vmatmul.bf16.gmra.mxu3 %v905_v47 }
  0xa8   : > { %v479_v48 = vpop.f32.mrf.mxu0 }
  0xa9   : > { %v568_v49 = vpop.f32.mrf.mxu1 }
  0xaa   : > { %v569_v54 = vadd.f32 %v568_v49, %v479_v48 }
  0xae   : > { %v519_v50 = vpop.f32.mrf.mxu2 }
  0xaf   : > { %v608_v51 = vpop.f32.mrf.mxu3 }
  0xb0   : > { %v481_v52 = vpop.f32.mrf.mxu0  ;;  %v609_v59 = vadd.f32 %v608_v51, %v519_v50 }
  0xb1   : > { %v570_v53 = vpop.f32.mrf.mxu1 }
  0xb2   : > { %v571_v55 = vadd.f32 %v570_v53, %v481_v52 }
  0xb4   : > { %v1024_v56 = vpack.c.bf16 %v571_v55, %v569_v54 }
  0xb6   : > { %1025 = vst [vmem:[%s1295_s25] sm:$0xff] %v1024_v56   ;;  %v521_v57 = vpop.f32.mrf.mxu2 }
  0xb7   : > { %v610_v58 = vpop.f32.mrf.mxu3 }
  0xb8   : > { %v611_v60 = vadd.f32 %v610_v58, %v521_v57  ;;  %v484_v61 = vpop.f32.mrf.mxu0 }
  0xb9   : > { %v573_v62 = vpop.f32.mrf.mxu1 }
  0xba   : > { %v1064_v63 = vpack.c.bf16 %v611_v60, %v609_v59  ;;  %v574_v4 = vadd.f32 %v573_v62, %v484_v61 }
  0xbc   : > { %1108 = vst [vmem:[%s1295_s25 + $0x40] sm:$0xff] %v1064_v63  }
  0xbe   : > { %v524_v0 = vpop.f32.mrf.mxu2 }
  0xbf   : > { %v613_v1 = vpop.f32.mrf.mxu3 }
  0xc0   : > { %v486_v2 = vpop.f32.mrf.mxu0  ;;  %v614_v9 = vadd.f32 %v613_v1, %v524_v0 }
  0xc1   : > { %v575_v3 = vpop.f32.mrf.mxu1 }
  0xc2   : > { %v576_v5 = vadd.f32 %v575_v3, %v486_v2 }
  0xc4   : > { %v1029_v6 = vpack.c.bf16 %v576_v5, %v574_v4 }
  0xc6   : > { %1101 = vst [vmem:[%s1295_s25 + $0x8] sm:$0xff] %v1029_v6   ;;  %v526_v7 = vpop.f32.mrf.mxu2 }
  0xc7   : > { %v615_v8 = vpop.f32.mrf.mxu3 }
  0xc8   : > { %v616_v10 = vadd.f32 %v615_v8, %v526_v7  ;;  %v489_v11 = vpop.f32.mrf.mxu0 }
  0xc9   : > { %v578_v12 = vpop.f32.mrf.mxu1 }
  0xca   : > { %v1069_v13 = vpack.c.bf16 %v616_v10, %v614_v9  ;;  %v579_v18 = vadd.f32 %v578_v12, %v489_v11 }
  0xcc   : > { %1109 = vst [vmem:[%s1295_s25 + $0x48] sm:$0xff] %v1069_v13  }
  0xce   : > { %v529_v14 = vpop.f32.mrf.mxu2 }
  0xcf   : > { %v618_v15 = vpop.f32.mrf.mxu3 }
  0xd0   : > { %v491_v16 = vpop.f32.mrf.mxu0  ;;  %v619_v23 = vadd.f32 %v618_v15, %v529_v14 }
  0xd1   : > { %v580_v17 = vpop.f32.mrf.mxu1 }
  0xd2   : > { %v581_v19 = vadd.f32 %v580_v17, %v491_v16 }
  0xd4   : > { %v1034_v20 = vpack.c.bf16 %v581_v19, %v579_v18 }
  0xd6   : > { %1102 = vst [vmem:[%s1295_s25 + $0x10] sm:$0xff] %v1034_v20   ;;  %v531_v21 = vpop.f32.mrf.mxu2 }
  0xd7   : > { %v620_v22 = vpop.f32.mrf.mxu3 }
  0xd8   : > { %v621_v24 = vadd.f32 %v620_v22, %v531_v21  ;;  %v494_v25 = vpop.f32.mrf.mxu0 }
  0xd9   : > { %v583_v26 = vpop.f32.mrf.mxu1 }
  0xda   : > { %v1074_v27 = vpack.c.bf16 %v621_v24, %v619_v23  ;;  %v584_v32 = vadd.f32 %v583_v26, %v494_v25 }
  0xdc   : > { %1110 = vst [vmem:[%s1295_s25 + $0x50] sm:$0xff] %v1074_v27  }
  0xde   : > { %v534_v28 = vpop.f32.mrf.mxu2 }
  0xdf   : > { %v623_v29 = vpop.f32.mrf.mxu3 }
  0xe0   : > { %v496_v30 = vpop.f32.mrf.mxu0  ;;  %v624_v37 = vadd.f32 %v623_v29, %v534_v28 }
  0xe1   : > { %v585_v31 = vpop.f32.mrf.mxu1 }
  0xe2   : > { %v586_v33 = vadd.f32 %v585_v31, %v496_v30 }
  0xe4   : > { %v1039_v34 = vpack.c.bf16 %v586_v33, %v584_v32 }
  0xe6   : > { %1103 = vst [vmem:[%s1295_s25 + $0x18] sm:$0xff] %v1039_v34   ;;  %v536_v35 = vpop.f32.mrf.mxu2 }
  0xe7   : > { %v625_v36 = vpop.f32.mrf.mxu3 }
  0xe8   : > { %v626_v38 = vadd.f32 %v625_v36, %v536_v35  ;;  %v499_v39 = vpop.f32.mrf.mxu0 }
  0xe9   : > { %v588_v40 = vpop.f32.mrf.mxu1 }
  0xea   : > { %v1079_v41 = vpack.c.bf16 %v626_v38, %v624_v37  ;;  %v589_v46 = vadd.f32 %v588_v40, %v499_v39 }
  0xec   : > { %1111 = vst [vmem:[%s1295_s25 + $0x58] sm:$0xff] %v1079_v41  }
  0xee   : > { %v539_v42 = vpop.f32.mrf.mxu2 }
  0xef   : > { %v628_v43 = vpop.f32.mrf.mxu3 }
  0xf0   : > { %v501_v44 = vpop.f32.mrf.mxu0  ;;  %v629_v51 = vadd.f32 %v628_v43, %v539_v42 }
  0xf1   : > { %v590_v45 = vpop.f32.mrf.mxu1 }
  0xf2   : > { %v591_v47 = vadd.f32 %v590_v45, %v501_v44 }
  0xf4   : > { %v1044_v48 = vpack.c.bf16 %v591_v47, %v589_v46 }
  0xf6   : > { %1104 = vst [vmem:[%s1295_s25 + $0x20] sm:$0xff] %v1044_v48   ;;  %v541_v49 = vpop.f32.mrf.mxu2 }
  0xf7   : > { %v630_v50 = vpop.f32.mrf.mxu3 }
  0xf8   : > { %v631_v52 = vadd.f32 %v630_v50, %v541_v49  ;;  %v504_v53 = vpop.f32.mrf.mxu0 }
  0xf9   : > { %v593_v54 = vpop.f32.mrf.mxu1 }
  0xfa   : > { %v1084_v55 = vpack.c.bf16 %v631_v52, %v629_v51  ;;  %v594_v60 = vadd.f32 %v593_v54, %v504_v53 }
  0xfc   : > { %1112 = vst [vmem:[%s1295_s25 + $0x60] sm:$0xff] %v1084_v55  }
  0xfe   : > { %v544_v56 = vpop.f32.mrf.mxu2 }
  0xff   : > { %v633_v57 = vpop.f32.mrf.mxu3 }
 0x100   : > { %v506_v58 = vpop.f32.mrf.mxu0  ;;  %v634_v1 = vadd.f32 %v633_v57, %v544_v56 }
 0x101   : > { %v595_v59 = vpop.f32.mrf.mxu1 }
 0x102   : > { %v596_v61 = vadd.f32 %v595_v59, %v506_v58 }
 0x104   : > { %v1049_v62 = vpack.c.bf16 %v596_v61, %v594_v60 }
 0x106   : > { %1105 = vst [vmem:[%s1295_s25 + $0x28] sm:$0xff] %v1049_v62   ;;  %v546_v63 = vpop.f32.mrf.mxu2 }
 0x107   : > { %v635_v0 = vpop.f32.mrf.mxu3 }
 0x108   : > { %v636_v2 = vadd.f32 %v635_v0, %v546_v63  ;;  %v509_v3 = vpop.f32.mrf.mxu0 }
 0x109   : > { %v598_v4 = vpop.f32.mrf.mxu1 }
 0x10a   : > { %v1089_v5 = vpack.c.bf16 %v636_v2, %v634_v1  ;;  %v599_v10 = vadd.f32 %v598_v4, %v509_v3 }
 0x10c   : > { %1113 = vst [vmem:[%s1295_s25 + $0x68] sm:$0xff] %v1089_v5  }
 0x10e   : > { %v549_v6 = vpop.f32.mrf.mxu2 }
 0x10f   : > { %v638_v7 = vpop.f32.mrf.mxu3 }
 0x110   : > { %v511_v8 = vpop.f32.mrf.mxu0  ;;  %v639_v15 = vadd.f32 %v638_v7, %v549_v6 }
 0x111   : > { %v600_v9 = vpop.f32.mrf.mxu1 }
 0x112   : > { %v601_v11 = vadd.f32 %v600_v9, %v511_v8 }
 0x114   : > { %v1054_v12 = vpack.c.bf16 %v601_v11, %v599_v10 }
 0x116   : > { %1106 = vst [vmem:[%s1295_s25 + $0x30] sm:$0xff] %v1054_v12   ;;  %v551_v13 = vpop.f32.mrf.mxu2 }
 0x117   : > { %v640_v14 = vpop.f32.mrf.mxu3 }
 0x118   : > { %v641_v16 = vadd.f32 %v640_v14, %v551_v13  ;;  %v514_v17 = vpop.f32.mrf.mxu0 }
 0x119   : > { %v603_v18 = vpop.f32.mrf.mxu1 }
 0x11a   : > { %v1094_v19 = vpack.c.bf16 %v641_v16, %v639_v15  ;;  %v604_v24 = vadd.f32 %v603_v18, %v514_v17 }
 0x11c   : > { %1114 = vst [vmem:[%s1295_s25 + $0x70] sm:$0xff] %v1094_v19  }
 0x11e   : > { %v554_v20 = vpop.f32.mrf.mxu2 }
 0x11f   : > { %v643_v21 = vpop.f32.mrf.mxu3 }
 0x120   : > { %v516_v22 = vpop.f32.mrf.mxu0  ;;  %v644_v29 = vadd.f32 %v643_v21, %v554_v20 }
 0x121   : > { %v605_v23 = vpop.f32.mrf.mxu1 }
 0x122   : > { %v606_v25 = vadd.f32 %v605_v23, %v516_v22 }
 0x124   : > { %v1059_v26 = vpack.c.bf16 %v606_v25, %v604_v24 }
 0x126   : > { %1107 = vst [vmem:[%s1295_s25 + $0x38] sm:$0xff] %v1059_v26   ;;  %v556_v27 = vpop.f32.mrf.mxu2 }
 0x127   : > { %v645_v28 = vpop.f32.mrf.mxu3 }
 0x128   : > { %v646_v30 = vadd.f32 %v645_v28, %v556_v27 }
 0x12a   : > { %v1099_v31 = vpack.c.bf16 %v646_v30, %v644_v29 }
 0x12c   : > { %1115 = vst [vmem:[%s1295_s25 + $0x78] sm:$0xff] %v1099_v31  }
 0x12d PF: > { %s12_s9 = sadd.s32 1, %s1146_s9  }
 0x12e   : > { %p9_p4 = scmp.ge.s32.totalorder %s12_s9, 4  }
 0x130   :  { %11 = sbr.rel (!%p9_p4) target bundleno = 1 (0x1), region = 58 }

// kernel: gcn_forward.7
= control target key start
LH: loop header
LB: loop body
LE: loop exit
PB: predicated region body
PF: predicated region fallthrough
CT: control target
= control target key end

     0   :  { %s1707_s12 = smov 0   ;;  %s1709_s13 = smov 0   ;;  %s2008_s0 = inlined_call_operand.vmem [shape: bf16[512,512], index: 0, kind: input, shape index: {}]   ;;  %s2009_s1 = inlined_call_operand.vmem [shape: bf16[512,128], index: 1, kind: input, shape index: {}]   ;;  %s2010_s2 = inlined_call_operand.vmem [shape: f32[1,128], index: 2, kind: input, shape index: {}]   ;;  %s2011_s3 = inlined_call_operand.vmem [shape: bf16[512,128], index: 3, kind: output, shape index: {}]  }
   0x1   :  { %s1711_s14 = smov 0   ;;  %s1713_s15 = smov 0  }
   0x2   :  { %s1715_s16 = smov 0   ;;  %s1717_s17 = smov 0  }
   0x3   :  { %s1719_s18 = smov 0  }
   0x4 LB: > { %s22_s19 = sadd.s32 1, %s1676_s16  ;;  %s25_s20 = sadd.s32 1, %s1680_s17  ;;  %s1684_s18 = sphi %s1719_s18, %s13_s18   ;;  %s1680_s17 = sphi %s1717_s17, %s2017_s17   ;;  %s1676_s16 = sphi %s1715_s16, %s2016_s16   ;;  %s1672_s15 = sphi %s1713_s15, %s2015_s15   ;;  %s1668_s14 = sphi %s1711_s14, %s2014_s14   ;;  %s1664_s13 = sphi %s1709_s13, %s2013_s13   ;;  %s1660_s12 = sphi %s1707_s12, %s2012_s12  }
   0x5   : > { %p23_p0 = scmp.ge.s32.totalorder %s22_s19, 2  ;;  %p41_p1 = scmp.ne.s32.totalorder %s1664_s13, %s1660_s12 }
   0x6   : > { %p42_p2 = scmp.eq.s32.totalorder %s1684_s18, 0  ;;  %s34_s24 = sadd.s32 1, %s1664_s13 }
   0x7   : > { %s2019_s19 = smov (%p23_p0, %s22_s19), 0  ;;  %s2021_s20 = smov (!%p23_p0, %s25_s20), %s1680_s17 }
   0x8   : > { %p43_p3 = por %p42_p2, %p41_p1  ;;  %p27_p4 = scmp.ge.s32.totalorder %s2021_s20, 2 }
   0x9   : > { %s30_s21 = ssub.s32 %s1676_s16, %s2019_s19  ;;  %p1204_p6 = scmp.ge.s32.totalorder %s1684_s18, 4 }
   0xa   : > { %s2023_s20 = smov (%p27_p4, %s2021_s20), 0 }
   0xb   : > { %s29_s22 = ssub.s32 %s1680_s17, %s2023_s20  ;;  %141 = sbr.rel (%p1204_p6) target bundleno = 55 (0x37), region = 24 }
   0xc   : > { %s31_s23 = sor.u32 %s30_s21, %s29_s22 }
   0xd   : > { %p32_p5 = scmp.eq.s32.totalorder %s31_s23, 0 }
   0xf   : > { %s1758_s25 = scalar_select %p32_p5, %s1664_s13, %s34_s24  }
  0x10   : > { %144 = sbr.rel (!%p43_p3) target bundleno = 55 (0x37), region = 28  ;;  %s146_s26 = sand.u32 (%p43_p3), 1, %s1664_s13  }
  0x11   : > { %s1207_s27 = sshll.u32 (%p43_p3), %s1676_s16, 1  ;;  %s1205_s28 = sshll.u32 (%p43_p3), %s146_s26, 8 }
  0x12   : > { %s1412_s29 = sshll.u32 (%p43_p3), %s1680_s17, 7  ;;  %s1772_s8 = scalar_lea.vmem (%p43_p3), [#allocation3], %s1205_s28 }
  0x13   : > { %s152_s30 = sadd.s32 (%p43_p3), %s1412_s29, %s1207_s27 }
  0x14   : > { %s1209_s4 = sshll.u32 (%p43_p3), %s152_s30, 2 }
  0x15   : > { %s1767_s7 = scalar_lea.vmem %s2008_s0, %s1209_s4 }
  0x16   : > { %v245_v0 = vld [vmem:[%s1767_s7] sm:$0xff]  ;;  %v247_v1 = vld [vmem:[%s1767_s7 + $0x10] sm:$0xff] }
  0x17   : > { %v249_v2 = vld [vmem:[%s1767_s7 + $0x20] sm:$0xff]  ;;  %246 = vst [vmem:[%s1772_s8] sm:$0xff] %v245_v0  ;;  %v251_v3 = vld [vmem:[%s1767_s7 + $0x30] sm:$0xff] }
  0x18   : > { %248 = vst [vmem:[%s1772_s8 + $0x8] sm:$0xff] %v247_v1  ;;  %v253_v4 = vld [vmem:[%s1767_s7 + $0x40] sm:$0xff]  ;;  %v255_v5 = vld [vmem:[%s1767_s7 + $0x50] sm:$0xff] }
  0x19   : > { %250 = vst [vmem:[%s1772_s8 + $0x10] sm:$0xff] %v249_v2  ;;  %v257_v6 = vld [vmem:[%s1767_s7 + $0x60] sm:$0xff]  ;;  %v259_v7 = vld [vmem:[%s1767_s7 + $0x70] sm:$0xff] }
  0x1a   : > { %252 = vst [vmem:[%s1772_s8 + $0x18] sm:$0xff] %v251_v3  ;;  %v261_v8 = vld [vmem:[%s1767_s7 + $0x80] sm:$0xff]  ;;  %v263_v9 = vld [vmem:[%s1767_s7 + $0x90] sm:$0xff] }
  0x1b   : > { %254 = vst [vmem:[%s1772_s8 + $0x20] sm:$0xff] %v253_v4  ;;  %v265_v10 = vld [vmem:[%s1767_s7 + $0xa0] sm:$0xff]  ;;  %v267_v11 = vld [vmem:[%s1767_s7 + $0xb0] sm:$0xff] }
  0x1c   : > { %256 = vst [vmem:[%s1772_s8 + $0x28] sm:$0xff] %v255_v5  ;;  %v269_v12 = vld [vmem:[%s1767_s7 + $0xc0] sm:$0xff]  ;;  %v271_v13 = vld [vmem:[%s1767_s7 + $0xd0] sm:$0xff] }
  0x1d   : > { %258 = vst [vmem:[%s1772_s8 + $0x30] sm:$0xff] %v257_v6  ;;  %v273_v14 = vld [vmem:[%s1767_s7 + $0xe0] sm:$0xff]  ;;  %v275_v15 = vld [vmem:[%s1767_s7 + $0xf0] sm:$0xff] }
  0x1e   : > { %260 = vst [vmem:[%s1772_s8 + $0x38] sm:$0xff] %v259_v7  ;;  %v277_v16 = vld [vmem:[%s1767_s7 + $0x100] sm:$0xff]  ;;  %v279_v17 = vld [vmem:[%s1767_s7 + $0x110] sm:$0xff] }
  0x1f   : > { %262 = vst [vmem:[%s1772_s8 + $0x40] sm:$0xff] %v261_v8  ;;  %v281_v18 = vld [vmem:[%s1767_s7 + $0x120] sm:$0xff]  ;;  %v283_v19 = vld [vmem:[%s1767_s7 + $0x130] sm:$0xff] }
  0x20   : > { %264 = vst [vmem:[%s1772_s8 + $0x48] sm:$0xff] %v263_v9  ;;  %v285_v20 = vld [vmem:[%s1767_s7 + $0x140] sm:$0xff]  ;;  %v287_v21 = vld [vmem:[%s1767_s7 + $0x150] sm:$0xff] }
  0x21   : > { %266 = vst [vmem:[%s1772_s8 + $0x50] sm:$0xff] %v265_v10  ;;  %v289_v22 = vld [vmem:[%s1767_s7 + $0x160] sm:$0xff]  ;;  %v291_v23 = vld [vmem:[%s1767_s7 + $0x170] sm:$0xff] }
  0x22   : > { %268 = vst [vmem:[%s1772_s8 + $0x58] sm:$0xff] %v267_v11  ;;  %v293_v24 = vld [vmem:[%s1767_s7 + $0x180] sm:$0xff]  ;;  %v295_v25 = vld [vmem:[%s1767_s7 + $0x190] sm:$0xff] }
  0x23   : > { %270 = vst [vmem:[%s1772_s8 + $0x60] sm:$0xff] %v269_v12  ;;  %v297_v26 = vld [vmem:[%s1767_s7 + $0x1a0] sm:$0xff]  ;;  %v299_v27 = vld [vmem:[%s1767_s7 + $0x1b0] sm:$0xff] }
  0x24   : > { %272 = vst [vmem:[%s1772_s8 + $0x68] sm:$0xff] %v271_v13  ;;  %v301_v28 = vld [vmem:[%s1767_s7 + $0x1c0] sm:$0xff]  ;;  %v303_v29 = vld [vmem:[%s1767_s7 + $0x1d0] sm:$0xff] }
  0x25   : > { %274 = vst [vmem:[%s1772_s8 + $0x70] sm:$0xff] %v273_v14  ;;  %v305_v30 = vld [vmem:[%s1767_s7 + $0x1e0] sm:$0xff]  ;;  %v307_v31 = vld [vmem:[%s1767_s7 + $0x1f0] sm:$0xff] }
  0x26   : > { %276 = vst [vmem:[%s1772_s8 + $0x78] sm:$0xff] %v275_v15 }
  0x27   : > { %278 = vst [vmem:[%s1772_s8 + $0x80] sm:$0xff] %v277_v16 }
  0x28   : > { %280 = vst [vmem:[%s1772_s8 + $0x88] sm:$0xff] %v279_v17 }
  0x29   : > { %282 = vst [vmem:[%s1772_s8 + $0x90] sm:$0xff] %v281_v18 }
  0x2a   : > { %284 = vst [vmem:[%s1772_s8 + $0x98] sm:$0xff] %v283_v19 }
  0x2b   : > { %286 = vst [vmem:[%s1772_s8 + $0xa0] sm:$0xff] %v285_v20 }
  0x2c   : > { %288 = vst [vmem:[%s1772_s8 + $0xa8] sm:$0xff] %v287_v21 }
  0x2d   : > { %290 = vst [vmem:[%s1772_s8 + $0xb0] sm:$0xff] %v289_v22 }
  0x2e   : > { %292 = vst [vmem:[%s1772_s8 + $0xb8] sm:$0xff] %v291_v23 }
  0x2f   : > { %294 = vst [vmem:[%s1772_s8 + $0xc0] sm:$0xff] %v293_v24 }
  0x30   : > { %296 = vst [vmem:[%s1772_s8 + $0xc8] sm:$0xff] %v295_v25 }
  0x31   : > { %298 = vst [vmem:[%s1772_s8 + $0xd0] sm:$0xff] %v297_v26 }
  0x32   : > { %300 = vst [vmem:[%s1772_s8 + $0xd8] sm:$0xff] %v299_v27 }
  0x33   : > { %302 = vst [vmem:[%s1772_s8 + $0xe0] sm:$0xff] %v301_v28 }
  0x34   : > { %304 = vst [vmem:[%s1772_s8 + $0xe8] sm:$0xff] %v303_v29 }
  0x35   : > { %306 = vst [vmem:[%s1772_s8 + $0xf0] sm:$0xff] %v305_v30 }
  0x36   : > { %308 = vst [vmem:[%s1772_s8 + $0xf8] sm:$0xff] %v307_v31 }
  0x37 PF: > { %p1210_p7 = scmp.ge.s32.totalorder %s1684_s18, 1  ;;  %p313_p8 = scmp.lt.s32.totalorder %s1684_s18, 5 }
  0x39   : > { %p314_p9 = pnand %p1210_p7, %p313_p8 }
  0x3a   : > { %s320_s9 = sand.u32 (!%p314_p9), 1, %s1660_s12   ;;  %s1212_s10 = sshll.u32 (!%p314_p9), %s1672_s15, 5 }
  0x3b   : > { %317 = sbr.rel (%p314_p9) target bundleno = 418 (0x1a2), region = 66  ;;  %s1211_s11 = sshll.u32 (!%p314_p9), %s320_s9, 8 }
  0x3c   : > { %p346_p10 = scmp.lt.s32.totalorder (!%p314_p9), %s1212_s10, 63  ;;  %s1844_s26 = scalar_lea.vmem (!%p314_p9), [#allocation3], %s1211_s11 }
  0x3d   : > { %p1214_p11 = scmp.ne.s32.totalorder (!%p314_p9), %s1668_s14, 0 }
  0x40   : > { %s2025_s10 = smov (!%p346_p10, %s1212_s10), 63  ;;  %354 = sbr.rel (%p1214_p11) target bundleno = 102 (0x66), region = 74 }
  0x41   : > { %s1213_s21 = sshll.u32 %s2025_s10, 2 }
  0x42   : > { %s1842_s24 = scalar_lea.vmem %s2011_s3, %s1213_s21 }
  0x45   : > { %v1686_v32 = vmov 0.0  }
  0x46   : > { %355 = vst [vmem:[#allocation2 + $0xb0] sm:$0xff] %v1686_v32 }
  0x47   : > { %356 = vst [vmem:[#allocation2] sm:$0xff] %v1686_v32 }
  0x48   : > { %357 = vst [vmem:[#allocation2 + $0xd8] sm:$0xff] %v1686_v32 }
  0x49   : > { %358 = vst [vmem:[#allocation2 + $0x18] sm:$0xff] %v1686_v32 }
  0x4a   : > { %359 = vst [vmem:[#allocation2 + $0x50] sm:$0xff] %v1686_v32 }
  0x4b   : > { %360 = vst [vmem:[#allocation2 + $0x68] sm:$0xff] %v1686_v32 }
  0x4c   : > { %361 = vst [vmem:[#allocation2 + $0x30] sm:$0xff] %v1686_v32 }
  0x4d   : > { %362 = vst [vmem:[#allocation2 + $0x48] sm:$0xff] %v1686_v32 }
  0x4e   : > { %363 = vst [vmem:[#allocation2 + $0x80] sm:$0xff] %v1686_v32 }
  0x4f   : > { %364 = vst [vmem:[#allocation2 + $0x88] sm:$0xff] %v1686_v32 }
  0x50   : > { %365 = vst [vmem:[#allocation2 + $0xe8] sm:$0xff] %v1686_v32 }
  0x51   : > { %366 = vst [vmem:[#allocation2 + $0xb8] sm:$0xff] %v1686_v32 }
  0x52   : > { %367 = vst [vmem:[#allocation2 + $0x60] sm:$0xff] %v1686_v32 }
  0x53   : > { %368 = vst [vmem:[#allocation2 + $0xf0] sm:$0xff] %v1686_v32 }
  0x54   : > { %369 = vst [vmem:[#allocation2 + $0x8] sm:$0xff] %v1686_v32 }
  0x55   : > { %370 = vst [vmem:[#allocation2 + $0x78] sm:$0xff] %v1686_v32 }
  0x56   : > { %371 = vst [vmem:[#allocation2 + $0x38] sm:$0xff] %v1686_v32 }
  0x57   : > { %372 = vst [vmem:[#allocation2 + $0x58] sm:$0xff] %v1686_v32 }
  0x58   : > { %373 = vst [vmem:[#allocation2 + $0x40] sm:$0xff] %v1686_v32 }
  0x59   : > { %374 = vst [vmem:[#allocation2 + $0xc8] sm:$0xff] %v1686_v32 }
  0x5a   : > { %375 = vst [vmem:[#allocation2 + $0xe0] sm:$0xff] %v1686_v32 }
  0x5b   : > { %376 = vst [vmem:[#allocation2 + $0x90] sm:$0xff] %v1686_v32 }
  0x5c   : > { %377 = vst [vmem:[#allocation2 + $0x70] sm:$0xff] %v1686_v32 }
  0x5d   : > { %378 = vst [vmem:[#allocation2 + $0xc0] sm:$0xff] %v1686_v32 }
  0x5e   : > { %379 = vst [vmem:[#allocation2 + $0xa8] sm:$0xff] %v1686_v32 }
  0x5f   : > { %380 = vst [vmem:[#allocation2 + $0xd0] sm:$0xff] %v1686_v32 }
  0x60   : > { %381 = vst [vmem:[#allocation2 + $0x10] sm:$0xff] %v1686_v32 }
  0x61   : > { %382 = vst [vmem:[#allocation2 + $0x28] sm:$0xff] %v1686_v32 }
  0x62   : > { %383 = vst [vmem:[#allocation2 + $0xa0] sm:$0xff] %v1686_v32 }
  0x63   : > { %384 = vst [vmem:[#allocation2 + $0xf8] sm:$0xff] %v1686_v32 }
  0x64   : > { %385 = vst [vmem:[#allocation2 + $0x20] sm:$0xff] %v1686_v32 }
  0x65   : > { %386 = vst [vmem:[#allocation2 + $0x98] sm:$0xff] %v1686_v32 }
  0x66 PF: > { %s1215_s12 = sshll.u32 %s1668_s14, 8  ;;  %v1219_v47 = vld [vmem:[%s1844_s26] sm:$0xf]  ;;  %v1430_v49 = vld [vmem:[%s1844_s26 + $0x4] sm:$0xf0]  ;;  %p1409_p12 = scmp.ne.s32.totalorder %s1668_s14, 1 }
  0x67   : > { %s388_s15 = sshra.s32 %s1215_s12, 3  ;;  %v1283_v50 = vld [vmem:[%s1844_s26 + $0x80] sm:$0xf]  ;;  %v1446_v52 = vld [vmem:[%s1844_s26 + $0x84] sm:$0xf0]  ;;  %v1220_v57 = vor.u32 %v1430_v49, %v1219_v47 }
  0x68   : > { %s1216_s27 = sshll.u32 %s388_s15, 2  ;;  %v1429_v53 = vld [vmem:[%s1844_s26 + $0x4] sm:$0xf]  ;;  %v1221_v54 = vld [vmem:[%s1844_s26 + $0x8] sm:$0xf0]  ;;  %v1284_v58 = vor.u32 %v1446_v52, %v1283_v50 }
  0x69   : > { %s1851_s30 = scalar_lea.vmem %s2009_s1, %s1216_s27  ;;  %v1445_v55 = vld [vmem:[%s1844_s26 + $0x84] sm:$0xf]  ;;  %v1285_v56 = vld [vmem:[%s1844_s26 + $0x88] sm:$0xf0]  ;;  %v1224_v59 = vor.u32 %v1429_v53, %v1221_v54  ;;  %v1227_v61 = vld [vmem:[%s1844_s26 + $0x10] sm:$0xf] }
  0x6a   : > { %v1420_v33 = vld [vmem:[%s1851_s30 + $0x38] sm:$0xff]  ;;  %v1419_v35 = vld [vmem:[%s1851_s30 + $0x30] sm:$0xff]  ;;  %v1418_v37 = vld [vmem:[%s1851_s30 + $0x28] sm:$0xff]  ;;  %v1288_v60 = vor.u32 %v1445_v55, %v1285_v56 }
  0x6b   : > { %v1428_v34 = vld [vmem:[%s1851_s30 + $0x78] sm:$0xff]  ;;  %744 = vmatpush.bf16.msra.mxu0 %v1420_v33  ;;  %1556 = vmatpush.bf16.msra.mxu2 %v1420_v33  ;;  %v1427_v36 = vld [vmem:[%s1851_s30 + $0x70] sm:$0xff]  ;;  %v1426_v38 = vld [vmem:[%s1851_s30 + $0x68] sm:$0xff] }
  0x6c   : > { %833 = vmatpush.bf16.msra.mxu1 %v1428_v34  ;;  %1564 = vmatpush.bf16.msra.mxu3 %v1428_v34  ;;  %v1417_v39 = vld [vmem:[%s1851_s30 + $0x20] sm:$0xff]  ;;  %v1416_v41 = vld [vmem:[%s1851_s30 + $0x18] sm:$0xff]  ;;  %v1415_v43 = vld [vmem:[%s1851_s30 + $0x10] sm:$0xff] }
  0x6d   : > { %v1425_v40 = vld [vmem:[%s1851_s30 + $0x60] sm:$0xff]  ;;  %v1424_v42 = vld [vmem:[%s1851_s30 + $0x58] sm:$0xff]  ;;  %v1423_v44 = vld [vmem:[%s1851_s30 + $0x50] sm:$0xff] }
  0x6e   : > { %v1414_v45 = vld [vmem:[%s1851_s30 + $0x8] sm:$0xff]  ;;  %v1413_v48 = vld [vmem:[%s1851_s30] sm:$0xff]  ;;  %v1432_v62 = vld [vmem:[%s1844_s26 + $0x14] sm:$0xf0] }
  0x6f   : > { %745 = vmatpush.bf16.msra.mxu0 %v1419_v35  ;;  %1557 = vmatpush.bf16.msra.mxu2 %v1419_v35  ;;  %v1422_v46 = vld [vmem:[%s1851_s30 + $0x48] sm:$0xff]  ;;  %v1421_v51 = vld [vmem:[%s1851_s30 + $0x40] sm:$0xff]  ;;  %v1291_v63 = vld [vmem:[%s1844_s26 + $0x90] sm:$0xf]  ;;  %v1228_v5 = vor.u32 %v1432_v62, %v1227_v61 }
  0x70   : > { %834 = vmatpush.bf16.msra.mxu1 %v1427_v36  ;;  %1565 = vmatpush.bf16.msra.mxu3 %v1427_v36  ;;  %v1448_v0 = vld [vmem:[%s1844_s26 + $0x94] sm:$0xf0]  ;;  %v1431_v1 = vld [vmem:[%s1844_s26 + $0x14] sm:$0xf]  ;;  %v1229_v2 = vld [vmem:[%s1844_s26 + $0x18] sm:$0xf0] }
  0x71   : > { %v1447_v3 = vld [vmem:[%s1844_s26 + $0x94] sm:$0xf]  ;;  %v1293_v4 = vld [vmem:[%s1844_s26 + $0x98] sm:$0xf0]  ;;  %v1292_v6 = vor.u32 %v1448_v0, %v1291_v63  ;;  %v1232_v7 = vor.u32 %v1431_v1, %v1229_v2  ;;  %v1235_v9 = vld [vmem:[%s1844_s26 + $0x20] sm:$0xf] }
  0x72   : > { %v1296_v8 = vor.u32 %v1447_v3, %v1293_v4  ;;  %v1434_v10 = vld [vmem:[%s1844_s26 + $0x24] sm:$0xf0]  ;;  %v1299_v11 = vld [vmem:[%s1844_s26 + $0xa0] sm:$0xf]  ;;  %v1433_v13 = vld [vmem:[%s1844_s26 + $0x24] sm:$0xf] }
  0x73   : > { %746 = vmatpush.bf16.msra.mxu0 %v1418_v37  ;;  %1558 = vmatpush.bf16.msra.mxu2 %v1418_v37  ;;  %v1450_v12 = vld [vmem:[%s1844_s26 + $0xa4] sm:$0xf0]  ;;  %v1237_v14 = vld [vmem:[%s1844_s26 + $0x28] sm:$0xf0]  ;;  %v1449_v15 = vld [vmem:[%s1844_s26 + $0xa4] sm:$0xf]  ;;  %v1236_v17 = vor.u32 %v1434_v10, %v1235_v9 }
  0x74   : > { %835 = vmatpush.bf16.msra.mxu1 %v1426_v38  ;;  %1566 = vmatpush.bf16.msra.mxu3 %v1426_v38  ;;  %v1301_v16 = vld [vmem:[%s1844_s26 + $0xa8] sm:$0xf0]  ;;  %v1300_v18 = vor.u32 %v1450_v12, %v1299_v11  ;;  %v1240_v19 = vor.u32 %v1433_v13, %v1237_v14  ;;  %v1243_v21 = vld [vmem:[%s1844_s26 + $0x30] sm:$0xf]  ;;  %v1436_v22 = vld [vmem:[%s1844_s26 + $0x34] sm:$0xf0] }
  0x75   : > { %v1304_v20 = vor.u32 %v1449_v15, %v1301_v16  ;;  %v1307_v23 = vld [vmem:[%s1844_s26 + $0xb0] sm:$0xf]  ;;  %v1452_v24 = vld [vmem:[%s1844_s26 + $0xb4] sm:$0xf0]  ;;  %v1435_v25 = vld [vmem:[%s1844_s26 + $0x34] sm:$0xf]  ;;  %v1244_v29 = vor.u32 %v1436_v22, %v1243_v21 }
  0x76   : > { %v1245_v26 = vld [vmem:[%s1844_s26 + $0x38] sm:$0xf0]  ;;  %v1451_v27 = vld [vmem:[%s1844_s26 + $0xb4] sm:$0xf]  ;;  %v1308_v30 = vor.u32 %v1452_v24, %v1307_v23  ;;  %v1251_v33 = vld [vmem:[%s1844_s26 + $0x40] sm:$0xf] }
  0x77   : > { %747 = vmatpush.bf16.msra.mxu0 %v1417_v39  ;;  %1559 = vmatpush.bf16.msra.mxu2 %v1417_v39  ;;  %v1309_v28 = vld [vmem:[%s1844_s26 + $0xb8] sm:$0xf0]  ;;  %v1248_v31 = vor.u32 %v1435_v25, %v1245_v26  ;;  %v1438_v34 = vld [vmem:[%s1844_s26 + $0x44] sm:$0xf0]  ;;  %v1315_v35 = vld [vmem:[%s1844_s26 + $0xc0] sm:$0xf] }
  0x78   : > { %836 = vmatpush.bf16.msra.mxu1 %v1425_v40  ;;  %1567 = vmatpush.bf16.msra.mxu3 %v1425_v40  ;;  %v1312_v32 = vor.u32 %v1451_v27, %v1309_v28  ;;  %v1454_v36 = vld [vmem:[%s1844_s26 + $0xc4] sm:$0xf0]  ;;  %v1437_v37 = vld [vmem:[%s1844_s26 + $0x44] sm:$0xf]  ;;  %v1253_v38 = vld [vmem:[%s1844_s26 + $0x48] sm:$0xf0] }
  0x79   : > { %v1453_v39 = vld [vmem:[%s1844_s26 + $0xc4] sm:$0xf]  ;;  %v1317_v40 = vld [vmem:[%s1844_s26 + $0xc8] sm:$0xf0]  ;;  %v1323_v47 = vld [vmem:[%s1844_s26 + $0xd0] sm:$0xf] }
  0x7a   : > { %v1439_v49 = vld [vmem:[%s1844_s26 + $0x54] sm:$0xf]  ;;  %v1261_v50 = vld [vmem:[%s1844_s26 + $0x58] sm:$0xf0]  ;;  %v1441_v61 = vld [vmem:[%s1844_s26 + $0x64] sm:$0xf] }
  0x7b   : > { %748 = vmatpush.bf16.msra.mxu0 %v1416_v41  ;;  %1560 = vmatpush.bf16.msra.mxu2 %v1416_v41  ;;  %v1252_v41 = vor.u32 %v1438_v34, %v1251_v33  ;;  %v1325_v52 = vld [vmem:[%s1844_s26 + $0xd8] sm:$0xf0]  ;;  %v1264_v55 = vor.u32 %v1439_v49, %v1261_v50  ;;  %v1269_v62 = vld [vmem:[%s1844_s26 + $0x68] sm:$0xf0]  ;;  %v1457_v63 = vld [vmem:[%s1844_s26 + $0xe4] sm:$0xf] }
  0x7c   : > { %837 = vmatpush.bf16.msra.mxu1 %v1424_v42  ;;  %1568 = vmatpush.bf16.msra.mxu3 %v1424_v42  ;;  %v1316_v42 = vor.u32 %v1454_v36, %v1315_v35  ;;  %v1333_v0 = vld [vmem:[%s1844_s26 + $0xe8] sm:$0xf0]  ;;  %v1272_v3 = vor.u32 %v1441_v61, %v1269_v62  ;;  %v1443_v9 = vld [vmem:[%s1844_s26 + $0x74] sm:$0xf]  ;;  %v1277_v10 = vld [vmem:[%s1844_s26 + $0x78] sm:$0xf0] }
  0x7d   : > { %v1336_v4 = vor.u32 %v1457_v63, %v1333_v0  ;;  %v1459_v11 = vld [vmem:[%s1844_s26 + $0xf4] sm:$0xf]  ;;  %v1341_v12 = vld [vmem:[%s1844_s26 + $0xf8] sm:$0xf0]  ;;  %v1280_v15 = vor.u32 %v1443_v9, %v1277_v10  ;;  %v425_v27 = vld [vmem:[#allocation2] sm:$0xff] }
  0x7e   : > { %v1344_v16 = vor.u32 %v1459_v11, %v1341_v12  ;;  %v440_v23 = vld [vmem:[#allocation2 + $0x38] sm:$0xff]  ;;  %v444_v63 = vld [vmem:[#allocation2 + $0xe0] sm:$0xff]  ;;  %v445_v9 = vld [vmem:[#allocation2 + $0x90] sm:$0xff] }
  0x7f   : > { %749 = vmatpush.bf16.msra.mxu0 %v1415_v43  ;;  %1561 = vmatpush.bf16.msra.mxu2 %v1415_v43  ;;  %v1256_v43 = vor.u32 %v1437_v37, %v1253_v38  ;;  %v441_v33 = vld [vmem:[#allocation2 + $0x58] sm:$0xff] }
  0x80   : > { %838 = vmatpush.bf16.msra.mxu1 %v1423_v44  ;;  %1569 = vmatpush.bf16.msra.mxu3 %v1423_v44  ;;  %v1320_v44 = vor.u32 %v1453_v39, %v1317_v40  ;;  %v426_v37 = vld [vmem:[#allocation2 + $0xd8] sm:$0xff] }
  0x83   : > { %750 = vmatpush.bf16.msra.mxu0 %v1414_v45  ;;  %1562 = vmatpush.bf16.msra.mxu2 %v1414_v45  ;;  %v1259_v45 = vld [vmem:[%s1844_s26 + $0x50] sm:$0xf] }
  0x84   : > { %839 = vmatpush.bf16.msra.mxu1 %v1422_v46  ;;  %1570 = vmatpush.bf16.msra.mxu3 %v1422_v46  ;;  %v1440_v46 = vld [vmem:[%s1844_s26 + $0x54] sm:$0xf0] }
  0x85   : > { %v1260_v53 = vor.u32 %v1440_v46, %v1259_v45 }
  0x87   : > { %751 = vmatpush.bf16.msra.mxu0 %v1413_v48  ;;  %1563 = vmatpush.bf16.msra.mxu2 %v1413_v48  ;;  %v1456_v48 = vld [vmem:[%s1844_s26 + $0xd4] sm:$0xf0] }
  0x88   : > { %840 = vmatpush.bf16.msra.mxu1 %v1421_v51  ;;  %1571 = vmatpush.bf16.msra.mxu3 %v1421_v51  ;;  %v1455_v51 = vld [vmem:[%s1844_s26 + $0xd4] sm:$0xf]  ;;  %v1324_v54 = vor.u32 %v1456_v48, %v1323_v47  ;;  %v427_v47 = vld [vmem:[#allocation2 + $0x18] sm:$0xff] }
  0x89   : > { %v1328_v56 = vor.u32 %v1455_v51, %v1325_v52 }
  0x8a   : > { %752 = vmatmul.bf16.vlgmr.msra.gmra.mxu0 %v1220_v57  ;;  %792 = vmatmul.bf16.vlgmr.msra.gmra.mxu2 %v1284_v58  ;;  %v1267_v57 = vld [vmem:[%s1844_s26 + $0x60] sm:$0xf]  ;;  %v1442_v58 = vld [vmem:[%s1844_s26 + $0x64] sm:$0xf0] }
  0x8b   : > { %841 = vmatmul.bf16.vlgmr.msra.gmra.mxu1 %v1224_v59  ;;  %881 = vmatmul.bf16.vlgmr.msra.gmra.mxu3 %v1288_v60  ;;  %v1331_v59 = vld [vmem:[%s1844_s26 + $0xe0] sm:$0xf]  ;;  %v1458_v60 = vld [vmem:[%s1844_s26 + $0xe4] sm:$0xf0]  ;;  %v1268_v1 = vor.u32 %v1442_v58, %v1267_v57  ;;  %v428_v57 = vld [vmem:[#allocation2 + $0x50] sm:$0xff] }
  0x8c   : > { %v1332_v2 = vor.u32 %v1458_v60, %v1331_v59 }
  0x9a   : > { %757 = vmatmul.bf16.gmra.mxu0 %v1228_v5  ;;  %797 = vmatmul.bf16.gmra.mxu2 %v1292_v6  ;;  %v1275_v5 = vld [vmem:[%s1844_s26 + $0x70] sm:$0xf]  ;;  %v1444_v6 = vld [vmem:[%s1844_s26 + $0x74] sm:$0xf0] }
  0x9b   : > { %846 = vmatmul.bf16.gmra.mxu1 %v1232_v7  ;;  %886 = vmatmul.bf16.gmra.mxu3 %v1296_v8  ;;  %v1339_v7 = vld [vmem:[%s1844_s26 + $0xf0] sm:$0xf]  ;;  %v1460_v8 = vld [vmem:[%s1844_s26 + $0xf4] sm:$0xf0]  ;;  %v1276_v13 = vor.u32 %v1444_v6, %v1275_v5 }
  0x9c   : > { %v1340_v14 = vor.u32 %v1460_v8, %v1339_v7 }
  0xaa   : > { %762 = vmatmul.bf16.gmra.mxu0 %v1236_v17  ;;  %802 = vmatmul.bf16.gmra.mxu2 %v1300_v18  ;;  %v424_v18 = vld [vmem:[#allocation2 + $0xb0] sm:$0xff] }
  0xab   : > { %851 = vmatmul.bf16.gmra.mxu1 %v1240_v19  ;;  %891 = vmatmul.bf16.gmra.mxu3 %v1304_v20 }
  0xba   : > { %767 = vmatmul.bf16.gmra.mxu0 %v1244_v29  ;;  %807 = vmatmul.bf16.gmra.mxu2 %v1308_v30 }
  0xbb   : > { %856 = vmatmul.bf16.gmra.mxu1 %v1248_v31  ;;  %896 = vmatmul.bf16.gmra.mxu3 %v1312_v32 }
  0xca   : > { %772 = vmatmul.bf16.gmra.mxu0 %v1252_v41  ;;  %812 = vmatmul.bf16.gmra.mxu2 %v1316_v42 }
  0xcb   : > { %861 = vmatmul.bf16.gmra.mxu1 %v1256_v43  ;;  %901 = vmatmul.bf16.gmra.mxu3 %v1320_v44  ;;  %v442_v43 = vld [vmem:[#allocation2 + $0x40] sm:$0xff] }
  0xda   : > { %777 = vmatmul.bf16.gmra.mxu0 %v1260_v53  ;;  %817 = vmatmul.bf16.gmra.mxu2 %v1324_v54  ;;  %v443_v53 = vld [vmem:[#allocation2 + $0xc8] sm:$0xff] }
  0xdb   : > { %866 = vmatmul.bf16.gmra.mxu1 %v1264_v55  ;;  %906 = vmatmul.bf16.gmra.mxu3 %v1328_v56 }
  0xea   : > { %782 = vmatmul.bf16.gmra.mxu0 %v1268_v1  ;;  %822 = vmatmul.bf16.gmra.mxu2 %v1332_v2 }
  0xeb   : > { %871 = vmatmul.bf16.gmra.mxu1 %v1272_v3  ;;  %911 = vmatmul.bf16.gmra.mxu3 %v1336_v4  ;;  %v429_v3 = vld [vmem:[#allocation2 + $0x68] sm:$0xff] }
  0xfa   : > { %787 = vmatmul.bf16.gmra.mxu0 %v1276_v13  ;;  %827 = vmatmul.bf16.gmra.mxu2 %v1340_v14  ;;  %v430_v13 = vld [vmem:[#allocation2 + $0x30] sm:$0xff] }
  0xfb   : > { %876 = vmatmul.bf16.gmra.mxu1 %v1280_v15  ;;  %916 = vmatmul.bf16.gmra.mxu3 %v1344_v16 }
 0x107   : > { %v753_v17 = vpop.f32.mrf.mxu0 }
 0x108   : > { %v842_v19 = vpop.f32.mrf.mxu1 }
 0x109   : > { %v843_v20 = vadd.f32 %v842_v19, %v753_v17  ;;  %v446_v19 = vld [vmem:[#allocation2 + $0x70] sm:$0xff] }
 0x10b   : > { %v922_v21 = vadd.f32 %v843_v20, %v424_v18 }
 0x10d   : > { %954 = vst [vmem:[#allocation2 + $0xb0] sm:$0xff] %v922_v21  ;;  %v793_v22 = vpop.f32.mrf.mxu2 }
 0x10e   : > { %v882_v24 = vpop.f32.mrf.mxu3 }
 0x10f   : > { %v883_v25 = vadd.f32 %v882_v24, %v793_v22  ;;  %v755_v26 = vpop.f32.mrf.mxu0 }
 0x110   : > { %v844_v28 = vpop.f32.mrf.mxu1 }
 0x111   : > { %v938_v29 = vadd.f32 %v883_v25, %v440_v23  ;;  %v845_v30 = vadd.f32 %v844_v28, %v755_v26  ;;  %v431_v23 = vld [vmem:[#allocation2 + $0x48] sm:$0xff] }
 0x113   : > { %970 = vst [vmem:[#allocation2 + $0x38] sm:$0xff] %v938_v29  ;;  %v923_v31 = vadd.f32 %v845_v30, %v425_v27  ;;  %v447_v29 = vld [vmem:[#allocation2 + $0xc0] sm:$0xff] }
 0x115   : > { %955 = vst [vmem:[#allocation2] sm:$0xff] %v923_v31  ;;  %v795_v32 = vpop.f32.mrf.mxu2 }
 0x116   : > { %v884_v34 = vpop.f32.mrf.mxu3 }
 0x117   : > { %v885_v35 = vadd.f32 %v884_v34, %v795_v32  ;;  %v758_v36 = vpop.f32.mrf.mxu0 }
 0x118   : > { %v847_v38 = vpop.f32.mrf.mxu1 }
 0x119   : > { %v939_v39 = vadd.f32 %v885_v35, %v441_v33  ;;  %v848_v40 = vadd.f32 %v847_v38, %v758_v36  ;;  %v432_v33 = vld [vmem:[#allocation2 + $0x80] sm:$0xff] }
 0x11b   : > { %971 = vst [vmem:[#allocation2 + $0x58] sm:$0xff] %v939_v39  ;;  %v924_v41 = vadd.f32 %v848_v40, %v426_v37  ;;  %v448_v39 = vld [vmem:[#allocation2 + $0xa8] sm:$0xff] }
 0x11d   : > { %956 = vst [vmem:[#allocation2 + $0xd8] sm:$0xff] %v924_v41  ;;  %v798_v42 = vpop.f32.mrf.mxu2 }
 0x11e   : > { %v887_v44 = vpop.f32.mrf.mxu3 }
 0x11f   : > { %v888_v45 = vadd.f32 %v887_v44, %v798_v42  ;;  %v760_v46 = vpop.f32.mrf.mxu0 }
 0x120   : > { %v849_v48 = vpop.f32.mrf.mxu1 }
 0x121   : > { %v940_v49 = vadd.f32 %v888_v45, %v442_v43  ;;  %v850_v50 = vadd.f32 %v849_v48, %v760_v46  ;;  %v433_v43 = vld [vmem:[#allocation2 + $0x88] sm:$0xff] }
 0x123   : > { %972 = vst [vmem:[#allocation2 + $0x40] sm:$0xff] %v940_v49  ;;  %v925_v51 = vadd.f32 %v850_v50, %v427_v47  ;;  %v449_v49 = vld [vmem:[#allocation2 + $0xd0] sm:$0xff] }
 0x125   : > { %957 = vst [vmem:[#allocation2 + $0x18] sm:$0xff] %v925_v51  ;;  %v800_v52 = vpop.f32.mrf.mxu2 }
 0x126   : > { %v889_v54 = vpop.f32.mrf.mxu3 }
 0x127   : > { %v890_v55 = vadd.f32 %v889_v54, %v800_v52  ;;  %v763_v56 = vpop.f32.mrf.mxu0 }
 0x128   : > { %v852_v58 = vpop.f32.mrf.mxu1 }
 0x129   : > { %v941_v59 = vadd.f32 %v890_v55, %v443_v53  ;;  %v853_v60 = vadd.f32 %v852_v58, %v763_v56  ;;  %v434_v53 = vld [vmem:[#allocation2 + $0xe8] sm:$0xff] }
 0x12b   : > { %973 = vst [vmem:[#allocation2 + $0xc8] sm:$0xff] %v941_v59  ;;  %v926_v61 = vadd.f32 %v853_v60, %v428_v57  ;;  %v450_v59 = vld [vmem:[#allocation2 + $0x10] sm:$0xff] }
 0x12d   : > { %958 = vst [vmem:[#allocation2 + $0x50] sm:$0xff] %v926_v61  ;;  %v803_v62 = vpop.f32.mrf.mxu2 }
 0x12e   : > { %v892_v0 = vpop.f32.mrf.mxu3 }
 0x12f   : > { %v893_v1 = vadd.f32 %v892_v0, %v803_v62  ;;  %v765_v2 = vpop.f32.mrf.mxu0 }
 0x130   : > { %v854_v4 = vpop.f32.mrf.mxu1 }
 0x131   : > { %v942_v5 = vadd.f32 %v893_v1, %v444_v63  ;;  %v855_v6 = vadd.f32 %v854_v4, %v765_v2  ;;  %v435_v63 = vld [vmem:[#allocation2 + $0xb8] sm:$0xff] }
 0x133   : > { %974 = vst [vmem:[#allocation2 + $0xe0] sm:$0xff] %v942_v5  ;;  %v927_v7 = vadd.f32 %v855_v6, %v429_v3  ;;  %v451_v5 = vld [vmem:[#allocation2 + $0x28] sm:$0xff] }
 0x135   : > { %959 = vst [vmem:[#allocation2 + $0x68] sm:$0xff] %v927_v7  ;;  %v805_v8 = vpop.f32.mrf.mxu2 }
 0x136   : > { %v894_v10 = vpop.f32.mrf.mxu3 }
 0x137   : > { %v895_v11 = vadd.f32 %v894_v10, %v805_v8  ;;  %v768_v12 = vpop.f32.mrf.mxu0 }
 0x138   : > { %v857_v14 = vpop.f32.mrf.mxu1 }
 0x139   : > { %v943_v15 = vadd.f32 %v895_v11, %v445_v9  ;;  %v858_v16 = vadd.f32 %v857_v14, %v768_v12  ;;  %v436_v9 = vld [vmem:[#allocation2 + $0x60] sm:$0xff] }
 0x13b   : > { %975 = vst [vmem:[#allocation2 + $0x90] sm:$0xff] %v943_v15  ;;  %v928_v17 = vadd.f32 %v858_v16, %v430_v13  ;;  %v452_v15 = vld [vmem:[#allocation2 + $0xa0] sm:$0xff] }
 0x13d   : > { %960 = vst [vmem:[#allocation2 + $0x30] sm:$0xff] %v928_v17  ;;  %v808_v18 = vpop.f32.mrf.mxu2 }
 0x13e   : > { %v897_v20 = vpop.f32.mrf.mxu3 }
 0x13f   : > { %v898_v21 = vadd.f32 %v897_v20, %v808_v18  ;;  %v770_v22 = vpop.f32.mrf.mxu0 }
 0x140   : > { %v859_v24 = vpop.f32.mrf.mxu1 }
 0x141   : > { %v944_v25 = vadd.f32 %v898_v21, %v446_v19  ;;  %v860_v26 = vadd.f32 %v859_v24, %v770_v22  ;;  %v437_v19 = vld [vmem:[#allocation2 + $0xf0] sm:$0xff] }
 0x143   : > { %976 = vst [vmem:[#allocation2 + $0x70] sm:$0xff] %v944_v25  ;;  %v929_v27 = vadd.f32 %v860_v26, %v431_v23  ;;  %v453_v25 = vld [vmem:[#allocation2 + $0xf8] sm:$0xff] }
 0x145   : > { %961 = vst [vmem:[#allocation2 + $0x48] sm:$0xff] %v929_v27  ;;  %v810_v28 = vpop.f32.mrf.mxu2 }
 0x146   : > { %v899_v30 = vpop.f32.mrf.mxu3 }
 0x147   : > { %v900_v31 = vadd.f32 %v899_v30, %v810_v28  ;;  %v773_v32 = vpop.f32.mrf.mxu0 }
 0x148   : > { %v862_v34 = vpop.f32.mrf.mxu1 }
 0x149   : > { %v945_v35 = vadd.f32 %v900_v31, %v447_v29  ;;  %v863_v36 = vadd.f32 %v862_v34, %v773_v32  ;;  %v438_v29 = vld [vmem:[#allocation2 + $0x8] sm:$0xff] }
 0x14b   : > { %977 = vst [vmem:[#allocation2 + $0xc0] sm:$0xff] %v945_v35  ;;  %v930_v37 = vadd.f32 %v863_v36, %v432_v33  ;;  %v454_v35 = vld [vmem:[#allocation2 + $0x20] sm:$0xff] }
 0x14d   : > { %962 = vst [vmem:[#allocation2 + $0x80] sm:$0xff] %v930_v37  ;;  %v813_v38 = vpop.f32.mrf.mxu2 }
 0x14e   : > { %v902_v40 = vpop.f32.mrf.mxu3 }
 0x14f   : > { %v903_v41 = vadd.f32 %v902_v40, %v813_v38  ;;  %v775_v42 = vpop.f32.mrf.mxu0 }
 0x150   : > { %v864_v44 = vpop.f32.mrf.mxu1 }
 0x151   : > { %v946_v45 = vadd.f32 %v903_v41, %v448_v39  ;;  %v865_v46 = vadd.f32 %v864_v44, %v775_v42  ;;  %v439_v39 = vld [vmem:[#allocation2 + $0x78] sm:$0xff] }
 0x153   : > { %978 = vst [vmem:[#allocation2 + $0xa8] sm:$0xff] %v946_v45  ;;  %v931_v47 = vadd.f32 %v865_v46, %v433_v43  ;;  %v455_v45 = vld [vmem:[#allocation2 + $0x98] sm:$0xff] }
 0x155   : > { %963 = vst [vmem:[#allocation2 + $0x88] sm:$0xff] %v931_v47  ;;  %v815_v48 = vpop.f32.mrf.mxu2 }
 0x156   : > { %v904_v50 = vpop.f32.mrf.mxu3 }
 0x157   : > { %v905_v51 = vadd.f32 %v904_v50, %v815_v48  ;;  %v778_v52 = vpop.f32.mrf.mxu0 }
 0x158   : > { %v867_v54 = vpop.f32.mrf.mxu1 }
 0x159   : > { %v947_v55 = vadd.f32 %v905_v51, %v449_v49  ;;  %v868_v56 = vadd.f32 %v867_v54, %v778_v52 }
 0x15b   : > { %979 = vst [vmem:[#allocation2 + $0xd0] sm:$0xff] %v947_v55  ;;  %v932_v57 = vadd.f32 %v868_v56, %v434_v53 }
 0x15d   : > { %964 = vst [vmem:[#allocation2 + $0xe8] sm:$0xff] %v932_v57  ;;  %v818_v58 = vpop.f32.mrf.mxu2 }
 0x15e   : > { %v907_v60 = vpop.f32.mrf.mxu3 }
 0x15f   : > { %v908_v61 = vadd.f32 %v907_v60, %v818_v58  ;;  %v780_v62 = vpop.f32.mrf.mxu0 }
 0x160   : > { %v869_v0 = vpop.f32.mrf.mxu1 }
 0x161   : > { %v948_v1 = vadd.f32 %v908_v61, %v450_v59  ;;  %v870_v2 = vadd.f32 %v869_v0, %v780_v62 }
 0x163   : > { %980 = vst [vmem:[#allocation2 + $0x10] sm:$0xff] %v948_v1  ;;  %v933_v3 = vadd.f32 %v870_v2, %v435_v63 }
 0x165   : > { %965 = vst [vmem:[#allocation2 + $0xb8] sm:$0xff] %v933_v3  ;;  %v820_v4 = vpop.f32.mrf.mxu2 }
 0x166   : > { %v909_v6 = vpop.f32.mrf.mxu3 }
 0x167   : > { %v910_v7 = vadd.f32 %v909_v6, %v820_v4  ;;  %v783_v8 = vpop.f32.mrf.mxu0 }
 0x168   : > { %v872_v10 = vpop.f32.mrf.mxu1 }
 0x169   : > { %v949_v11 = vadd.f32 %v910_v7, %v451_v5  ;;  %v873_v12 = vadd.f32 %v872_v10, %v783_v8 }
 0x16b   : > { %981 = vst [vmem:[#allocation2 + $0x28] sm:$0xff] %v949_v11  ;;  %v934_v13 = vadd.f32 %v873_v12, %v436_v9 }
 0x16d   : > { %966 = vst [vmem:[#allocation2 + $0x60] sm:$0xff] %v934_v13  ;;  %v823_v14 = vpop.f32.mrf.mxu2 }
 0x16e   : > { %v912_v16 = vpop.f32.mrf.mxu3 }
 0x16f   : > { %v913_v17 = vadd.f32 %v912_v16, %v823_v14  ;;  %v785_v18 = vpop.f32.mrf.mxu0 }
 0x170   : > { %v874_v20 = vpop.f32.mrf.mxu1 }
 0x171   : > { %v950_v21 = vadd.f32 %v913_v17, %v452_v15  ;;  %v875_v22 = vadd.f32 %v874_v20, %v785_v18 }
 0x173   : > { %982 = vst [vmem:[#allocation2 + $0xa0] sm:$0xff] %v950_v21  ;;  %v935_v23 = vadd.f32 %v875_v22, %v437_v19 }
 0x175   : > { %967 = vst [vmem:[#allocation2 + $0xf0] sm:$0xff] %v935_v23  ;;  %v825_v24 = vpop.f32.mrf.mxu2 }
 0x176   : > { %v914_v26 = vpop.f32.mrf.mxu3 }
 0x177   : > { %v915_v27 = vadd.f32 %v914_v26, %v825_v24  ;;  %v788_v28 = vpop.f32.mrf.mxu0 }
 0x178   : > { %v877_v30 = vpop.f32.mrf.mxu1 }
 0x179   : > { %v951_v31 = vadd.f32 %v915_v27, %v453_v25  ;;  %v878_v32 = vadd.f32 %v877_v30, %v788_v28 }
 0x17b   : > { %983 = vst [vmem:[#allocation2 + $0xf8] sm:$0xff] %v951_v31  ;;  %v936_v33 = vadd.f32 %v878_v32, %v438_v29 }
 0x17d   : > { %968 = vst [vmem:[#allocation2 + $0x8] sm:$0xff] %v936_v33  ;;  %v828_v34 = vpop.f32.mrf.mxu2 }
 0x17e   : > { %v917_v36 = vpop.f32.mrf.mxu3 }
 0x17f   : > { %v918_v37 = vadd.f32 %v917_v36, %v828_v34  ;;  %v790_v38 = vpop.f32.mrf.mxu0 }
 0x180   : > { %v879_v40 = vpop.f32.mrf.mxu1 }
 0x181   : > { %v952_v41 = vadd.f32 %v918_v37, %v454_v35  ;;  %v880_v42 = vadd.f32 %v879_v40, %v790_v38 }
 0x183   : > { %984 = vst [vmem:[#allocation2 + $0x20] sm:$0xff] %v952_v41  ;;  %v937_v43 = vadd.f32 %v880_v42, %v439_v39 }
 0x185   : > { %969 = vst [vmem:[#allocation2 + $0x78] sm:$0xff] %v937_v43  ;;  %v830_v44 = vpop.f32.mrf.mxu2 }
 0x186   : > { %v919_v46 = vpop.f32.mrf.mxu3 }
 0x187   : > { %v920_v47 = vadd.f32 %v919_v46, %v830_v44  ;;  %989 = sbr.rel (%p1409_p12) target bundleno = 418 (0x1a2), region = 78 }
 0x189   : > { %v953_v48 = vadd.f32 %v920_v47, %v455_v45 }
 0x18b   : > { %985 = vst [vmem:[#allocation2 + $0x98] sm:$0xff] %v953_v48 }
 0x18c   : > { %v990_v49 = vld [vmem:[#allocation2 + $0xb0] sm:$0xff]  ;;  %v991_v50 = vld [vmem:[#allocation2] sm:$0xff]  ;;  %v992_v52 = vld [vmem:[#allocation2 + $0xd8] sm:$0xff] }
 0x18d   : > { %v1937_v51 = vld [vmem:[%s2010_s2] ss:$0 sm:$0xff]  ;;  %v993_v53 = vld [vmem:[#allocation2 + $0x18] sm:$0xff]  ;;  %v994_v54 = vld [vmem:[#allocation2 + $0x50] sm:$0xff] }
 0x18e   : > { %v995_v55 = vld [vmem:[#allocation2 + $0x68] sm:$0xff]  ;;  %v996_v56 = vld [vmem:[#allocation2 + $0x30] sm:$0xff]  ;;  %v1026_v57 = vadd.f32 %v1937_v51, %v990_v49  ;;  %v1027_v58 = vadd.f32 %v1937_v51, %v991_v50  ;;  %v1028_v59 = vadd.f32 %v1937_v51, %v992_v52  ;;  %v1029_v60 = vadd.f32 %v1937_v51, %v993_v53  ;;  %v998_v62 = vld [vmem:[#allocation2 + $0x80] sm:$0xff] }
 0x18f   : > { %v997_v61 = vld [vmem:[#allocation2 + $0x48] sm:$0xff]  ;;  %v1030_v0 = vadd.f32 %v1937_v51, %v994_v54  ;;  %v1031_v1 = vadd.f32 %v1937_v51, %v995_v55  ;;  %v1032_v2 = vadd.f32 %v1937_v51, %v996_v56  ;;  %v1001_v5 = vld [vmem:[#allocation2 + $0xb8] sm:$0xff]  ;;  %v1002_v6 = vld [vmem:[#allocation2 + $0x60] sm:$0xff]  ;;  %v1034_v9 = vadd.f32 %v1937_v51, %v998_v62 }
 0x190   : > { %v999_v63 = vld [vmem:[#allocation2 + $0x88] sm:$0xff]  ;;  %v1033_v3 = vadd.f32 %v1937_v51, %v997_v61  ;;  %v1464_v7 = vpack.c.bf16 %v1027_v58, %v1026_v57  ;;  %v1469_v8 = vpack.c.bf16 %v1029_v60, %v1028_v59  ;;  %v1003_v11 = vld [vmem:[#allocation2 + $0xf0] sm:$0xff]  ;;  %v1005_v13 = vld [vmem:[#allocation2 + $0x78] sm:$0xff]  ;;  %v1037_v17 = vadd.f32 %v1937_v51, %v1001_v5 }
 0x191   : > { %v1000_v4 = vld [vmem:[#allocation2 + $0xe8] sm:$0xff]  ;;  %v1035_v10 = vadd.f32 %v1937_v51, %v999_v63  ;;  %v1474_v14 = vpack.c.bf16 %v1031_v1, %v1030_v0  ;;  %v1006_v18 = vld [vmem:[#allocation2 + $0x38] sm:$0xff]  ;;  %v1008_v20 = vld [vmem:[#allocation2 + $0x40] sm:$0xff]  ;;  %v1038_v22 = vadd.f32 %v1937_v51, %v1002_v6  ;;  %v1039_v23 = vadd.f32 %v1937_v51, %v1003_v11 }
 0x192   : > { %v1004_v12 = vld [vmem:[#allocation2 + $0x8] sm:$0xff]  ;;  %v1479_v15 = vpack.c.bf16 %v1033_v3, %v1032_v2  ;;  %v1036_v16 = vadd.f32 %v1937_v51, %v1000_v4  ;;  %v1007_v19 = vld [vmem:[#allocation2 + $0x58] sm:$0xff]  ;;  %1465 = vst [vmem:[%s1842_s24] sm:$0xff] %v1464_v7   ;;  %v1010_v26 = vld [vmem:[#allocation2 + $0xe0] sm:$0xff]  ;;  %v1041_v29 = vadd.f32 %v1937_v51, %v1005_v13  ;;  %v1042_v30 = vadd.f32 %v1937_v51, %v1006_v18 }
 0x193   : > { %v1484_v21 = vpack.c.bf16 %v1035_v10, %v1034_v9  ;;  %v1040_v24 = vadd.f32 %v1937_v51, %v1004_v12  ;;  %v1009_v25 = vld [vmem:[#allocation2 + $0xc8] sm:$0xff]  ;;  %v1011_v27 = vld [vmem:[#allocation2 + $0x90] sm:$0xff]  ;;  %1541 = vst [vmem:[%s1842_s24 + $0x8] sm:$0xff] %v1469_v8   ;;  %v1043_v31 = vadd.f32 %v1937_v51, %v1007_v19  ;;  %v1013_v33 = vld [vmem:[#allocation2 + $0xc0] sm:$0xff]  ;;  %v1494_v35 = vpack.c.bf16 %v1039_v23, %v1038_v22 }
 0x194   : > { %v1489_v28 = vpack.c.bf16 %v1037_v17, %v1036_v16  ;;  %v1012_v32 = vld [vmem:[#allocation2 + $0x70] sm:$0xff]  ;;  %v1014_v34 = vld [vmem:[#allocation2 + $0xa8] sm:$0xff]  ;;  %1542 = vst [vmem:[%s1842_s24 + $0x10] sm:$0xff] %v1474_v14   ;;  %v1044_v36 = vadd.f32 %v1937_v51, %v1008_v20  ;;  %v1045_v37 = vadd.f32 %v1937_v51, %v1009_v25  ;;  %v1046_v38 = vadd.f32 %v1937_v51, %v1010_v26  ;;  %v1018_v45 = vld [vmem:[#allocation2 + $0xa0] sm:$0xff] }
 0x195   : > { %v1015_v39 = vld [vmem:[#allocation2 + $0xd0] sm:$0xff]  ;;  %v1017_v41 = vld [vmem:[#allocation2 + $0x28] sm:$0xff]  ;;  %1543 = vst [vmem:[%s1842_s24 + $0x18] sm:$0xff] %v1479_v15   ;;  %v1499_v42 = vpack.c.bf16 %v1041_v29, %v1040_v24  ;;  %v1047_v43 = vadd.f32 %v1937_v51, %v1011_v27  ;;  %v1048_v44 = vadd.f32 %v1937_v51, %v1012_v32  ;;  %v1019_v46 = vld [vmem:[#allocation2 + $0xf8] sm:$0xff]  ;;  %v1504_v47 = vpack.c.bf16 %v1043_v31, %v1042_v30 }
 0x196   : > { %v1016_v40 = vld [vmem:[#allocation2 + $0x10] sm:$0xff]  ;;  %1544 = vst [vmem:[%s1842_s24 + $0x20] sm:$0xff] %v1484_v21   ;;  %v1049_v48 = vadd.f32 %v1937_v51, %v1013_v33  ;;  %v1050_v49 = vadd.f32 %v1937_v51, %v1014_v34  ;;  %v1051_v50 = vadd.f32 %v1937_v51, %v1015_v39  ;;  %v1020_v52 = vld [vmem:[#allocation2 + $0x20] sm:$0xff]  ;;  %v1021_v53 = vld [vmem:[#allocation2 + $0x98] sm:$0xff]  ;;  %v1509_v54 = vpack.c.bf16 %v1045_v37, %v1044_v36 }
 0x197   : > { %1545 = vst [vmem:[%s1842_s24 + $0x28] sm:$0xff] %v1489_v28   ;;  %v1052_v55 = vadd.f32 %v1937_v51, %v1016_v40  ;;  %v1053_v56 = vadd.f32 %v1937_v51, %v1017_v41  ;;  %v1514_v57 = vpack.c.bf16 %v1047_v43, %v1046_v38  ;;  %v1054_v58 = vadd.f32 %v1937_v51, %v1018_v45 }
 0x198   : > { %1546 = vst [vmem:[%s1842_s24 + $0x30] sm:$0xff] %v1494_v35   ;;  %v1055_v59 = vadd.f32 %v1937_v51, %v1019_v46  ;;  %v1519_v60 = vpack.c.bf16 %v1049_v48, %v1048_v44  ;;  %v1056_v61 = vadd.f32 %v1937_v51, %v1020_v52  ;;  %v1057_v62 = vadd.f32 %v1937_v51, %v1021_v53 }
 0x199   : > { %1547 = vst [vmem:[%s1842_s24 + $0x38] sm:$0xff] %v1499_v42   ;;  %v1524_v63 = vpack.c.bf16 %v1051_v50, %v1050_v49  ;;  %v1529_v0 = vpack.c.bf16 %v1053_v56, %v1052_v55 }
 0x19a   : > { %1548 = vst [vmem:[%s1842_s24 + $0x40] sm:$0xff] %v1504_v47   ;;  %v1534_v1 = vpack.c.bf16 %v1055_v59, %v1054_v58  ;;  %v1539_v2 = vpack.c.bf16 %v1057_v62, %v1056_v61 }
 0x19b   : > { %1549 = vst [vmem:[%s1842_s24 + $0x48] sm:$0xff] %v1509_v54  }
 0x19c   : > { %1550 = vst [vmem:[%s1842_s24 + $0x50] sm:$0xff] %v1514_v57  }
 0x19d   : > { %1551 = vst [vmem:[%s1842_s24 + $0x58] sm:$0xff] %v1519_v60  }
 0x19e   : > { %1552 = vst [vmem:[%s1842_s24 + $0x60] sm:$0xff] %v1524_v63  }
 0x19f   : > { %1553 = vst [vmem:[%s1842_s24 + $0x68] sm:$0xff] %v1529_v0  }
 0x1a0   : > { %1554 = vst [vmem:[%s1842_s24 + $0x70] sm:$0xff] %v1534_v1  }
 0x1a1   : > { %1555 = vst [vmem:[%s1842_s24 + $0x78] sm:$0xff] %v1539_v2  }
 0x1a2 PF: > { %s13_s18 = sadd.s32 1, %s1684_s18   ;;  %s2012_s12 = smov %s1664_s13 }
 0x1a3   : > { %p10_p13 = scmp.ge.s32.totalorder %s13_s18, 6   ;;  %s2013_s13 = smov %s1758_s25 }
 0x1a4   : > { %s2014_s14 = smov %s1676_s16  ;;  %s2015_s15 = smov %s1680_s17 }
 0x1a5   : > { %s2016_s16 = smov %s2019_s19  ;;  %s2017_s17 = smov %s2023_s20 }
 0x1a6   :  { %12 = sbr.rel (!%p10_p13) target bundleno = 4 (0x4), region = 114 }

// kernel: gcn_forward.4
= control target key start
LH: loop header
LB: loop body
LE: loop exit
PB: predicated region body
PF: predicated region fallthrough
CT: control target
= control target key end

     0   :  { %s2069_s15 = smov 0   ;;  %s2071_s16 = smov 0   ;;  %s2516_s0 = inlined_call_operand.vmem [shape: bf16[512,512], index: 0, kind: input, shape index: {}]   ;;  %s2517_s1 = inlined_call_operand.vmem [shape: bf16[512,128], index: 1, kind: input, shape index: {}]   ;;  %s2518_s2 = inlined_call_operand.vmem [shape: bf16[128,256], index: 2, kind: input, shape index: {}]   ;;  %s2519_s3 = inlined_call_operand.vmem [shape: f32[1,256], index: 3, kind: input, shape index: {}]   ;;  %s2520_s4 = inlined_call_operand.vmem [shape: bf16[512,256], index: 4, kind: output, shape index: {}]  }
   0x1   :  { %s2073_s17 = smov 0   ;;  %s2075_s18 = smov 0  }
   0x2   :  { %s2077_s19 = smov 0   ;;  %s2079_s20 = smov 0  }
   0x3   :  { %s2081_s21 = smov 0  }
   0x4 LB: > { %s23_s22 = sadd.s32 1, %s2033_s19  ;;  %s26_s23 = sadd.s32 1, %s2037_s20  ;;  %s2041_s21 = sphi %s2081_s21, %s14_s21   ;;  %s2037_s20 = sphi %s2079_s20, %s2526_s20   ;;  %s2033_s19 = sphi %s2077_s19, %s2525_s19   ;;  %s2029_s18 = sphi %s2075_s18, %s2524_s18   ;;  %s2025_s17 = sphi %s2073_s17, %s2523_s17   ;;  %s2021_s16 = sphi %s2071_s16, %s2522_s16   ;;  %s2017_s15 = sphi %s2069_s15, %s2521_s15  }
   0x5   : > { %p24_p0 = scmp.ge.s32.totalorder %s23_s22, 2  ;;  %p42_p1 = scmp.ne.s32.totalorder %s2021_s16, %s2017_s15 }
   0x6   : > { %p43_p2 = scmp.eq.s32.totalorder %s2041_s21, 0  ;;  %s35_s27 = sadd.s32 1, %s2021_s16 }
   0x7   : > { %s2528_s22 = smov (%p24_p0, %s23_s22), 0  ;;  %s2530_s23 = smov (!%p24_p0, %s26_s23), %s2037_s20 }
   0x8   : > { %p44_p3 = por %p43_p2, %p42_p1  ;;  %p28_p4 = scmp.ge.s32.totalorder %s2530_s23, 2 }
   0x9   : > { %s31_s24 = ssub.s32 %s2033_s19, %s2528_s22  ;;  %p1559_p6 = scmp.ge.s32.totalorder %s2041_s21, 4 }
   0xa   : > { %s2532_s23 = smov (%p28_p4, %s2530_s23), 0 }
   0xb   : > { %s30_s25 = ssub.s32 %s2037_s20, %s2532_s23  ;;  %166 = sbr.rel (%p1559_p6) target bundleno = 55 (0x37), region = 28 }
   0xc   : > { %s32_s26 = sor.u32 %s31_s24, %s30_s25 }
   0xd   : > { %p33_p5 = scmp.eq.s32.totalorder %s32_s26, 0 }
   0xf   : > { %s2120_s28 = scalar_select %p33_p5, %s2021_s16, %s35_s27  }
  0x10   : > { %169 = sbr.rel (!%p44_p3) target bundleno = 55 (0x37), region = 32  ;;  %s171_s29 = sand.u32 (%p44_p3), 1, %s2021_s16  }
  0x11   : > { %s1562_s30 = sshll.u32 (%p44_p3), %s2033_s19, 1  ;;  %s1560_s5 = sshll.u32 (%p44_p3), %s171_s29, 8 }
  0x12   : > { %s1832_s6 = sshll.u32 (%p44_p3), %s2037_s20, 7  ;;  %s2134_s12 = scalar_lea.vmem (%p44_p3), [#allocation3], %s1560_s5 }
  0x13   : > { %s177_s7 = sadd.s32 (%p44_p3), %s1832_s6, %s1562_s30 }
  0x14   : > { %s1564_s8 = sshll.u32 (%p44_p3), %s177_s7, 2 }
  0x15   : > { %s2129_s11 = scalar_lea.vmem %s2516_s0, %s1564_s8 }
  0x16   : > { %v270_v0 = vld [vmem:[%s2129_s11] sm:$0xff]  ;;  %v272_v1 = vld [vmem:[%s2129_s11 + $0x10] sm:$0xff] }
  0x17   : > { %v274_v2 = vld [vmem:[%s2129_s11 + $0x20] sm:$0xff]  ;;  %271 = vst [vmem:[%s2134_s12] sm:$0xff] %v270_v0  ;;  %v276_v3 = vld [vmem:[%s2129_s11 + $0x30] sm:$0xff] }
  0x18   : > { %273 = vst [vmem:[%s2134_s12 + $0x8] sm:$0xff] %v272_v1  ;;  %v278_v4 = vld [vmem:[%s2129_s11 + $0x40] sm:$0xff]  ;;  %v280_v5 = vld [vmem:[%s2129_s11 + $0x50] sm:$0xff] }
  0x19   : > { %275 = vst [vmem:[%s2134_s12 + $0x10] sm:$0xff] %v274_v2  ;;  %v282_v6 = vld [vmem:[%s2129_s11 + $0x60] sm:$0xff]  ;;  %v284_v7 = vld [vmem:[%s2129_s11 + $0x70] sm:$0xff] }
  0x1a   : > { %277 = vst [vmem:[%s2134_s12 + $0x18] sm:$0xff] %v276_v3  ;;  %v286_v8 = vld [vmem:[%s2129_s11 + $0x80] sm:$0xff]  ;;  %v288_v9 = vld [vmem:[%s2129_s11 + $0x90] sm:$0xff] }
  0x1b   : > { %279 = vst [vmem:[%s2134_s12 + $0x20] sm:$0xff] %v278_v4  ;;  %v290_v10 = vld [vmem:[%s2129_s11 + $0xa0] sm:$0xff]  ;;  %v292_v11 = vld [vmem:[%s2129_s11 + $0xb0] sm:$0xff] }
  0x1c   : > { %281 = vst [vmem:[%s2134_s12 + $0x28] sm:$0xff] %v280_v5  ;;  %v294_v12 = vld [vmem:[%s2129_s11 + $0xc0] sm:$0xff]  ;;  %v296_v13 = vld [vmem:[%s2129_s11 + $0xd0] sm:$0xff] }
  0x1d   : > { %283 = vst [vmem:[%s2134_s12 + $0x30] sm:$0xff] %v282_v6  ;;  %v298_v14 = vld [vmem:[%s2129_s11 + $0xe0] sm:$0xff]  ;;  %v300_v15 = vld [vmem:[%s2129_s11 + $0xf0] sm:$0xff] }
  0x1e   : > { %285 = vst [vmem:[%s2134_s12 + $0x38] sm:$0xff] %v284_v7  ;;  %v302_v16 = vld [vmem:[%s2129_s11 + $0x100] sm:$0xff]  ;;  %v304_v17 = vld [vmem:[%s2129_s11 + $0x110] sm:$0xff] }
  0x1f   : > { %287 = vst [vmem:[%s2134_s12 + $0x40] sm:$0xff] %v286_v8  ;;  %v306_v18 = vld [vmem:[%s2129_s11 + $0x120] sm:$0xff]  ;;  %v308_v19 = vld [vmem:[%s2129_s11 + $0x130] sm:$0xff] }
  0x20   : > { %289 = vst [vmem:[%s2134_s12 + $0x48] sm:$0xff] %v288_v9  ;;  %v310_v20 = vld [vmem:[%s2129_s11 + $0x140] sm:$0xff]  ;;  %v312_v21 = vld [vmem:[%s2129_s11 + $0x150] sm:$0xff] }
  0x21   : > { %291 = vst [vmem:[%s2134_s12 + $0x50] sm:$0xff] %v290_v10  ;;  %v314_v22 = vld [vmem:[%s2129_s11 + $0x160] sm:$0xff]  ;;  %v316_v23 = vld [vmem:[%s2129_s11 + $0x170] sm:$0xff] }
  0x22   : > { %293 = vst [vmem:[%s2134_s12 + $0x58] sm:$0xff] %v292_v11  ;;  %v318_v24 = vld [vmem:[%s2129_s11 + $0x180] sm:$0xff]  ;;  %v320_v25 = vld [vmem:[%s2129_s11 + $0x190] sm:$0xff] }
  0x23   : > { %295 = vst [vmem:[%s2134_s12 + $0x60] sm:$0xff] %v294_v12  ;;  %v322_v26 = vld [vmem:[%s2129_s11 + $0x1a0] sm:$0xff]  ;;  %v324_v27 = vld [vmem:[%s2129_s11 + $0x1b0] sm:$0xff] }
  0x24   : > { %297 = vst [vmem:[%s2134_s12 + $0x68] sm:$0xff] %v296_v13  ;;  %v326_v28 = vld [vmem:[%s2129_s11 + $0x1c0] sm:$0xff]  ;;  %v328_v29 = vld [vmem:[%s2129_s11 + $0x1d0] sm:$0xff] }
  0x25   : > { %299 = vst [vmem:[%s2134_s12 + $0x70] sm:$0xff] %v298_v14  ;;  %v330_v30 = vld [vmem:[%s2129_s11 + $0x1e0] sm:$0xff]  ;;  %v332_v31 = vld [vmem:[%s2129_s11 + $0x1f0] sm:$0xff] }
  0x26   : > { %301 = vst [vmem:[%s2134_s12 + $0x78] sm:$0xff] %v300_v15 }
  0x27   : > { %303 = vst [vmem:[%s2134_s12 + $0x80] sm:$0xff] %v302_v16 }
  0x28   : > { %305 = vst [vmem:[%s2134_s12 + $0x88] sm:$0xff] %v304_v17 }
  0x29   : > { %307 = vst [vmem:[%s2134_s12 + $0x90] sm:$0xff] %v306_v18 }
  0x2a   : > { %309 = vst [vmem:[%s2134_s12 + $0x98] sm:$0xff] %v308_v19 }
  0x2b   : > { %311 = vst [vmem:[%s2134_s12 + $0xa0] sm:$0xff] %v310_v20 }
  0x2c   : > { %313 = vst [vmem:[%s2134_s12 + $0xa8] sm:$0xff] %v312_v21 }
  0x2d   : > { %315 = vst [vmem:[%s2134_s12 + $0xb0] sm:$0xff] %v314_v22 }
  0x2e   : > { %317 = vst [vmem:[%s2134_s12 + $0xb8] sm:$0xff] %v316_v23 }
  0x2f   : > { %319 = vst [vmem:[%s2134_s12 + $0xc0] sm:$0xff] %v318_v24 }
  0x30   : > { %321 = vst [vmem:[%s2134_s12 + $0xc8] sm:$0xff] %v320_v25 }
  0x31   : > { %323 = vst [vmem:[%s2134_s12 + $0xd0] sm:$0xff] %v322_v26 }
  0x32   : > { %325 = vst [vmem:[%s2134_s12 + $0xd8] sm:$0xff] %v324_v27 }
  0x33   : > { %327 = vst [vmem:[%s2134_s12 + $0xe0] sm:$0xff] %v326_v28 }
  0x34   : > { %329 = vst [vmem:[%s2134_s12 + $0xe8] sm:$0xff] %v328_v29 }
  0x35   : > { %331 = vst [vmem:[%s2134_s12 + $0xf0] sm:$0xff] %v330_v30 }
  0x36   : > { %333 = vst [vmem:[%s2134_s12 + $0xf8] sm:$0xff] %v332_v31 }
  0x37 PF: > { %p1565_p7 = scmp.ge.s32.totalorder %s2041_s21, 1  ;;  %p338_p8 = scmp.lt.s32.totalorder %s2041_s21, 5 }
  0x39   : > { %p339_p9 = pnand %p1565_p7, %p338_p8 }
  0x3a   : > { %s345_s13 = sand.u32 (!%p339_p9), 1, %s2017_s15   ;;  %s1567_s14 = sshll.u32 (!%p339_p9), %s2029_s18, 5 }
  0x3b   : > { %342 = sbr.rel (%p339_p9) target bundleno = 690 (0x2b2), region = 70  ;;  %s1566_s24 = sshll.u32 (!%p339_p9), %s345_s13, 8 }
  0x3c   : > { %p374_p10 = scmp.lt.s32.totalorder (!%p339_p9), %s1567_s14, 63  ;;  %s2206_s30 = scalar_lea.vmem (!%p339_p9), [#allocation3], %s1566_s24 }
  0x3d   : > { %p1570_p11 = scmp.ne.s32.totalorder (!%p339_p9), %s2025_s17, 0 }
  0x40   : > { %s2534_s14 = smov (!%p374_p10, %s1567_s14), 63  ;;  %383 = sbr.rel (%p1570_p11) target bundleno = 102 (0x66), region = 78 }
  0x41   : > { %s1833_s25 = sshll.u32 %s2534_s14, 3 }
  0x42   : > { %s2204_s29 = scalar_lea.vmem %s2520_s4, %s1833_s25 }
  0x45   : > { %v2043_v32 = vmov 0.0  }
  0x46   : > { %384 = vst [vmem:[#allocation2 + $0xb0] sm:$0xff] %v2043_v32 }
  0x47   : > { %385 = vst [vmem:[#allocation2] sm:$0xff] %v2043_v32 }
  0x48   : > { %386 = vst [vmem:[#allocation2 + $0xd8] sm:$0xff] %v2043_v32 }
  0x49   : > { %387 = vst [vmem:[#allocation2 + $0x18] sm:$0xff] %v2043_v32 }
  0x4a   : > { %388 = vst [vmem:[#allocation2 + $0x50] sm:$0xff] %v2043_v32 }
  0x4b   : > { %389 = vst [vmem:[#allocation2 + $0x68] sm:$0xff] %v2043_v32 }
  0x4c   : > { %390 = vst [vmem:[#allocation2 + $0x30] sm:$0xff] %v2043_v32 }
  0x4d   : > { %391 = vst [vmem:[#allocation2 + $0x48] sm:$0xff] %v2043_v32 }
  0x4e   : > { %392 = vst [vmem:[#allocation2 + $0x80] sm:$0xff] %v2043_v32 }
  0x4f   : > { %393 = vst [vmem:[#allocation2 + $0x88] sm:$0xff] %v2043_v32 }
  0x50   : > { %394 = vst [vmem:[#allocation2 + $0xe8] sm:$0xff] %v2043_v32 }
  0x51   : > { %395 = vst [vmem:[#allocation2 + $0xb8] sm:$0xff] %v2043_v32 }
  0x52   : > { %396 = vst [vmem:[#allocation2 + $0x60] sm:$0xff] %v2043_v32 }
  0x53   : > { %397 = vst [vmem:[#allocation2 + $0xf0] sm:$0xff] %v2043_v32 }
  0x54   : > { %398 = vst [vmem:[#allocation2 + $0x8] sm:$0xff] %v2043_v32 }
  0x55   : > { %399 = vst [vmem:[#allocation2 + $0x78] sm:$0xff] %v2043_v32 }
  0x56   : > { %400 = vst [vmem:[#allocation2 + $0x38] sm:$0xff] %v2043_v32 }
  0x57   : > { %401 = vst [vmem:[#allocation2 + $0x58] sm:$0xff] %v2043_v32 }
  0x58   : > { %402 = vst [vmem:[#allocation2 + $0x40] sm:$0xff] %v2043_v32 }
  0x59   : > { %403 = vst [vmem:[#allocation2 + $0xc8] sm:$0xff] %v2043_v32 }
  0x5a   : > { %404 = vst [vmem:[#allocation2 + $0xe0] sm:$0xff] %v2043_v32 }
  0x5b   : > { %405 = vst [vmem:[#allocation2 + $0x90] sm:$0xff] %v2043_v32 }
  0x5c   : > { %406 = vst [vmem:[#allocation2 + $0x70] sm:$0xff] %v2043_v32 }
  0x5d   : > { %407 = vst [vmem:[#allocation2 + $0xc0] sm:$0xff] %v2043_v32 }
  0x5e   : > { %408 = vst [vmem:[#allocation2 + $0xa8] sm:$0xff] %v2043_v32 }
  0x5f   : > { %409 = vst [vmem:[#allocation2 + $0xd0] sm:$0xff] %v2043_v32 }
  0x60   : > { %410 = vst [vmem:[#allocation2 + $0x10] sm:$0xff] %v2043_v32 }
  0x61   : > { %411 = vst [vmem:[#allocation2 + $0x28] sm:$0xff] %v2043_v32 }
  0x62   : > { %412 = vst [vmem:[#allocation2 + $0xa0] sm:$0xff] %v2043_v32 }
  0x63   : > { %413 = vst [vmem:[#allocation2 + $0xf8] sm:$0xff] %v2043_v32 }
  0x64   : > { %414 = vst [vmem:[#allocation2 + $0x20] sm:$0xff] %v2043_v32 }
  0x65   : > { %415 = vst [vmem:[#allocation2 + $0x98] sm:$0xff] %v2043_v32 }
  0x66 PF: > { %s1571_s15 = sshll.u32 %s2025_s17, 8  ;;  %v1575_v47 = vld [vmem:[%s2206_s30] sm:$0xf]  ;;  %v1851_v49 = vld [vmem:[%s2206_s30 + $0x4] sm:$0xf0]  ;;  %p1765_p12 = scmp.ne.s32.totalorder %s2025_s17, 1 }
  0x67   : > { %s417_s18 = sshra.s32 %s1571_s15, 3  ;;  %v1639_v50 = vld [vmem:[%s2206_s30 + $0x80] sm:$0xf]  ;;  %v1867_v52 = vld [vmem:[%s2206_s30 + $0x84] sm:$0xf0]  ;;  %v1576_v57 = vor.u32 %v1851_v49, %v1575_v47 }
  0x68   : > { %s1572_s5 = sshll.u32 %s417_s18, 2  ;;  %v1850_v53 = vld [vmem:[%s2206_s30 + $0x4] sm:$0xf]  ;;  %v1577_v54 = vld [vmem:[%s2206_s30 + $0x8] sm:$0xf0]  ;;  %v1640_v58 = vor.u32 %v1867_v52, %v1639_v50 }
  0x69   : > { %s2213_s8 = scalar_lea.vmem %s2517_s1, %s1572_s5  ;;  %v1866_v55 = vld [vmem:[%s2206_s30 + $0x84] sm:$0xf]  ;;  %v1641_v56 = vld [vmem:[%s2206_s30 + $0x88] sm:$0xf0]  ;;  %v1580_v59 = vor.u32 %v1850_v53, %v1577_v54  ;;  %v1583_v61 = vld [vmem:[%s2206_s30 + $0x10] sm:$0xf] }
  0x6a   : > { %v1841_v33 = vld [vmem:[%s2213_s8 + $0x38] sm:$0xff]  ;;  %v1840_v35 = vld [vmem:[%s2213_s8 + $0x30] sm:$0xff]  ;;  %v1839_v37 = vld [vmem:[%s2213_s8 + $0x28] sm:$0xff]  ;;  %v1644_v60 = vor.u32 %v1866_v55, %v1641_v56 }
  0x6b   : > { %v1849_v34 = vld [vmem:[%s2213_s8 + $0x78] sm:$0xff]  ;;  %773 = vmatpush.bf16.msra.mxu0 %v1841_v33  ;;  %1898 = vmatpush.bf16.msra.mxu2 %v1841_v33  ;;  %v1848_v36 = vld [vmem:[%s2213_s8 + $0x70] sm:$0xff]  ;;  %v1847_v38 = vld [vmem:[%s2213_s8 + $0x68] sm:$0xff] }
  0x6c   : > { %862 = vmatpush.bf16.msra.mxu1 %v1849_v34  ;;  %1906 = vmatpush.bf16.msra.mxu3 %v1849_v34  ;;  %v1838_v39 = vld [vmem:[%s2213_s8 + $0x20] sm:$0xff]  ;;  %v1837_v41 = vld [vmem:[%s2213_s8 + $0x18] sm:$0xff]  ;;  %v1836_v43 = vld [vmem:[%s2213_s8 + $0x10] sm:$0xff] }
  0x6d   : > { %v1846_v40 = vld [vmem:[%s2213_s8 + $0x60] sm:$0xff]  ;;  %v1845_v42 = vld [vmem:[%s2213_s8 + $0x58] sm:$0xff]  ;;  %v1844_v44 = vld [vmem:[%s2213_s8 + $0x50] sm:$0xff] }
  0x6e   : > { %v1835_v45 = vld [vmem:[%s2213_s8 + $0x8] sm:$0xff]  ;;  %v1834_v48 = vld [vmem:[%s2213_s8] sm:$0xff]  ;;  %v1853_v62 = vld [vmem:[%s2206_s30 + $0x14] sm:$0xf0] }
  0x6f   : > { %774 = vmatpush.bf16.msra.mxu0 %v1840_v35  ;;  %1899 = vmatpush.bf16.msra.mxu2 %v1840_v35  ;;  %v1843_v46 = vld [vmem:[%s2213_s8 + $0x48] sm:$0xff]  ;;  %v1842_v51 = vld [vmem:[%s2213_s8 + $0x40] sm:$0xff]  ;;  %v1647_v63 = vld [vmem:[%s2206_s30 + $0x90] sm:$0xf]  ;;  %v1584_v5 = vor.u32 %v1853_v62, %v1583_v61 }
  0x70   : > { %863 = vmatpush.bf16.msra.mxu1 %v1848_v36  ;;  %1907 = vmatpush.bf16.msra.mxu3 %v1848_v36  ;;  %v1869_v0 = vld [vmem:[%s2206_s30 + $0x94] sm:$0xf0]  ;;  %v1852_v1 = vld [vmem:[%s2206_s30 + $0x14] sm:$0xf]  ;;  %v1585_v2 = vld [vmem:[%s2206_s30 + $0x18] sm:$0xf0] }
  0x71   : > { %v1868_v3 = vld [vmem:[%s2206_s30 + $0x94] sm:$0xf]  ;;  %v1649_v4 = vld [vmem:[%s2206_s30 + $0x98] sm:$0xf0]  ;;  %v1648_v6 = vor.u32 %v1869_v0, %v1647_v63  ;;  %v1588_v7 = vor.u32 %v1852_v1, %v1585_v2  ;;  %v1591_v9 = vld [vmem:[%s2206_s30 + $0x20] sm:$0xf] }
  0x72   : > { %v1652_v8 = vor.u32 %v1868_v3, %v1649_v4  ;;  %v1855_v10 = vld [vmem:[%s2206_s30 + $0x24] sm:$0xf0]  ;;  %v1655_v11 = vld [vmem:[%s2206_s30 + $0xa0] sm:$0xf]  ;;  %v1854_v13 = vld [vmem:[%s2206_s30 + $0x24] sm:$0xf] }
  0x73   : > { %775 = vmatpush.bf16.msra.mxu0 %v1839_v37  ;;  %1900 = vmatpush.bf16.msra.mxu2 %v1839_v37  ;;  %v1871_v12 = vld [vmem:[%s2206_s30 + $0xa4] sm:$0xf0]  ;;  %v1593_v14 = vld [vmem:[%s2206_s30 + $0x28] sm:$0xf0]  ;;  %v1870_v15 = vld [vmem:[%s2206_s30 + $0xa4] sm:$0xf]  ;;  %v1592_v17 = vor.u32 %v1855_v10, %v1591_v9 }
  0x74   : > { %864 = vmatpush.bf16.msra.mxu1 %v1847_v38  ;;  %1908 = vmatpush.bf16.msra.mxu3 %v1847_v38  ;;  %v1657_v16 = vld [vmem:[%s2206_s30 + $0xa8] sm:$0xf0]  ;;  %v1656_v18 = vor.u32 %v1871_v12, %v1655_v11  ;;  %v1596_v19 = vor.u32 %v1854_v13, %v1593_v14  ;;  %v1599_v21 = vld [vmem:[%s2206_s30 + $0x30] sm:$0xf]  ;;  %v1857_v22 = vld [vmem:[%s2206_s30 + $0x34] sm:$0xf0] }
  0x75   : > { %v1660_v20 = vor.u32 %v1870_v15, %v1657_v16  ;;  %v1663_v23 = vld [vmem:[%s2206_s30 + $0xb0] sm:$0xf]  ;;  %v1873_v24 = vld [vmem:[%s2206_s30 + $0xb4] sm:$0xf0]  ;;  %v1856_v25 = vld [vmem:[%s2206_s30 + $0x34] sm:$0xf]  ;;  %v1600_v29 = vor.u32 %v1857_v22, %v1599_v21 }
  0x76   : > { %v1601_v26 = vld [vmem:[%s2206_s30 + $0x38] sm:$0xf0]  ;;  %v1872_v27 = vld [vmem:[%s2206_s30 + $0xb4] sm:$0xf]  ;;  %v1664_v30 = vor.u32 %v1873_v24, %v1663_v23  ;;  %v1607_v33 = vld [vmem:[%s2206_s30 + $0x40] sm:$0xf] }
  0x77   : > { %776 = vmatpush.bf16.msra.mxu0 %v1838_v39  ;;  %1901 = vmatpush.bf16.msra.mxu2 %v1838_v39  ;;  %v1665_v28 = vld [vmem:[%s2206_s30 + $0xb8] sm:$0xf0]  ;;  %v1604_v31 = vor.u32 %v1856_v25, %v1601_v26  ;;  %v1859_v34 = vld [vmem:[%s2206_s30 + $0x44] sm:$0xf0]  ;;  %v1671_v35 = vld [vmem:[%s2206_s30 + $0xc0] sm:$0xf] }
  0x78   : > { %865 = vmatpush.bf16.msra.mxu1 %v1846_v40  ;;  %1909 = vmatpush.bf16.msra.mxu3 %v1846_v40  ;;  %v1668_v32 = vor.u32 %v1872_v27, %v1665_v28  ;;  %v1875_v36 = vld [vmem:[%s2206_s30 + $0xc4] sm:$0xf0]  ;;  %v1858_v37 = vld [vmem:[%s2206_s30 + $0x44] sm:$0xf]  ;;  %v1609_v38 = vld [vmem:[%s2206_s30 + $0x48] sm:$0xf0] }
  0x79   : > { %v1874_v39 = vld [vmem:[%s2206_s30 + $0xc4] sm:$0xf]  ;;  %v1673_v40 = vld [vmem:[%s2206_s30 + $0xc8] sm:$0xf0]  ;;  %v1679_v47 = vld [vmem:[%s2206_s30 + $0xd0] sm:$0xf] }
  0x7a   : > { %v1860_v49 = vld [vmem:[%s2206_s30 + $0x54] sm:$0xf]  ;;  %v1617_v50 = vld [vmem:[%s2206_s30 + $0x58] sm:$0xf0]  ;;  %v1862_v61 = vld [vmem:[%s2206_s30 + $0x64] sm:$0xf] }
  0x7b   : > { %777 = vmatpush.bf16.msra.mxu0 %v1837_v41  ;;  %1902 = vmatpush.bf16.msra.mxu2 %v1837_v41  ;;  %v1608_v41 = vor.u32 %v1859_v34, %v1607_v33  ;;  %v1681_v52 = vld [vmem:[%s2206_s30 + $0xd8] sm:$0xf0]  ;;  %v1620_v55 = vor.u32 %v1860_v49, %v1617_v50  ;;  %v1625_v62 = vld [vmem:[%s2206_s30 + $0x68] sm:$0xf0]  ;;  %v1878_v63 = vld [vmem:[%s2206_s30 + $0xe4] sm:$0xf] }
  0x7c   : > { %866 = vmatpush.bf16.msra.mxu1 %v1845_v42  ;;  %1910 = vmatpush.bf16.msra.mxu3 %v1845_v42  ;;  %v1672_v42 = vor.u32 %v1875_v36, %v1671_v35  ;;  %v1689_v0 = vld [vmem:[%s2206_s30 + $0xe8] sm:$0xf0]  ;;  %v1628_v3 = vor.u32 %v1862_v61, %v1625_v62  ;;  %v1864_v9 = vld [vmem:[%s2206_s30 + $0x74] sm:$0xf]  ;;  %v1633_v10 = vld [vmem:[%s2206_s30 + $0x78] sm:$0xf0] }
  0x7d   : > { %v1692_v4 = vor.u32 %v1878_v63, %v1689_v0  ;;  %v1880_v11 = vld [vmem:[%s2206_s30 + $0xf4] sm:$0xf]  ;;  %v1697_v12 = vld [vmem:[%s2206_s30 + $0xf8] sm:$0xf0]  ;;  %v1636_v15 = vor.u32 %v1864_v9, %v1633_v10  ;;  %v454_v27 = vld [vmem:[#allocation2] sm:$0xff] }
  0x7e   : > { %v1700_v16 = vor.u32 %v1880_v11, %v1697_v12  ;;  %v469_v23 = vld [vmem:[#allocation2 + $0x38] sm:$0xff]  ;;  %v473_v63 = vld [vmem:[#allocation2 + $0xe0] sm:$0xff]  ;;  %v474_v9 = vld [vmem:[#allocation2 + $0x90] sm:$0xff] }
  0x7f   : > { %778 = vmatpush.bf16.msra.mxu0 %v1836_v43  ;;  %1903 = vmatpush.bf16.msra.mxu2 %v1836_v43  ;;  %v1612_v43 = vor.u32 %v1858_v37, %v1609_v38  ;;  %v470_v33 = vld [vmem:[#allocation2 + $0x58] sm:$0xff] }
  0x80   : > { %867 = vmatpush.bf16.msra.mxu1 %v1844_v44  ;;  %1911 = vmatpush.bf16.msra.mxu3 %v1844_v44  ;;  %v1676_v44 = vor.u32 %v1874_v39, %v1673_v40  ;;  %v455_v37 = vld [vmem:[#allocation2 + $0xd8] sm:$0xff] }
  0x83   : > { %779 = vmatpush.bf16.msra.mxu0 %v1835_v45  ;;  %1904 = vmatpush.bf16.msra.mxu2 %v1835_v45  ;;  %v1615_v45 = vld [vmem:[%s2206_s30 + $0x50] sm:$0xf] }
  0x84   : > { %868 = vmatpush.bf16.msra.mxu1 %v1843_v46  ;;  %1912 = vmatpush.bf16.msra.mxu3 %v1843_v46  ;;  %v1861_v46 = vld [vmem:[%s2206_s30 + $0x54] sm:$0xf0] }
  0x85   : > { %v1616_v53 = vor.u32 %v1861_v46, %v1615_v45 }
  0x87   : > { %780 = vmatpush.bf16.msra.mxu0 %v1834_v48  ;;  %1905 = vmatpush.bf16.msra.mxu2 %v1834_v48  ;;  %v1877_v48 = vld [vmem:[%s2206_s30 + $0xd4] sm:$0xf0] }
  0x88   : > { %869 = vmatpush.bf16.msra.mxu1 %v1842_v51  ;;  %1913 = vmatpush.bf16.msra.mxu3 %v1842_v51  ;;  %v1876_v51 = vld [vmem:[%s2206_s30 + $0xd4] sm:$0xf]  ;;  %v1680_v54 = vor.u32 %v1877_v48, %v1679_v47  ;;  %v456_v47 = vld [vmem:[#allocation2 + $0x18] sm:$0xff] }
  0x89   : > { %v1684_v56 = vor.u32 %v1876_v51, %v1681_v52 }
  0x8a   : > { %781 = vmatmul.bf16.vlgmr.msra.gmra.mxu0 %v1576_v57  ;;  %821 = vmatmul.bf16.vlgmr.msra.gmra.mxu2 %v1640_v58  ;;  %v1623_v57 = vld [vmem:[%s2206_s30 + $0x60] sm:$0xf]  ;;  %v1863_v58 = vld [vmem:[%s2206_s30 + $0x64] sm:$0xf0] }
  0x8b   : > { %870 = vmatmul.bf16.vlgmr.msra.gmra.mxu1 %v1580_v59  ;;  %910 = vmatmul.bf16.vlgmr.msra.gmra.mxu3 %v1644_v60  ;;  %v1687_v59 = vld [vmem:[%s2206_s30 + $0xe0] sm:$0xf]  ;;  %v1879_v60 = vld [vmem:[%s2206_s30 + $0xe4] sm:$0xf0]  ;;  %v1624_v1 = vor.u32 %v1863_v58, %v1623_v57  ;;  %v457_v57 = vld [vmem:[#allocation2 + $0x50] sm:$0xff] }
  0x8c   : > { %v1688_v2 = vor.u32 %v1879_v60, %v1687_v59 }
  0x9a   : > { %786 = vmatmul.bf16.gmra.mxu0 %v1584_v5  ;;  %826 = vmatmul.bf16.gmra.mxu2 %v1648_v6  ;;  %v1631_v5 = vld [vmem:[%s2206_s30 + $0x70] sm:$0xf]  ;;  %v1865_v6 = vld [vmem:[%s2206_s30 + $0x74] sm:$0xf0] }
  0x9b   : > { %875 = vmatmul.bf16.gmra.mxu1 %v1588_v7  ;;  %915 = vmatmul.bf16.gmra.mxu3 %v1652_v8  ;;  %v1695_v7 = vld [vmem:[%s2206_s30 + $0xf0] sm:$0xf]  ;;  %v1881_v8 = vld [vmem:[%s2206_s30 + $0xf4] sm:$0xf0]  ;;  %v1632_v13 = vor.u32 %v1865_v6, %v1631_v5 }
  0x9c   : > { %v1696_v14 = vor.u32 %v1881_v8, %v1695_v7 }
  0xaa   : > { %791 = vmatmul.bf16.gmra.mxu0 %v1592_v17  ;;  %831 = vmatmul.bf16.gmra.mxu2 %v1656_v18  ;;  %v453_v18 = vld [vmem:[#allocation2 + $0xb0] sm:$0xff] }
  0xab   : > { %880 = vmatmul.bf16.gmra.mxu1 %v1596_v19  ;;  %920 = vmatmul.bf16.gmra.mxu3 %v1660_v20 }
  0xba   : > { %796 = vmatmul.bf16.gmra.mxu0 %v1600_v29  ;;  %836 = vmatmul.bf16.gmra.mxu2 %v1664_v30 }
  0xbb   : > { %885 = vmatmul.bf16.gmra.mxu1 %v1604_v31  ;;  %925 = vmatmul.bf16.gmra.mxu3 %v1668_v32 }
  0xca   : > { %801 = vmatmul.bf16.gmra.mxu0 %v1608_v41  ;;  %841 = vmatmul.bf16.gmra.mxu2 %v1672_v42 }
  0xcb   : > { %890 = vmatmul.bf16.gmra.mxu1 %v1612_v43  ;;  %930 = vmatmul.bf16.gmra.mxu3 %v1676_v44  ;;  %v471_v43 = vld [vmem:[#allocation2 + $0x40] sm:$0xff] }
  0xda   : > { %806 = vmatmul.bf16.gmra.mxu0 %v1616_v53  ;;  %846 = vmatmul.bf16.gmra.mxu2 %v1680_v54  ;;  %v472_v53 = vld [vmem:[#allocation2 + $0xc8] sm:$0xff] }
  0xdb   : > { %895 = vmatmul.bf16.gmra.mxu1 %v1620_v55  ;;  %935 = vmatmul.bf16.gmra.mxu3 %v1684_v56 }
  0xea   : > { %811 = vmatmul.bf16.gmra.mxu0 %v1624_v1  ;;  %851 = vmatmul.bf16.gmra.mxu2 %v1688_v2 }
  0xeb   : > { %900 = vmatmul.bf16.gmra.mxu1 %v1628_v3  ;;  %940 = vmatmul.bf16.gmra.mxu3 %v1692_v4  ;;  %v458_v3 = vld [vmem:[#allocation2 + $0x68] sm:$0xff] }
  0xfa   : > { %816 = vmatmul.bf16.gmra.mxu0 %v1632_v13  ;;  %856 = vmatmul.bf16.gmra.mxu2 %v1696_v14  ;;  %v459_v13 = vld [vmem:[#allocation2 + $0x30] sm:$0xff] }
  0xfb   : > { %905 = vmatmul.bf16.gmra.mxu1 %v1636_v15  ;;  %945 = vmatmul.bf16.gmra.mxu3 %v1700_v16 }
 0x107   : > { %v782_v17 = vpop.f32.mrf.mxu0 }
 0x108   : > { %v871_v19 = vpop.f32.mrf.mxu1 }
 0x109   : > { %v872_v20 = vadd.f32 %v871_v19, %v782_v17  ;;  %v475_v19 = vld [vmem:[#allocation2 + $0x70] sm:$0xff] }
 0x10b   : > { %v951_v21 = vadd.f32 %v872_v20, %v453_v18 }
 0x10d   : > { %983 = vst [vmem:[#allocation2 + $0xb0] sm:$0xff] %v951_v21  ;;  %v822_v22 = vpop.f32.mrf.mxu2 }
 0x10e   : > { %v911_v24 = vpop.f32.mrf.mxu3 }
 0x10f   : > { %v912_v25 = vadd.f32 %v911_v24, %v822_v22  ;;  %v784_v26 = vpop.f32.mrf.mxu0 }
 0x110   : > { %v873_v28 = vpop.f32.mrf.mxu1 }
 0x111   : > { %v967_v29 = vadd.f32 %v912_v25, %v469_v23  ;;  %v874_v30 = vadd.f32 %v873_v28, %v784_v26  ;;  %v460_v23 = vld [vmem:[#allocation2 + $0x48] sm:$0xff] }
 0x113   : > { %999 = vst [vmem:[#allocation2 + $0x38] sm:$0xff] %v967_v29  ;;  %v952_v31 = vadd.f32 %v874_v30, %v454_v27  ;;  %v476_v29 = vld [vmem:[#allocation2 + $0xc0] sm:$0xff] }
 0x115   : > { %984 = vst [vmem:[#allocation2] sm:$0xff] %v952_v31  ;;  %v824_v32 = vpop.f32.mrf.mxu2 }
 0x116   : > { %v913_v34 = vpop.f32.mrf.mxu3 }
 0x117   : > { %v914_v35 = vadd.f32 %v913_v34, %v824_v32  ;;  %v787_v36 = vpop.f32.mrf.mxu0 }
 0x118   : > { %v876_v38 = vpop.f32.mrf.mxu1 }
 0x119   : > { %v968_v39 = vadd.f32 %v914_v35, %v470_v33  ;;  %v877_v40 = vadd.f32 %v876_v38, %v787_v36  ;;  %v461_v33 = vld [vmem:[#allocation2 + $0x80] sm:$0xff] }
 0x11b   : > { %1000 = vst [vmem:[#allocation2 + $0x58] sm:$0xff] %v968_v39  ;;  %v953_v41 = vadd.f32 %v877_v40, %v455_v37  ;;  %v477_v39 = vld [vmem:[#allocation2 + $0xa8] sm:$0xff] }
 0x11d   : > { %985 = vst [vmem:[#allocation2 + $0xd8] sm:$0xff] %v953_v41  ;;  %v827_v42 = vpop.f32.mrf.mxu2 }
 0x11e   : > { %v916_v44 = vpop.f32.mrf.mxu3 }
 0x11f   : > { %v917_v45 = vadd.f32 %v916_v44, %v827_v42  ;;  %v789_v46 = vpop.f32.mrf.mxu0 }
 0x120   : > { %v878_v48 = vpop.f32.mrf.mxu1 }
 0x121   : > { %v969_v49 = vadd.f32 %v917_v45, %v471_v43  ;;  %v879_v50 = vadd.f32 %v878_v48, %v789_v46  ;;  %v462_v43 = vld [vmem:[#allocation2 + $0x88] sm:$0xff] }
 0x123   : > { %1001 = vst [vmem:[#allocation2 + $0x40] sm:$0xff] %v969_v49  ;;  %v954_v51 = vadd.f32 %v879_v50, %v456_v47  ;;  %v478_v49 = vld [vmem:[#allocation2 + $0xd0] sm:$0xff] }
 0x125   : > { %986 = vst [vmem:[#allocation2 + $0x18] sm:$0xff] %v954_v51  ;;  %v829_v52 = vpop.f32.mrf.mxu2 }
 0x126   : > { %v918_v54 = vpop.f32.mrf.mxu3 }
 0x127   : > { %v919_v55 = vadd.f32 %v918_v54, %v829_v52  ;;  %v792_v56 = vpop.f32.mrf.mxu0 }
 0x128   : > { %v881_v58 = vpop.f32.mrf.mxu1 }
 0x129   : > { %v970_v59 = vadd.f32 %v919_v55, %v472_v53  ;;  %v882_v60 = vadd.f32 %v881_v58, %v792_v56  ;;  %v463_v53 = vld [vmem:[#allocation2 + $0xe8] sm:$0xff] }
 0x12b   : > { %1002 = vst [vmem:[#allocation2 + $0xc8] sm:$0xff] %v970_v59  ;;  %v955_v61 = vadd.f32 %v882_v60, %v457_v57  ;;  %v479_v59 = vld [vmem:[#allocation2 + $0x10] sm:$0xff] }
 0x12d   : > { %987 = vst [vmem:[#allocation2 + $0x50] sm:$0xff] %v955_v61  ;;  %v832_v62 = vpop.f32.mrf.mxu2 }
 0x12e   : > { %v921_v0 = vpop.f32.mrf.mxu3 }
 0x12f   : > { %v922_v1 = vadd.f32 %v921_v0, %v832_v62  ;;  %v794_v2 = vpop.f32.mrf.mxu0 }
 0x130   : > { %v883_v4 = vpop.f32.mrf.mxu1 }
 0x131   : > { %v971_v5 = vadd.f32 %v922_v1, %v473_v63  ;;  %v884_v6 = vadd.f32 %v883_v4, %v794_v2  ;;  %v464_v63 = vld [vmem:[#allocation2 + $0xb8] sm:$0xff] }
 0x133   : > { %1003 = vst [vmem:[#allocation2 + $0xe0] sm:$0xff] %v971_v5  ;;  %v956_v7 = vadd.f32 %v884_v6, %v458_v3  ;;  %v480_v5 = vld [vmem:[#allocation2 + $0x28] sm:$0xff] }
 0x135   : > { %988 = vst [vmem:[#allocation2 + $0x68] sm:$0xff] %v956_v7  ;;  %v834_v8 = vpop.f32.mrf.mxu2 }
 0x136   : > { %v923_v10 = vpop.f32.mrf.mxu3 }
 0x137   : > { %v924_v11 = vadd.f32 %v923_v10, %v834_v8  ;;  %v797_v12 = vpop.f32.mrf.mxu0 }
 0x138   : > { %v886_v14 = vpop.f32.mrf.mxu1 }
 0x139   : > { %v972_v15 = vadd.f32 %v924_v11, %v474_v9  ;;  %v887_v16 = vadd.f32 %v886_v14, %v797_v12  ;;  %v465_v9 = vld [vmem:[#allocation2 + $0x60] sm:$0xff] }
 0x13b   : > { %1004 = vst [vmem:[#allocation2 + $0x90] sm:$0xff] %v972_v15  ;;  %v957_v17 = vadd.f32 %v887_v16, %v459_v13  ;;  %v481_v15 = vld [vmem:[#allocation2 + $0xa0] sm:$0xff] }
 0x13d   : > { %989 = vst [vmem:[#allocation2 + $0x30] sm:$0xff] %v957_v17  ;;  %v837_v18 = vpop.f32.mrf.mxu2 }
 0x13e   : > { %v926_v20 = vpop.f32.mrf.mxu3 }
 0x13f   : > { %v927_v21 = vadd.f32 %v926_v20, %v837_v18  ;;  %v799_v22 = vpop.f32.mrf.mxu0 }
 0x140   : > { %v888_v24 = vpop.f32.mrf.mxu1 }
 0x141   : > { %v973_v25 = vadd.f32 %v927_v21, %v475_v19  ;;  %v889_v26 = vadd.f32 %v888_v24, %v799_v22  ;;  %v466_v19 = vld [vmem:[#allocation2 + $0xf0] sm:$0xff] }
 0x143   : > { %1005 = vst [vmem:[#allocation2 + $0x70] sm:$0xff] %v973_v25  ;;  %v958_v27 = vadd.f32 %v889_v26, %v460_v23  ;;  %v482_v25 = vld [vmem:[#allocation2 + $0xf8] sm:$0xff] }
 0x145   : > { %990 = vst [vmem:[#allocation2 + $0x48] sm:$0xff] %v958_v27  ;;  %v839_v28 = vpop.f32.mrf.mxu2 }
 0x146   : > { %v928_v30 = vpop.f32.mrf.mxu3 }
 0x147   : > { %v929_v31 = vadd.f32 %v928_v30, %v839_v28  ;;  %v802_v32 = vpop.f32.mrf.mxu0 }
 0x148   : > { %v891_v34 = vpop.f32.mrf.mxu1 }
 0x149   : > { %v974_v35 = vadd.f32 %v929_v31, %v476_v29  ;;  %v892_v36 = vadd.f32 %v891_v34, %v802_v32  ;;  %v467_v29 = vld [vmem:[#allocation2 + $0x8] sm:$0xff] }
 0x14b   : > { %1006 = vst [vmem:[#allocation2 + $0xc0] sm:$0xff] %v974_v35  ;;  %v959_v37 = vadd.f32 %v892_v36, %v461_v33  ;;  %v483_v35 = vld [vmem:[#allocation2 + $0x20] sm:$0xff] }
 0x14d   : > { %991 = vst [vmem:[#allocation2 + $0x80] sm:$0xff] %v959_v37  ;;  %v842_v38 = vpop.f32.mrf.mxu2 }
 0x14e   : > { %v931_v40 = vpop.f32.mrf.mxu3 }
 0x14f   : > { %v932_v41 = vadd.f32 %v931_v40, %v842_v38  ;;  %v804_v42 = vpop.f32.mrf.mxu0 }
 0x150   : > { %v893_v44 = vpop.f32.mrf.mxu1 }
 0x151   : > { %v975_v45 = vadd.f32 %v932_v41, %v477_v39  ;;  %v894_v46 = vadd.f32 %v893_v44, %v804_v42  ;;  %v468_v39 = vld [vmem:[#allocation2 + $0x78] sm:$0xff] }
 0x153   : > { %1007 = vst [vmem:[#allocation2 + $0xa8] sm:$0xff] %v975_v45  ;;  %v960_v47 = vadd.f32 %v894_v46, %v462_v43  ;;  %v484_v45 = vld [vmem:[#allocation2 + $0x98] sm:$0xff] }
 0x155   : > { %992 = vst [vmem:[#allocation2 + $0x88] sm:$0xff] %v960_v47  ;;  %v844_v48 = vpop.f32.mrf.mxu2 }
 0x156   : > { %v933_v50 = vpop.f32.mrf.mxu3 }
 0x157   : > { %v934_v51 = vadd.f32 %v933_v50, %v844_v48  ;;  %v807_v52 = vpop.f32.mrf.mxu0 }
 0x158   : > { %v896_v54 = vpop.f32.mrf.mxu1 }
 0x159   : > { %v976_v55 = vadd.f32 %v934_v51, %v478_v49  ;;  %v897_v56 = vadd.f32 %v896_v54, %v807_v52 }
 0x15b   : > { %1008 = vst [vmem:[#allocation2 + $0xd0] sm:$0xff] %v976_v55  ;;  %v961_v57 = vadd.f32 %v897_v56, %v463_v53 }
 0x15d   : > { %993 = vst [vmem:[#allocation2 + $0xe8] sm:$0xff] %v961_v57  ;;  %v847_v58 = vpop.f32.mrf.mxu2 }
 0x15e   : > { %v936_v60 = vpop.f32.mrf.mxu3 }
 0x15f   : > { %v937_v61 = vadd.f32 %v936_v60, %v847_v58  ;;  %v809_v62 = vpop.f32.mrf.mxu0 }
 0x160   : > { %v898_v0 = vpop.f32.mrf.mxu1 }
 0x161   : > { %v977_v1 = vadd.f32 %v937_v61, %v479_v59  ;;  %v899_v2 = vadd.f32 %v898_v0, %v809_v62 }
 0x163   : > { %1009 = vst [vmem:[#allocation2 + $0x10] sm:$0xff] %v977_v1  ;;  %v962_v3 = vadd.f32 %v899_v2, %v464_v63 }
 0x165   : > { %994 = vst [vmem:[#allocation2 + $0xb8] sm:$0xff] %v962_v3  ;;  %v849_v4 = vpop.f32.mrf.mxu2 }
 0x166   : > { %v938_v6 = vpop.f32.mrf.mxu3 }
 0x167   : > { %v939_v7 = vadd.f32 %v938_v6, %v849_v4  ;;  %v812_v8 = vpop.f32.mrf.mxu0 }
 0x168   : > { %v901_v10 = vpop.f32.mrf.mxu1 }
 0x169   : > { %v978_v11 = vadd.f32 %v939_v7, %v480_v5  ;;  %v902_v12 = vadd.f32 %v901_v10, %v812_v8 }
 0x16b   : > { %1010 = vst [vmem:[#allocation2 + $0x28] sm:$0xff] %v978_v11  ;;  %v963_v13 = vadd.f32 %v902_v12, %v465_v9 }
 0x16d   : > { %995 = vst [vmem:[#allocation2 + $0x60] sm:$0xff] %v963_v13  ;;  %v852_v14 = vpop.f32.mrf.mxu2 }
 0x16e   : > { %v941_v16 = vpop.f32.mrf.mxu3 }
 0x16f   : > { %v942_v17 = vadd.f32 %v941_v16, %v852_v14  ;;  %v814_v18 = vpop.f32.mrf.mxu0 }
 0x170   : > { %v903_v20 = vpop.f32.mrf.mxu1 }
 0x171   : > { %v979_v21 = vadd.f32 %v942_v17, %v481_v15  ;;  %v904_v22 = vadd.f32 %v903_v20, %v814_v18 }
 0x173   : > { %1011 = vst [vmem:[#allocation2 + $0xa0] sm:$0xff] %v979_v21  ;;  %v964_v23 = vadd.f32 %v904_v22, %v466_v19 }
 0x175   : > { %996 = vst [vmem:[#allocation2 + $0xf0] sm:$0xff] %v964_v23  ;;  %v854_v24 = vpop.f32.mrf.mxu2 }
 0x176   : > { %v943_v26 = vpop.f32.mrf.mxu3 }
 0x177   : > { %v944_v27 = vadd.f32 %v943_v26, %v854_v24  ;;  %v817_v28 = vpop.f32.mrf.mxu0 }
 0x178   : > { %v906_v30 = vpop.f32.mrf.mxu1 }
 0x179   : > { %v980_v31 = vadd.f32 %v944_v27, %v482_v25  ;;  %v907_v32 = vadd.f32 %v906_v30, %v817_v28 }
 0x17b   : > { %1012 = vst [vmem:[#allocation2 + $0xf8] sm:$0xff] %v980_v31  ;;  %v965_v33 = vadd.f32 %v907_v32, %v467_v29 }
 0x17d   : > { %997 = vst [vmem:[#allocation2 + $0x8] sm:$0xff] %v965_v33  ;;  %v857_v34 = vpop.f32.mrf.mxu2 }
 0x17e   : > { %v946_v36 = vpop.f32.mrf.mxu3 }
 0x17f   : > { %v947_v37 = vadd.f32 %v946_v36, %v857_v34  ;;  %v819_v38 = vpop.f32.mrf.mxu0 }
 0x180   : > { %v908_v40 = vpop.f32.mrf.mxu1 }
 0x181   : > { %v981_v41 = vadd.f32 %v947_v37, %v483_v35  ;;  %v909_v42 = vadd.f32 %v908_v40, %v819_v38 }
 0x183   : > { %1013 = vst [vmem:[#allocation2 + $0x20] sm:$0xff] %v981_v41  ;;  %v966_v43 = vadd.f32 %v909_v42, %v468_v39 }
 0x185   : > { %998 = vst [vmem:[#allocation2 + $0x78] sm:$0xff] %v966_v43  ;;  %v859_v44 = vpop.f32.mrf.mxu2 }
 0x186   : > { %v948_v46 = vpop.f32.mrf.mxu3 }
 0x187   : > { %v949_v47 = vadd.f32 %v948_v46, %v859_v44  ;;  %1018 = sbr.rel (%p1765_p12) target bundleno = 690 (0x2b2), region = 82 }
 0x189   : > { %v982_v48 = vadd.f32 %v949_v47, %v484_v45 }
 0x18b   : > { %1014 = vst [vmem:[#allocation2 + $0x98] sm:$0xff] %v982_v48 }
 0x18c   : > { %v1824_v49 = vld [vmem:[%s2518_s2 + $0x70] sm:$0xf]  ;;  %v1897_v50 = vld [vmem:[%s2518_s2 + $0x74] sm:$0xf0]  ;;  %v1896_v51 = vld [vmem:[%s2518_s2 + $0x74] sm:$0xf] }
 0x18d   : > { %v1825_v52 = vor.u32 %v1897_v50, %v1824_v49  ;;  %v1826_v53 = vld [vmem:[%s2518_s2 + $0x78] sm:$0xf0]  ;;  %v1816_v54 = vld [vmem:[%s2518_s2 + $0x60] sm:$0xf]  ;;  %v1895_v55 = vld [vmem:[%s2518_s2 + $0x64] sm:$0xf0] }
 0x18e   : > { %v1829_v56 = vor.u32 %v1896_v51, %v1826_v53  ;;  %v1894_v57 = vld [vmem:[%s2518_s2 + $0x64] sm:$0xf]  ;;  %v1818_v58 = vld [vmem:[%s2518_s2 + $0x68] sm:$0xf0]  ;;  %v1817_v59 = vor.u32 %v1895_v55, %v1816_v54  ;;  %v1808_v61 = vld [vmem:[%s2518_s2 + $0x50] sm:$0xf] }
 0x18f   : > { %1169 = vmatpush.bf16.msra.mxu0 %v1825_v52  ;;  %1914 = vmatpush.bf16.msra.mxu2 %v1825_v52  ;;  %v1821_v60 = vor.u32 %v1894_v57, %v1818_v58  ;;  %v1893_v62 = vld [vmem:[%s2518_s2 + $0x54] sm:$0xf0]  ;;  %v1892_v63 = vld [vmem:[%s2518_s2 + $0x54] sm:$0xf]  ;;  %v1810_v0 = vld [vmem:[%s2518_s2 + $0x58] sm:$0xf0] }
 0x190   : > { %1258 = vmatpush.bf16.msra.mxu1 %v1829_v56  ;;  %1922 = vmatpush.bf16.msra.mxu3 %v1829_v56  ;;  %v1809_v1 = vor.u32 %v1893_v62, %v1808_v61  ;;  %v1813_v2 = vor.u32 %v1892_v63, %v1810_v0  ;;  %v1800_v3 = vld [vmem:[%s2518_s2 + $0x40] sm:$0xf]  ;;  %v1891_v4 = vld [vmem:[%s2518_s2 + $0x44] sm:$0xf0]  ;;  %v1890_v5 = vld [vmem:[%s2518_s2 + $0x44] sm:$0xf] }
 0x191   : > { %v1802_v6 = vld [vmem:[%s2518_s2 + $0x48] sm:$0xf0]  ;;  %v1801_v7 = vor.u32 %v1891_v4, %v1800_v3  ;;  %v1792_v9 = vld [vmem:[%s2518_s2 + $0x30] sm:$0xf]  ;;  %v1889_v10 = vld [vmem:[%s2518_s2 + $0x34] sm:$0xf0] }
 0x192   : > { %v1805_v8 = vor.u32 %v1890_v5, %v1802_v6  ;;  %v1888_v11 = vld [vmem:[%s2518_s2 + $0x34] sm:$0xf]  ;;  %v1794_v12 = vld [vmem:[%s2518_s2 + $0x38] sm:$0xf0]  ;;  %v1793_v13 = vor.u32 %v1889_v10, %v1792_v9  ;;  %v1784_v15 = vld [vmem:[%s2518_s2 + $0x20] sm:$0xf] }
 0x193   : > { %1170 = vmatpush.bf16.msra.mxu0 %v1817_v59  ;;  %1915 = vmatpush.bf16.msra.mxu2 %v1817_v59  ;;  %v1797_v14 = vor.u32 %v1888_v11, %v1794_v12  ;;  %v1887_v16 = vld [vmem:[%s2518_s2 + $0x24] sm:$0xf0]  ;;  %v1886_v17 = vld [vmem:[%s2518_s2 + $0x24] sm:$0xf]  ;;  %v1786_v18 = vld [vmem:[%s2518_s2 + $0x28] sm:$0xf0] }
 0x194   : > { %1259 = vmatpush.bf16.msra.mxu1 %v1821_v60  ;;  %1923 = vmatpush.bf16.msra.mxu3 %v1821_v60  ;;  %v1785_v19 = vor.u32 %v1887_v16, %v1784_v15  ;;  %v1789_v20 = vor.u32 %v1886_v17, %v1786_v18  ;;  %v1776_v21 = vld [vmem:[%s2518_s2 + $0x10] sm:$0xf]  ;;  %v1885_v22 = vld [vmem:[%s2518_s2 + $0x14] sm:$0xf0]  ;;  %v1884_v23 = vld [vmem:[%s2518_s2 + $0x14] sm:$0xf] }
 0x195   : > { %v1778_v24 = vld [vmem:[%s2518_s2 + $0x18] sm:$0xf0]  ;;  %v1777_v25 = vor.u32 %v1885_v22, %v1776_v21  ;;  %v1768_v27 = vld [vmem:[%s2518_s2] sm:$0xf]  ;;  %v1883_v28 = vld [vmem:[%s2518_s2 + $0x4] sm:$0xf0] }
 0x196   : > { %v1781_v26 = vor.u32 %v1884_v23, %v1778_v24  ;;  %v1882_v29 = vld [vmem:[%s2518_s2 + $0x4] sm:$0xf]  ;;  %v1770_v30 = vld [vmem:[%s2518_s2 + $0x8] sm:$0xf0]  ;;  %v1019_v31 = vld [vmem:[#allocation2 + $0xb0] sm:$0xff]  ;;  %v1769_v32 = vor.u32 %v1883_v28, %v1768_v27 }
 0x197   : > { %1171 = vmatpush.bf16.msra.mxu0 %v1809_v1  ;;  %1916 = vmatpush.bf16.msra.mxu2 %v1809_v1  ;;  %v1020_v33 = vld [vmem:[#allocation2] sm:$0xff]  ;;  %v1035_v34 = vld [vmem:[#allocation2 + $0x38] sm:$0xff]  ;;  %v1773_v36 = vor.u32 %v1882_v29, %v1770_v30  ;;  %v1038_v42 = vld [vmem:[#allocation2 + $0xc8] sm:$0xff] }
 0x198   : > { %1260 = vmatpush.bf16.msra.mxu1 %v1813_v2  ;;  %1924 = vmatpush.bf16.msra.mxu3 %v1813_v2  ;;  %v1036_v35 = vld [vmem:[#allocation2 + $0x58] sm:$0xff]  ;;  %v1051_v37 = vpack.c.bf16 %v1020_v33, %v1019_v31  ;;  %v1037_v41 = vld [vmem:[#allocation2 + $0x40] sm:$0xff]  ;;  %v1023_v45 = vld [vmem:[#allocation2 + $0x50] sm:$0xff] }
 0x199   : > { %v1059_v38 = vpack.c.bf16 %v1036_v35, %v1035_v34  ;;  %v1021_v39 = vld [vmem:[#allocation2 + $0xd8] sm:$0xff]  ;;  %v1060_v44 = vpack.c.bf16 %v1038_v42, %v1037_v41  ;;  %v1024_v46 = vld [vmem:[#allocation2 + $0x68] sm:$0xff]  ;;  %v1039_v47 = vld [vmem:[#allocation2 + $0xe0] sm:$0xff] }
 0x19a   : > { %v1022_v40 = vld [vmem:[#allocation2 + $0x18] sm:$0xff]  ;;  %v1040_v48 = vld [vmem:[#allocation2 + $0x90] sm:$0xff]  ;;  %v1053_v49 = vpack.c.bf16 %v1024_v46, %v1023_v45  ;;  %v1026_v52 = vld [vmem:[#allocation2 + $0x48] sm:$0xff] }
 0x19b   : > { %1172 = vmatpush.bf16.msra.mxu0 %v1801_v7  ;;  %1917 = vmatpush.bf16.msra.mxu2 %v1801_v7  ;;  %v1052_v43 = vpack.c.bf16 %v1022_v40, %v1021_v39  ;;  %v1061_v50 = vpack.c.bf16 %v1040_v48, %v1039_v47  ;;  %v1025_v51 = vld [vmem:[#allocation2 + $0x30] sm:$0xff]  ;;  %v1042_v54 = vld [vmem:[#allocation2 + $0xc0] sm:$0xff]  ;;  %v1028_v58 = vld [vmem:[#allocation2 + $0x88] sm:$0xff] }
 0x19c   : > { %1261 = vmatpush.bf16.msra.mxu1 %v1805_v8  ;;  %1925 = vmatpush.bf16.msra.mxu3 %v1805_v8  ;;  %v1041_v53 = vld [vmem:[#allocation2 + $0x70] sm:$0xff]  ;;  %v1054_v55 = vpack.c.bf16 %v1026_v52, %v1025_v51  ;;  %v1027_v57 = vld [vmem:[#allocation2 + $0x80] sm:$0xff]  ;;  %v1043_v59 = vld [vmem:[#allocation2 + $0xa8] sm:$0xff] }
 0x19d   : > { %v1062_v56 = vpack.c.bf16 %v1042_v54, %v1041_v53  ;;  %v1044_v60 = vld [vmem:[#allocation2 + $0xd0] sm:$0xff]  ;;  %v1055_v61 = vpack.c.bf16 %v1028_v58, %v1027_v57  ;;  %v1029_v63 = vld [vmem:[#allocation2 + $0xe8] sm:$0xff]  ;;  %v1030_v0 = vld [vmem:[#allocation2 + $0xb8] sm:$0xff] }
 0x19e   : > { %v1063_v62 = vpack.c.bf16 %v1044_v60, %v1043_v59  ;;  %v1045_v1 = vld [vmem:[#allocation2 + $0x10] sm:$0xff]  ;;  %v1046_v2 = vld [vmem:[#allocation2 + $0x28] sm:$0xff]  ;;  %v1056_v3 = vpack.c.bf16 %v1030_v0, %v1029_v63  ;;  %v1031_v5 = vld [vmem:[#allocation2 + $0x60] sm:$0xff] }
 0x19f   : > { %1173 = vmatpush.bf16.msra.mxu0 %v1793_v13  ;;  %1918 = vmatpush.bf16.msra.mxu2 %v1793_v13  ;;  %v1064_v4 = vpack.c.bf16 %v1046_v2, %v1045_v1  ;;  %v1032_v6 = vld [vmem:[#allocation2 + $0xf0] sm:$0xff]  ;;  %v1047_v7 = vld [vmem:[#allocation2 + $0xa0] sm:$0xff]  ;;  %v1048_v8 = vld [vmem:[#allocation2 + $0xf8] sm:$0xff] }
 0x1a0   : > { %1262 = vmatpush.bf16.msra.mxu1 %v1797_v14  ;;  %1926 = vmatpush.bf16.msra.mxu3 %v1797_v14  ;;  %v1057_v9 = vpack.c.bf16 %v1032_v6, %v1031_v5  ;;  %v1065_v10 = vpack.c.bf16 %v1048_v8, %v1047_v7  ;;  %v1033_v11 = vld [vmem:[#allocation2 + $0x8] sm:$0xff]  ;;  %v1034_v12 = vld [vmem:[#allocation2 + $0x78] sm:$0xff]  ;;  %v1049_v13 = vld [vmem:[#allocation2 + $0x20] sm:$0xff] }
 0x1a1   : > { %v1050_v14 = vld [vmem:[#allocation2 + $0x98] sm:$0xff]  ;;  %v1058_v15 = vpack.c.bf16 %v1034_v12, %v1033_v11  ;;  %v1083_v17 = vld [vmem:[%s2519_s3] sm:$0x3] }
 0x1a2   : > { %v1066_v16 = vpack.c.bf16 %v1050_v14, %v1049_v13  ;;  %v2395_v18 = vperm.slane %v1083_v17, 0 }
 0x1a3   : > { %1174 = vmatpush.bf16.msra.mxu0 %v1785_v19  ;;  %1919 = vmatpush.bf16.msra.mxu2 %v1785_v19  ;;  %v2397_v19 = vperm.slane %v1083_v17, 1 }
 0x1a4   : > { %1263 = vmatpush.bf16.msra.mxu1 %v1789_v20  ;;  %1927 = vmatpush.bf16.msra.mxu3 %v1789_v20 }
 0x1a7   : > { %1175 = vmatpush.bf16.msra.mxu0 %v1777_v25  ;;  %1920 = vmatpush.bf16.msra.mxu2 %v1777_v25 }
 0x1a8   : > { %1264 = vmatpush.bf16.msra.mxu1 %v1781_v26  ;;  %1928 = vmatpush.bf16.msra.mxu3 %v1781_v26 }
 0x1ab   : > { %1176 = vmatpush.bf16.msra.mxu0 %v1769_v32  ;;  %1921 = vmatpush.bf16.msra.mxu2 %v1769_v32 }
 0x1ac   : > { %1265 = vmatpush.bf16.msra.mxu1 %v1773_v36  ;;  %1929 = vmatpush.bf16.msra.mxu3 %v1773_v36 }
 0x1ae   : > { %1177 = vmatmul.bf16.vlgmr.msra.gmra.mxu0 %v1051_v37  ;;  %1217 = vmatmul.bf16.vlgmr.msra.gmra.mxu2 %v1059_v38 }
 0x1af   : > { %1266 = vmatmul.bf16.vlgmr.msra.gmra.mxu1 %v1051_v37  ;;  %1306 = vmatmul.bf16.vlgmr.msra.gmra.mxu3 %v1059_v38 }
 0x1be   : > { %1182 = vmatmul.bf16.gmra.mxu0 %v1052_v43  ;;  %1222 = vmatmul.bf16.gmra.mxu2 %v1060_v44 }
 0x1bf   : > { %1271 = vmatmul.bf16.gmra.mxu1 %v1052_v43  ;;  %1311 = vmatmul.bf16.gmra.mxu3 %v1060_v44 }
 0x1ce   : > { %1187 = vmatmul.bf16.gmra.mxu0 %v1053_v49  ;;  %1227 = vmatmul.bf16.gmra.mxu2 %v1061_v50 }
 0x1cf   : > { %1276 = vmatmul.bf16.gmra.mxu1 %v1053_v49  ;;  %1316 = vmatmul.bf16.gmra.mxu3 %v1061_v50 }
 0x1de   : > { %1192 = vmatmul.bf16.gmra.mxu0 %v1054_v55  ;;  %1232 = vmatmul.bf16.gmra.mxu2 %v1062_v56 }
 0x1df   : > { %1281 = vmatmul.bf16.gmra.mxu1 %v1054_v55  ;;  %1321 = vmatmul.bf16.gmra.mxu3 %v1062_v56 }
 0x1ee   : > { %1197 = vmatmul.bf16.gmra.mxu0 %v1055_v61  ;;  %1237 = vmatmul.bf16.gmra.mxu2 %v1063_v62 }
 0x1ef   : > { %1286 = vmatmul.bf16.gmra.mxu1 %v1055_v61  ;;  %1326 = vmatmul.bf16.gmra.mxu3 %v1063_v62 }
 0x1fe   : > { %1202 = vmatmul.bf16.gmra.mxu0 %v1056_v3  ;;  %1242 = vmatmul.bf16.gmra.mxu2 %v1064_v4 }
 0x1ff   : > { %1291 = vmatmul.bf16.gmra.mxu1 %v1056_v3  ;;  %1331 = vmatmul.bf16.gmra.mxu3 %v1064_v4 }
 0x20e   : > { %1207 = vmatmul.bf16.gmra.mxu0 %v1057_v9  ;;  %1247 = vmatmul.bf16.gmra.mxu2 %v1065_v10 }
 0x20f   : > { %1296 = vmatmul.bf16.gmra.mxu1 %v1057_v9  ;;  %1336 = vmatmul.bf16.gmra.mxu3 %v1065_v10 }
 0x21e   : > { %1212 = vmatmul.bf16.gmra.mxu0 %v1058_v15  ;;  %1252 = vmatmul.bf16.gmra.mxu2 %v1066_v16 }
 0x21f   : > { %1301 = vmatmul.bf16.gmra.mxu1 %v1058_v15  ;;  %1341 = vmatmul.bf16.gmra.mxu3 %v1066_v16 }
 0x22b   : > { %v1178_v20 = vpop.f32.mrf.mxu0 }
 0x22c   : > { %v1179_v21 = vadd.f32 %v1178_v20, %v2395_v18  ;;  %v1267_v22 = vpop.f32.mrf.mxu1 }
 0x22d   : > { %v1268_v23 = vadd.f32 %v1267_v22, %v2397_v19 }
 0x22e   : > { %v1347_v24 = vmax.f32 %v1179_v21, 0.0 }
 0x22f   : > { %v1348_v25 = vmax.f32 %v1268_v23, 0.0 }
 0x231   : > { %v1411_v26 = vpack.c.bf16 %v1348_v25, %v1347_v24  ;;  %v1218_v27 = vpop.f32.mrf.mxu2 }
 0x232   : > { %v1219_v28 = vadd.f32 %v1218_v27, %v2395_v18  ;;  %v1307_v29 = vpop.f32.mrf.mxu3 }
 0x233   : > { %1443 = vst [vmem:[%s2204_s29] sm:$0xff] %v1411_v26  ;;  %v1308_v30 = vadd.f32 %v1307_v29, %v2397_v19  ;;  %v1180_v31 = vpop.f32.mrf.mxu0 }
 0x234   : > { %v1379_v32 = vmax.f32 %v1219_v28, 0.0  ;;  %v1181_v33 = vadd.f32 %v1180_v31, %v2395_v18  ;;  %v1269_v34 = vpop.f32.mrf.mxu1 }
 0x235   : > { %v1380_v35 = vmax.f32 %v1308_v30, 0.0  ;;  %v1270_v36 = vadd.f32 %v1269_v34, %v2397_v19 }
 0x236   : > { %v1349_v37 = vmax.f32 %v1181_v33, 0.0 }
 0x237   : > { %v1427_v38 = vpack.c.bf16 %v1380_v35, %v1379_v32  ;;  %v1350_v39 = vmax.f32 %v1270_v36, 0.0 }
 0x239   : > { %1459 = vst [vmem:[%s2204_s29 + $0x80] sm:$0xff] %v1427_v38  ;;  %v1412_v40 = vpack.c.bf16 %v1350_v39, %v1349_v37  ;;  %v1220_v41 = vpop.f32.mrf.mxu2 }
 0x23a   : > { %v1221_v42 = vadd.f32 %v1220_v41, %v2395_v18  ;;  %v1309_v43 = vpop.f32.mrf.mxu3 }
 0x23b   : > { %1444 = vst [vmem:[%s2204_s29 + $0x8] sm:$0xff] %v1412_v40  ;;  %v1310_v44 = vadd.f32 %v1309_v43, %v2397_v19  ;;  %v1183_v45 = vpop.f32.mrf.mxu0 }
 0x23c   : > { %v1381_v46 = vmax.f32 %v1221_v42, 0.0  ;;  %v1184_v47 = vadd.f32 %v1183_v45, %v2395_v18  ;;  %v1272_v48 = vpop.f32.mrf.mxu1 }
 0x23d   : > { %v1382_v49 = vmax.f32 %v1310_v44, 0.0  ;;  %v1273_v50 = vadd.f32 %v1272_v48, %v2397_v19 }
 0x23e   : > { %v1351_v51 = vmax.f32 %v1184_v47, 0.0 }
 0x23f   : > { %v1428_v52 = vpack.c.bf16 %v1382_v49, %v1381_v46  ;;  %v1352_v53 = vmax.f32 %v1273_v50, 0.0 }
 0x241   : > { %1460 = vst [vmem:[%s2204_s29 + $0x88] sm:$0xff] %v1428_v52  ;;  %v1413_v54 = vpack.c.bf16 %v1352_v53, %v1351_v51  ;;  %v1223_v55 = vpop.f32.mrf.mxu2 }
 0x242   : > { %v1224_v56 = vadd.f32 %v1223_v55, %v2395_v18  ;;  %v1312_v57 = vpop.f32.mrf.mxu3 }
 0x243   : > { %1445 = vst [vmem:[%s2204_s29 + $0x10] sm:$0xff] %v1413_v54  ;;  %v1313_v58 = vadd.f32 %v1312_v57, %v2397_v19  ;;  %v1185_v59 = vpop.f32.mrf.mxu0 }
 0x244   : > { %v1383_v60 = vmax.f32 %v1224_v56, 0.0  ;;  %v1186_v61 = vadd.f32 %v1185_v59, %v2395_v18  ;;  %v1274_v62 = vpop.f32.mrf.mxu1 }
 0x245   : > { %v1384_v63 = vmax.f32 %v1313_v58, 0.0  ;;  %v1275_v0 = vadd.f32 %v1274_v62, %v2397_v19 }
 0x246   : > { %v1353_v1 = vmax.f32 %v1186_v61, 0.0 }
 0x247   : > { %v1429_v2 = vpack.c.bf16 %v1384_v63, %v1383_v60  ;;  %v1354_v3 = vmax.f32 %v1275_v0, 0.0 }
 0x249   : > { %1461 = vst [vmem:[%s2204_s29 + $0x90] sm:$0xff] %v1429_v2  ;;  %v1414_v4 = vpack.c.bf16 %v1354_v3, %v1353_v1  ;;  %v1225_v5 = vpop.f32.mrf.mxu2 }
 0x24a   : > { %v1226_v6 = vadd.f32 %v1225_v5, %v2395_v18  ;;  %v1314_v7 = vpop.f32.mrf.mxu3 }
 0x24b   : > { %1446 = vst [vmem:[%s2204_s29 + $0x18] sm:$0xff] %v1414_v4  ;;  %v1315_v8 = vadd.f32 %v1314_v7, %v2397_v19  ;;  %v1188_v9 = vpop.f32.mrf.mxu0 }
 0x24c   : > { %v1385_v10 = vmax.f32 %v1226_v6, 0.0  ;;  %v1189_v11 = vadd.f32 %v1188_v9, %v2395_v18  ;;  %v1277_v12 = vpop.f32.mrf.mxu1 }
 0x24d   : > { %v1386_v13 = vmax.f32 %v1315_v8, 0.0  ;;  %v1278_v14 = vadd.f32 %v1277_v12, %v2397_v19 }
 0x24e   : > { %v1355_v15 = vmax.f32 %v1189_v11, 0.0 }
 0x24f   : > { %v1430_v16 = vpack.c.bf16 %v1386_v13, %v1385_v10  ;;  %v1356_v17 = vmax.f32 %v1278_v14, 0.0 }
 0x251   : > { %1462 = vst [vmem:[%s2204_s29 + $0x98] sm:$0xff] %v1430_v16  ;;  %v1415_v20 = vpack.c.bf16 %v1356_v17, %v1355_v15  ;;  %v1228_v21 = vpop.f32.mrf.mxu2 }
 0x252   : > { %v1229_v22 = vadd.f32 %v1228_v21, %v2395_v18  ;;  %v1317_v23 = vpop.f32.mrf.mxu3 }
 0x253   : > { %1447 = vst [vmem:[%s2204_s29 + $0x20] sm:$0xff] %v1415_v20  ;;  %v1318_v24 = vadd.f32 %v1317_v23, %v2397_v19  ;;  %v1190_v25 = vpop.f32.mrf.mxu0 }
 0x254   : > { %v1387_v26 = vmax.f32 %v1229_v22, 0.0  ;;  %v1191_v27 = vadd.f32 %v1190_v25, %v2395_v18  ;;  %v1279_v28 = vpop.f32.mrf.mxu1 }
 0x255   : > { %v1388_v29 = vmax.f32 %v1318_v24, 0.0  ;;  %v1280_v30 = vadd.f32 %v1279_v28, %v2397_v19 }
 0x256   : > { %v1357_v31 = vmax.f32 %v1191_v27, 0.0 }
 0x257   : > { %v1431_v32 = vpack.c.bf16 %v1388_v29, %v1387_v26  ;;  %v1358_v33 = vmax.f32 %v1280_v30, 0.0 }
 0x259   : > { %1463 = vst [vmem:[%s2204_s29 + $0xa0] sm:$0xff] %v1431_v32  ;;  %v1416_v34 = vpack.c.bf16 %v1358_v33, %v1357_v31  ;;  %v1230_v35 = vpop.f32.mrf.mxu2 }
 0x25a   : > { %v1231_v36 = vadd.f32 %v1230_v35, %v2395_v18  ;;  %v1319_v37 = vpop.f32.mrf.mxu3 }
 0x25b   : > { %1448 = vst [vmem:[%s2204_s29 + $0x28] sm:$0xff] %v1416_v34  ;;  %v1320_v38 = vadd.f32 %v1319_v37, %v2397_v19  ;;  %v1193_v39 = vpop.f32.mrf.mxu0 }
 0x25c   : > { %v1389_v40 = vmax.f32 %v1231_v36, 0.0  ;;  %v1194_v41 = vadd.f32 %v1193_v39, %v2395_v18  ;;  %v1282_v42 = vpop.f32.mrf.mxu1 }
 0x25d   : > { %v1390_v43 = vmax.f32 %v1320_v38, 0.0  ;;  %v1283_v44 = vadd.f32 %v1282_v42, %v2397_v19 }
 0x25e   : > { %v1359_v45 = vmax.f32 %v1194_v41, 0.0 }
 0x25f   : > { %v1432_v46 = vpack.c.bf16 %v1390_v43, %v1389_v40  ;;  %v1360_v47 = vmax.f32 %v1283_v44, 0.0 }
 0x261   : > { %1464 = vst [vmem:[%s2204_s29 + $0xa8] sm:$0xff] %v1432_v46  ;;  %v1417_v48 = vpack.c.bf16 %v1360_v47, %v1359_v45  ;;  %v1233_v49 = vpop.f32.mrf.mxu2 }
 0x262   : > { %v1234_v50 = vadd.f32 %v1233_v49, %v2395_v18  ;;  %v1322_v51 = vpop.f32.mrf.mxu3 }
 0x263   : > { %1449 = vst [vmem:[%s2204_s29 + $0x30] sm:$0xff] %v1417_v48  ;;  %v1323_v52 = vadd.f32 %v1322_v51, %v2397_v19  ;;  %v1195_v53 = vpop.f32.mrf.mxu0 }
 0x264   : > { %v1391_v54 = vmax.f32 %v1234_v50, 0.0  ;;  %v1196_v55 = vadd.f32 %v1195_v53, %v2395_v18  ;;  %v1284_v56 = vpop.f32.mrf.mxu1 }
 0x265   : > { %v1392_v57 = vmax.f32 %v1323_v52, 0.0  ;;  %v1285_v58 = vadd.f32 %v1284_v56, %v2397_v19 }
 0x266   : > { %v1361_v59 = vmax.f32 %v1196_v55, 0.0 }
 0x267   : > { %v1433_v60 = vpack.c.bf16 %v1392_v57, %v1391_v54  ;;  %v1362_v61 = vmax.f32 %v1285_v58, 0.0 }
 0x269   : > { %1465 = vst [vmem:[%s2204_s29 + $0xb0] sm:$0xff] %v1433_v60  ;;  %v1418_v62 = vpack.c.bf16 %v1362_v61, %v1361_v59  ;;  %v1235_v63 = vpop.f32.mrf.mxu2 }
 0x26a   : > { %v1236_v0 = vadd.f32 %v1235_v63, %v2395_v18  ;;  %v1324_v1 = vpop.f32.mrf.mxu3 }
 0x26b   : > { %1450 = vst [vmem:[%s2204_s29 + $0x38] sm:$0xff] %v1418_v62  ;;  %v1325_v2 = vadd.f32 %v1324_v1, %v2397_v19  ;;  %v1198_v3 = vpop.f32.mrf.mxu0 }
 0x26c   : > { %v1393_v4 = vmax.f32 %v1236_v0, 0.0  ;;  %v1199_v5 = vadd.f32 %v1198_v3, %v2395_v18  ;;  %v1287_v6 = vpop.f32.mrf.mxu1 }
 0x26d   : > { %v1394_v7 = vmax.f32 %v1325_v2, 0.0  ;;  %v1288_v8 = vadd.f32 %v1287_v6, %v2397_v19 }
 0x26e   : > { %v1363_v9 = vmax.f32 %v1199_v5, 0.0 }
 0x26f   : > { %v1434_v10 = vpack.c.bf16 %v1394_v7, %v1393_v4  ;;  %v1364_v11 = vmax.f32 %v1288_v8, 0.0 }
 0x271   : > { %1466 = vst [vmem:[%s2204_s29 + $0xb8] sm:$0xff] %v1434_v10  ;;  %v1419_v12 = vpack.c.bf16 %v1364_v11, %v1363_v9  ;;  %v1238_v13 = vpop.f32.mrf.mxu2 }
 0x272   : > { %v1239_v14 = vadd.f32 %v1238_v13, %v2395_v18  ;;  %v1327_v15 = vpop.f32.mrf.mxu3 }
 0x273   : > { %1451 = vst [vmem:[%s2204_s29 + $0x40] sm:$0xff] %v1419_v12  ;;  %v1328_v16 = vadd.f32 %v1327_v15, %v2397_v19  ;;  %v1200_v17 = vpop.f32.mrf.mxu0 }
 0x274   : > { %v1395_v20 = vmax.f32 %v1239_v14, 0.0  ;;  %v1201_v21 = vadd.f32 %v1200_v17, %v2395_v18  ;;  %v1289_v22 = vpop.f32.mrf.mxu1 }
 0x275   : > { %v1396_v23 = vmax.f32 %v1328_v16, 0.0  ;;  %v1290_v24 = vadd.f32 %v1289_v22, %v2397_v19 }
 0x276   : > { %v1365_v25 = vmax.f32 %v1201_v21, 0.0 }
 0x277   : > { %v1435_v26 = vpack.c.bf16 %v1396_v23, %v1395_v20  ;;  %v1366_v27 = vmax.f32 %v1290_v24, 0.0 }
 0x279   : > { %1467 = vst [vmem:[%s2204_s29 + $0xc0] sm:$0xff] %v1435_v26  ;;  %v1420_v28 = vpack.c.bf16 %v1366_v27, %v1365_v25  ;;  %v1240_v29 = vpop.f32.mrf.mxu2 }
 0x27a   : > { %v1241_v30 = vadd.f32 %v1240_v29, %v2395_v18  ;;  %v1329_v31 = vpop.f32.mrf.mxu3 }
 0x27b   : > { %1452 = vst [vmem:[%s2204_s29 + $0x48] sm:$0xff] %v1420_v28  ;;  %v1330_v32 = vadd.f32 %v1329_v31, %v2397_v19  ;;  %v1203_v33 = vpop.f32.mrf.mxu0 }
 0x27c   : > { %v1397_v34 = vmax.f32 %v1241_v30, 0.0  ;;  %v1204_v35 = vadd.f32 %v1203_v33, %v2395_v18  ;;  %v1292_v36 = vpop.f32.mrf.mxu1 }
 0x27d   : > { %v1398_v37 = vmax.f32 %v1330_v32, 0.0  ;;  %v1293_v38 = vadd.f32 %v1292_v36, %v2397_v19 }
 0x27e   : > { %v1367_v39 = vmax.f32 %v1204_v35, 0.0 }
 0x27f   : > { %v1436_v40 = vpack.c.bf16 %v1398_v37, %v1397_v34  ;;  %v1368_v41 = vmax.f32 %v1293_v38, 0.0 }
 0x281   : > { %1468 = vst [vmem:[%s2204_s29 + $0xc8] sm:$0xff] %v1436_v40  ;;  %v1421_v42 = vpack.c.bf16 %v1368_v41, %v1367_v39  ;;  %v1243_v43 = vpop.f32.mrf.mxu2 }
 0x282   : > { %v1244_v44 = vadd.f32 %v1243_v43, %v2395_v18  ;;  %v1332_v45 = vpop.f32.mrf.mxu3 }
 0x283   : > { %1453 = vst [vmem:[%s2204_s29 + $0x50] sm:$0xff] %v1421_v42  ;;  %v1333_v46 = vadd.f32 %v1332_v45, %v2397_v19  ;;  %v1205_v47 = vpop.f32.mrf.mxu0 }
 0x284   : > { %v1399_v48 = vmax.f32 %v1244_v44, 0.0  ;;  %v1206_v49 = vadd.f32 %v1205_v47, %v2395_v18  ;;  %v1294_v50 = vpop.f32.mrf.mxu1 }
 0x285   : > { %v1400_v51 = vmax.f32 %v1333_v46, 0.0  ;;  %v1295_v52 = vadd.f32 %v1294_v50, %v2397_v19 }
 0x286   : > { %v1369_v53 = vmax.f32 %v1206_v49, 0.0 }
 0x287   : > { %v1437_v54 = vpack.c.bf16 %v1400_v51, %v1399_v48  ;;  %v1370_v55 = vmax.f32 %v1295_v52, 0.0 }
 0x289   : > { %1469 = vst [vmem:[%s2204_s29 + $0xd0] sm:$0xff] %v1437_v54  ;;  %v1422_v56 = vpack.c.bf16 %v1370_v55, %v1369_v53  ;;  %v1245_v57 = vpop.f32.mrf.mxu2 }
 0x28a   : > { %v1246_v58 = vadd.f32 %v1245_v57, %v2395_v18  ;;  %v1334_v59 = vpop.f32.mrf.mxu3 }
 0x28b   : > { %1454 = vst [vmem:[%s2204_s29 + $0x58] sm:$0xff] %v1422_v56  ;;  %v1335_v60 = vadd.f32 %v1334_v59, %v2397_v19  ;;  %v1208_v61 = vpop.f32.mrf.mxu0 }
 0x28c   : > { %v1401_v62 = vmax.f32 %v1246_v58, 0.0  ;;  %v1209_v63 = vadd.f32 %v1208_v61, %v2395_v18  ;;  %v1297_v0 = vpop.f32.mrf.mxu1 }
 0x28d   : > { %v1402_v1 = vmax.f32 %v1335_v60, 0.0  ;;  %v1298_v2 = vadd.f32 %v1297_v0, %v2397_v19 }
 0x28e   : > { %v1371_v3 = vmax.f32 %v1209_v63, 0.0 }
 0x28f   : > { %v1438_v4 = vpack.c.bf16 %v1402_v1, %v1401_v62  ;;  %v1372_v5 = vmax.f32 %v1298_v2, 0.0 }
 0x291   : > { %1470 = vst [vmem:[%s2204_s29 + $0xd8] sm:$0xff] %v1438_v4  ;;  %v1423_v6 = vpack.c.bf16 %v1372_v5, %v1371_v3  ;;  %v1248_v7 = vpop.f32.mrf.mxu2 }
 0x292   : > { %v1249_v8 = vadd.f32 %v1248_v7, %v2395_v18  ;;  %v1337_v9 = vpop.f32.mrf.mxu3 }
 0x293   : > { %1455 = vst [vmem:[%s2204_s29 + $0x60] sm:$0xff] %v1423_v6  ;;  %v1338_v10 = vadd.f32 %v1337_v9, %v2397_v19  ;;  %v1210_v11 = vpop.f32.mrf.mxu0 }
 0x294   : > { %v1403_v12 = vmax.f32 %v1249_v8, 0.0  ;;  %v1211_v13 = vadd.f32 %v1210_v11, %v2395_v18  ;;  %v1299_v14 = vpop.f32.mrf.mxu1 }
 0x295   : > { %v1404_v15 = vmax.f32 %v1338_v10, 0.0  ;;  %v1300_v16 = vadd.f32 %v1299_v14, %v2397_v19 }
 0x296   : > { %v1373_v17 = vmax.f32 %v1211_v13, 0.0 }
 0x297   : > { %v1439_v20 = vpack.c.bf16 %v1404_v15, %v1403_v12  ;;  %v1374_v21 = vmax.f32 %v1300_v16, 0.0 }
 0x299   : > { %1471 = vst [vmem:[%s2204_s29 + $0xe0] sm:$0xff] %v1439_v20  ;;  %v1424_v22 = vpack.c.bf16 %v1374_v21, %v1373_v17  ;;  %v1250_v23 = vpop.f32.mrf.mxu2 }
 0x29a   : > { %v1251_v24 = vadd.f32 %v1250_v23, %v2395_v18  ;;  %v1339_v25 = vpop.f32.mrf.mxu3 }
 0x29b   : > { %1456 = vst [vmem:[%s2204_s29 + $0x68] sm:$0xff] %v1424_v22  ;;  %v1340_v26 = vadd.f32 %v1339_v25, %v2397_v19  ;;  %v1213_v27 = vpop.f32.mrf.mxu0 }
 0x29c   : > { %v1405_v28 = vmax.f32 %v1251_v24, 0.0  ;;  %v1214_v29 = vadd.f32 %v1213_v27, %v2395_v18  ;;  %v1302_v30 = vpop.f32.mrf.mxu1 }
 0x29d   : > { %v1406_v31 = vmax.f32 %v1340_v26, 0.0  ;;  %v1303_v32 = vadd.f32 %v1302_v30, %v2397_v19 }
 0x29e   : > { %v1375_v33 = vmax.f32 %v1214_v29, 0.0 }
 0x29f   : > { %v1440_v34 = vpack.c.bf16 %v1406_v31, %v1405_v28  ;;  %v1376_v35 = vmax.f32 %v1303_v32, 0.0 }
 0x2a1   : > { %1472 = vst [vmem:[%s2204_s29 + $0xe8] sm:$0xff] %v1440_v34  ;;  %v1425_v36 = vpack.c.bf16 %v1376_v35, %v1375_v33  ;;  %v1253_v37 = vpop.f32.mrf.mxu2 }
 0x2a2   : > { %v1254_v38 = vadd.f32 %v1253_v37, %v2395_v18  ;;  %v1342_v39 = vpop.f32.mrf.mxu3 }
 0x2a3   : > { %1457 = vst [vmem:[%s2204_s29 + $0x70] sm:$0xff] %v1425_v36  ;;  %v1343_v40 = vadd.f32 %v1342_v39, %v2397_v19  ;;  %v1215_v41 = vpop.f32.mrf.mxu0 }
 0x2a4   : > { %v1407_v42 = vmax.f32 %v1254_v38, 0.0  ;;  %v1216_v43 = vadd.f32 %v1215_v41, %v2395_v18  ;;  %v1304_v44 = vpop.f32.mrf.mxu1 }
 0x2a5   : > { %v1408_v45 = vmax.f32 %v1343_v40, 0.0  ;;  %v1305_v46 = vadd.f32 %v1304_v44, %v2397_v19 }
 0x2a6   : > { %v1377_v47 = vmax.f32 %v1216_v43, 0.0 }
 0x2a7   : > { %v1441_v48 = vpack.c.bf16 %v1408_v45, %v1407_v42  ;;  %v1378_v49 = vmax.f32 %v1305_v46, 0.0 }
 0x2a9   : > { %1473 = vst [vmem:[%s2204_s29 + $0xf0] sm:$0xff] %v1441_v48  ;;  %v1426_v50 = vpack.c.bf16 %v1378_v49, %v1377_v47  ;;  %v1255_v51 = vpop.f32.mrf.mxu2 }
 0x2aa   : > { %v1256_v52 = vadd.f32 %v1255_v51, %v2395_v18  ;;  %v1344_v53 = vpop.f32.mrf.mxu3 }
 0x2ab   : > { %1458 = vst [vmem:[%s2204_s29 + $0x78] sm:$0xff] %v1426_v50  ;;  %v1345_v54 = vadd.f32 %v1344_v53, %v2397_v19 }
 0x2ac   : > { %v1409_v55 = vmax.f32 %v1256_v52, 0.0 }
 0x2ad   : > { %v1410_v56 = vmax.f32 %v1345_v54, 0.0 }
 0x2af   : > { %v1442_v57 = vpack.c.bf16 %v1410_v56, %v1409_v55 }
 0x2b1   : > { %1474 = vst [vmem:[%s2204_s29 + $0xf8] sm:$0xff] %v1442_v57 }
 0x2b2 PF: > { %s14_s21 = sadd.s32 1, %s2041_s21   ;;  %s2521_s15 = smov %s2021_s16 }
 0x2b3   : > { %p11_p13 = scmp.ge.s32.totalorder %s14_s21, 6   ;;  %s2522_s16 = smov %s2120_s28 }
 0x2b4   : > { %s2523_s17 = smov %s2033_s19  ;;  %s2524_s18 = smov %s2037_s20 }
 0x2b5   : > { %s2525_s19 = smov %s2528_s22  ;;  %s2526_s20 = smov %s2532_s23 }
 0x2b6   :  { %13 = sbr.rel (!%p11_p13) target bundleno = 4 (0x4), region = 118 }

// kernel: gcn_forward.5
= control target key start
LH: loop header
LB: loop body
LE: loop exit
PB: predicated region body
PF: predicated region fallthrough
CT: control target
= control target key end

     0   :  { %s2892_s15 = smov 0   ;;  %s2894_s16 = smov 0   ;;  %s3547_s0 = inlined_call_operand.vmem [shape: bf16[512,512], index: 0, kind: input, shape index: {}]   ;;  %s3548_s1 = inlined_call_operand.vmem [shape: bf16[512,256], index: 1, kind: input, shape index: {}]   ;;  %s3549_s2 = inlined_call_operand.vmem [shape: bf16[256,256], index: 2, kind: input, shape index: {}]   ;;  %s3550_s3 = inlined_call_operand.vmem [shape: f32[1,256], index: 3, kind: input, shape index: {}]   ;;  %s3551_s4 = inlined_call_operand.vmem [shape: bf16[512,256], index: 4, kind: output, shape index: {}]  }
   0x1   :  { %s2896_s17 = smov 0   ;;  %s2898_s18 = smov 0  }
   0x2   :  { %s2900_s19 = smov 0   ;;  %s2902_s20 = smov 0  }
   0x3   :  { %s2904_s21 = smov 0  }
   0x4 LB: > { %s23_s22 = sadd.s32 1, %s2856_s19  ;;  %s26_s23 = sadd.s32 1, %s2860_s20  ;;  %s2864_s21 = sphi %s2904_s21, %s14_s21   ;;  %s2860_s20 = sphi %s2902_s20, %s3557_s20   ;;  %s2856_s19 = sphi %s2900_s19, %s3556_s19   ;;  %s2852_s18 = sphi %s2898_s18, %s3555_s18   ;;  %s2848_s17 = sphi %s2896_s17, %s3554_s17   ;;  %s2844_s16 = sphi %s2894_s16, %s3553_s16   ;;  %s2840_s15 = sphi %s2892_s15, %s3552_s15  }
   0x5   : > { %p24_p0 = scmp.ge.s32.totalorder %s23_s22, 2  ;;  %p42_p1 = scmp.ne.s32.totalorder %s2844_s16, %s2840_s15 }
   0x6   : > { %p43_p2 = scmp.eq.s32.totalorder %s2864_s21, 0  ;;  %s35_s27 = sadd.s32 1, %s2844_s16 }
   0x7   : > { %s3559_s22 = smov (%p24_p0, %s23_s22), 0  ;;  %s3561_s23 = smov (!%p24_p0, %s26_s23), %s2860_s20 }
   0x8   : > { %p44_p3 = por %p43_p2, %p42_p1  ;;  %p28_p4 = scmp.ge.s32.totalorder %s3561_s23, 2 }
   0x9   : > { %s31_s24 = ssub.s32 %s2856_s19, %s3559_s22  ;;  %p2252_p6 = scmp.ge.s32.totalorder %s2864_s21, 4 }
   0xa   : > { %s3563_s23 = smov (%p28_p4, %s3561_s23), 0 }
   0xb   : > { %s30_s25 = ssub.s32 %s2860_s20, %s3563_s23  ;;  %166 = sbr.rel (%p2252_p6) target bundleno = 55 (0x37), region = 28 }
   0xc   : > { %s32_s26 = sor.u32 %s31_s24, %s30_s25 }
   0xd   : > { %p33_p5 = scmp.eq.s32.totalorder %s32_s26, 0 }
   0xf   : > { %s2943_s28 = scalar_select %p33_p5, %s2844_s16, %s35_s27  }
  0x10   : > { %169 = sbr.rel (!%p44_p3) target bundleno = 55 (0x37), region = 32  ;;  %s171_s29 = sand.u32 (%p44_p3), 1, %s2844_s16  }
  0x11   : > { %s2255_s30 = sshll.u32 (%p44_p3), %s2856_s19, 1  ;;  %s2253_s5 = sshll.u32 (%p44_p3), %s171_s29, 8 }
  0x12   : > { %s2654_s6 = sshll.u32 (%p44_p3), %s2860_s20, 7  ;;  %s2957_s12 = scalar_lea.vmem (%p44_p3), [#allocation3], %s2253_s5 }
  0x13   : > { %s177_s7 = sadd.s32 (%p44_p3), %s2654_s6, %s2255_s30 }
  0x14   : > { %s2257_s8 = sshll.u32 (%p44_p3), %s177_s7, 2 }
  0x15   : > { %s2952_s11 = scalar_lea.vmem %s3547_s0, %s2257_s8 }
  0x16   : > { %v270_v0 = vld [vmem:[%s2952_s11] sm:$0xff]  ;;  %v272_v1 = vld [vmem:[%s2952_s11 + $0x10] sm:$0xff] }
  0x17   : > { %v274_v2 = vld [vmem:[%s2952_s11 + $0x20] sm:$0xff]  ;;  %271 = vst [vmem:[%s2957_s12] sm:$0xff] %v270_v0  ;;  %v276_v3 = vld [vmem:[%s2952_s11 + $0x30] sm:$0xff] }
  0x18   : > { %273 = vst [vmem:[%s2957_s12 + $0x8] sm:$0xff] %v272_v1  ;;  %v278_v4 = vld [vmem:[%s2952_s11 + $0x40] sm:$0xff]  ;;  %v280_v5 = vld [vmem:[%s2952_s11 + $0x50] sm:$0xff] }
  0x19   : > { %275 = vst [vmem:[%s2957_s12 + $0x10] sm:$0xff] %v274_v2  ;;  %v282_v6 = vld [vmem:[%s2952_s11 + $0x60] sm:$0xff]  ;;  %v284_v7 = vld [vmem:[%s2952_s11 + $0x70] sm:$0xff] }
  0x1a   : > { %277 = vst [vmem:[%s2957_s12 + $0x18] sm:$0xff] %v276_v3  ;;  %v286_v8 = vld [vmem:[%s2952_s11 + $0x80] sm:$0xff]  ;;  %v288_v9 = vld [vmem:[%s2952_s11 + $0x90] sm:$0xff] }
  0x1b   : > { %279 = vst [vmem:[%s2957_s12 + $0x20] sm:$0xff] %v278_v4  ;;  %v290_v10 = vld [vmem:[%s2952_s11 + $0xa0] sm:$0xff]  ;;  %v292_v11 = vld [vmem:[%s2952_s11 + $0xb0] sm:$0xff] }
  0x1c   : > { %281 = vst [vmem:[%s2957_s12 + $0x28] sm:$0xff] %v280_v5  ;;  %v294_v12 = vld [vmem:[%s2952_s11 + $0xc0] sm:$0xff]  ;;  %v296_v13 = vld [vmem:[%s2952_s11 + $0xd0] sm:$0xff] }
  0x1d   : > { %283 = vst [vmem:[%s2957_s12 + $0x30] sm:$0xff] %v282_v6  ;;  %v298_v14 = vld [vmem:[%s2952_s11 + $0xe0] sm:$0xff]  ;;  %v300_v15 = vld [vmem:[%s2952_s11 + $0xf0] sm:$0xff] }
  0x1e   : > { %285 = vst [vmem:[%s2957_s12 + $0x38] sm:$0xff] %v284_v7  ;;  %v302_v16 = vld [vmem:[%s2952_s11 + $0x100] sm:$0xff]  ;;  %v304_v17 = vld [vmem:[%s2952_s11 + $0x110] sm:$0xff] }
  0x1f   : > { %287 = vst [vmem:[%s2957_s12 + $0x40] sm:$0xff] %v286_v8  ;;  %v306_v18 = vld [vmem:[%s2952_s11 + $0x120] sm:$0xff]  ;;  %v308_v19 = vld [vmem:[%s2952_s11 + $0x130] sm:$0xff] }
  0x20   : > { %289 = vst [vmem:[%s2957_s12 + $0x48] sm:$0xff] %v288_v9  ;;  %v310_v20 = vld [vmem:[%s2952_s11 + $0x140] sm:$0xff]  ;;  %v312_v21 = vld [vmem:[%s2952_s11 + $0x150] sm:$0xff] }
  0x21   : > { %291 = vst [vmem:[%s2957_s12 + $0x50] sm:$0xff] %v290_v10  ;;  %v314_v22 = vld [vmem:[%s2952_s11 + $0x160] sm:$0xff]  ;;  %v316_v23 = vld [vmem:[%s2952_s11 + $0x170] sm:$0xff] }
  0x22   : > { %293 = vst [vmem:[%s2957_s12 + $0x58] sm:$0xff] %v292_v11  ;;  %v318_v24 = vld [vmem:[%s2952_s11 + $0x180] sm:$0xff]  ;;  %v320_v25 = vld [vmem:[%s2952_s11 + $0x190] sm:$0xff] }
  0x23   : > { %295 = vst [vmem:[%s2957_s12 + $0x60] sm:$0xff] %v294_v12  ;;  %v322_v26 = vld [vmem:[%s2952_s11 + $0x1a0] sm:$0xff]  ;;  %v324_v27 = vld [vmem:[%s2952_s11 + $0x1b0] sm:$0xff] }
  0x24   : > { %297 = vst [vmem:[%s2957_s12 + $0x68] sm:$0xff] %v296_v13  ;;  %v326_v28 = vld [vmem:[%s2952_s11 + $0x1c0] sm:$0xff]  ;;  %v328_v29 = vld [vmem:[%s2952_s11 + $0x1d0] sm:$0xff] }
  0x25   : > { %299 = vst [vmem:[%s2957_s12 + $0x70] sm:$0xff] %v298_v14  ;;  %v330_v30 = vld [vmem:[%s2952_s11 + $0x1e0] sm:$0xff]  ;;  %v332_v31 = vld [vmem:[%s2952_s11 + $0x1f0] sm:$0xff] }
  0x26   : > { %301 = vst [vmem:[%s2957_s12 + $0x78] sm:$0xff] %v300_v15 }
  0x27   : > { %303 = vst [vmem:[%s2957_s12 + $0x80] sm:$0xff] %v302_v16 }
  0x28   : > { %305 = vst [vmem:[%s2957_s12 + $0x88] sm:$0xff] %v304_v17 }
  0x29   : > { %307 = vst [vmem:[%s2957_s12 + $0x90] sm:$0xff] %v306_v18 }
  0x2a   : > { %309 = vst [vmem:[%s2957_s12 + $0x98] sm:$0xff] %v308_v19 }
  0x2b   : > { %311 = vst [vmem:[%s2957_s12 + $0xa0] sm:$0xff] %v310_v20 }
  0x2c   : > { %313 = vst [vmem:[%s2957_s12 + $0xa8] sm:$0xff] %v312_v21 }
  0x2d   : > { %315 = vst [vmem:[%s2957_s12 + $0xb0] sm:$0xff] %v314_v22 }
  0x2e   : > { %317 = vst [vmem:[%s2957_s12 + $0xb8] sm:$0xff] %v316_v23 }
  0x2f   : > { %319 = vst [vmem:[%s2957_s12 + $0xc0] sm:$0xff] %v318_v24 }
  0x30   : > { %321 = vst [vmem:[%s2957_s12 + $0xc8] sm:$0xff] %v320_v25 }
  0x31   : > { %323 = vst [vmem:[%s2957_s12 + $0xd0] sm:$0xff] %v322_v26 }
  0x32   : > { %325 = vst [vmem:[%s2957_s12 + $0xd8] sm:$0xff] %v324_v27 }
  0x33   : > { %327 = vst [vmem:[%s2957_s12 + $0xe0] sm:$0xff] %v326_v28 }
  0x34   : > { %329 = vst [vmem:[%s2957_s12 + $0xe8] sm:$0xff] %v328_v29 }
  0x35   : > { %331 = vst [vmem:[%s2957_s12 + $0xf0] sm:$0xff] %v330_v30 }
  0x36   : > { %333 = vst [vmem:[%s2957_s12 + $0xf8] sm:$0xff] %v332_v31 }
  0x37 PF: > { %p2258_p7 = scmp.ge.s32.totalorder %s2864_s21, 1  ;;  %p338_p8 = scmp.lt.s32.totalorder %s2864_s21, 5 }
  0x39   : > { %p339_p9 = pnand %p2258_p7, %p338_p8 }
  0x3a   : > { %s345_s13 = sand.u32 (!%p339_p9), 1, %s2840_s15   ;;  %s2260_s14 = sshll.u32 (!%p339_p9), %s2852_s18, 5 }
  0x3b   : > { %342 = sbr.rel (%p339_p9) target bundleno = 981 (0x3d5), region = 70  ;;  %s2259_s24 = sshll.u32 (!%p339_p9), %s345_s13, 8 }
  0x3c   : > { %p374_p10 = scmp.lt.s32.totalorder (!%p339_p9), %s2260_s14, 63  ;;  %s3029_s30 = scalar_lea.vmem (!%p339_p9), [#allocation3], %s2259_s24 }
  0x3d   : > { %p2263_p11 = scmp.ne.s32.totalorder (!%p339_p9), %s2848_s17, 0 }
  0x40   : > { %s3565_s14 = smov (!%p374_p10, %s2260_s14), 63  ;;  %383 = sbr.rel (%p2263_p11) target bundleno = 134 (0x86), region = 78 }
  0x41   : > { %s2655_s25 = sshll.u32 %s3565_s14, 3 }
  0x42   : > { %s3027_s29 = scalar_lea.vmem %s3551_s4, %s2655_s25 }
  0x45   : > { %v2866_v32 = vmov 0.0  }
  0x46   : > { %384 = vst [vmem:[#allocation2 + $0xb0] sm:$0xff] %v2866_v32 }
  0x47   : > { %385 = vst [vmem:[#allocation2 + $0x1b0] sm:$0xff] %v2866_v32 }
  0x48   : > { %386 = vst [vmem:[#allocation2 + $0xd8] sm:$0xff] %v2866_v32 }
  0x49   : > { %387 = vst [vmem:[#allocation2 + $0x18] sm:$0xff] %v2866_v32 }
  0x4a   : > { %388 = vst [vmem:[#allocation2 + $0x50] sm:$0xff] %v2866_v32 }
  0x4b   : > { %389 = vst [vmem:[#allocation2 + $0x168] sm:$0xff] %v2866_v32 }
  0x4c   : > { %390 = vst [vmem:[#allocation2 + $0x130] sm:$0xff] %v2866_v32 }
  0x4d   : > { %391 = vst [vmem:[#allocation2 + $0x48] sm:$0xff] %v2866_v32 }
  0x4e   : > { %392 = vst [vmem:[#allocation2 + $0x180] sm:$0xff] %v2866_v32 }
  0x4f   : > { %393 = vst [vmem:[#allocation2 + $0x110] sm:$0xff] %v2866_v32 }
  0x50   : > { %394 = vst [vmem:[#allocation2 + $0x118] sm:$0xff] %v2866_v32 }
  0x51   : > { %395 = vst [vmem:[#allocation2 + $0x98] sm:$0xff] %v2866_v32 }
  0x52   : > { %396 = vst [vmem:[#allocation2 + $0x120] sm:$0xff] %v2866_v32 }
  0x53   : > { %397 = vst [vmem:[#allocation2 + $0x150] sm:$0xff] %v2866_v32 }
  0x54   : > { %398 = vst [vmem:[#allocation2 + $0x108] sm:$0xff] %v2866_v32 }
  0x55   : > { %399 = vst [vmem:[#allocation2 + $0x60] sm:$0xff] %v2866_v32 }
  0x56   : > { %400 = vst [vmem:[#allocation2 + $0xe0] sm:$0xff] %v2866_v32 }
  0x57   : > { %401 = vst [vmem:[#allocation2 + $0x188] sm:$0xff] %v2866_v32 }
  0x58   : > { %402 = vst [vmem:[#allocation2 + $0x138] sm:$0xff] %v2866_v32 }
  0x59   : > { %403 = vst [vmem:[#allocation2 + $0x140] sm:$0xff] %v2866_v32 }
  0x5a   : > { %404 = vst [vmem:[#allocation2 + $0x80] sm:$0xff] %v2866_v32 }
  0x5b   : > { %405 = vst [vmem:[#allocation2 + $0x1a8] sm:$0xff] %v2866_v32 }
  0x5c   : > { %406 = vst [vmem:[#allocation2 + $0x1b8] sm:$0xff] %v2866_v32 }
  0x5d   : > { %407 = vst [vmem:[#allocation2 + $0x28] sm:$0xff] %v2866_v32 }
  0x5e   : > { %408 = vst [vmem:[#allocation2 + $0x1e8] sm:$0xff] %v2866_v32 }
  0x5f   : > { %409 = vst [vmem:[#allocation2 + $0xf8] sm:$0xff] %v2866_v32 }
  0x60   : > { %410 = vst [vmem:[#allocation2 + $0x160] sm:$0xff] %v2866_v32 }
  0x61   : > { %411 = vst [vmem:[#allocation2 + $0x30] sm:$0xff] %v2866_v32 }
  0x62   : > { %412 = vst [vmem:[#allocation2 + $0x1e0] sm:$0xff] %v2866_v32 }
  0x63   : > { %413 = vst [vmem:[#allocation2] sm:$0xff] %v2866_v32 }
  0x64   : > { %414 = vst [vmem:[#allocation2 + $0xf0] sm:$0xff] %v2866_v32 }
  0x65   : > { %415 = vst [vmem:[#allocation2 + $0x8] sm:$0xff] %v2866_v32 }
  0x66   : > { %416 = vst [vmem:[#allocation2 + $0x148] sm:$0xff] %v2866_v32 }
  0x67   : > { %417 = vst [vmem:[#allocation2 + $0x1d0] sm:$0xff] %v2866_v32 }
  0x68   : > { %418 = vst [vmem:[#allocation2 + $0x100] sm:$0xff] %v2866_v32 }
  0x69   : > { %419 = vst [vmem:[#allocation2 + $0xc8] sm:$0xff] %v2866_v32 }
  0x6a   : > { %420 = vst [vmem:[#allocation2 + $0x40] sm:$0xff] %v2866_v32 }
  0x6b   : > { %421 = vst [vmem:[#allocation2 + $0x1f8] sm:$0xff] %v2866_v32 }
  0x6c   : > { %422 = vst [vmem:[#allocation2 + $0x20] sm:$0xff] %v2866_v32 }
  0x6d   : > { %423 = vst [vmem:[#allocation2 + $0x128] sm:$0xff] %v2866_v32 }
  0x6e   : > { %424 = vst [vmem:[#allocation2 + $0x1a0] sm:$0xff] %v2866_v32 }
  0x6f   : > { %425 = vst [vmem:[#allocation2 + $0x1f0] sm:$0xff] %v2866_v32 }
  0x70   : > { %426 = vst [vmem:[#allocation2 + $0xe8] sm:$0xff] %v2866_v32 }
  0x71   : > { %427 = vst [vmem:[#allocation2 + $0x78] sm:$0xff] %v2866_v32 }
  0x72   : > { %428 = vst [vmem:[#allocation2 + $0x70] sm:$0xff] %v2866_v32 }
  0x73   : > { %429 = vst [vmem:[#allocation2 + $0x90] sm:$0xff] %v2866_v32 }
  0x74   : > { %430 = vst [vmem:[#allocation2 + $0x1d8] sm:$0xff] %v2866_v32 }
  0x75   : > { %431 = vst [vmem:[#allocation2 + $0xd0] sm:$0xff] %v2866_v32 }
  0x76   : > { %432 = vst [vmem:[#allocation2 + $0xb8] sm:$0xff] %v2866_v32 }
  0x77   : > { %433 = vst [vmem:[#allocation2 + $0x88] sm:$0xff] %v2866_v32 }
  0x78   : > { %434 = vst [vmem:[#allocation2 + $0xa8] sm:$0xff] %v2866_v32 }
  0x79   : > { %435 = vst [vmem:[#allocation2 + $0x1c8] sm:$0xff] %v2866_v32 }
  0x7a   : > { %436 = vst [vmem:[#allocation2 + $0x170] sm:$0xff] %v2866_v32 }
  0x7b   : > { %437 = vst [vmem:[#allocation2 + $0x178] sm:$0xff] %v2866_v32 }
  0x7c   : > { %438 = vst [vmem:[#allocation2 + $0x68] sm:$0xff] %v2866_v32 }
  0x7d   : > { %439 = vst [vmem:[#allocation2 + $0x190] sm:$0xff] %v2866_v32 }
  0x7e   : > { %440 = vst [vmem:[#allocation2 + $0x198] sm:$0xff] %v2866_v32 }
  0x7f   : > { %441 = vst [vmem:[#allocation2 + $0x38] sm:$0xff] %v2866_v32 }
  0x80   : > { %442 = vst [vmem:[#allocation2 + $0xc0] sm:$0xff] %v2866_v32 }
  0x81   : > { %443 = vst [vmem:[#allocation2 + $0x1c0] sm:$0xff] %v2866_v32 }
  0x82   : > { %444 = vst [vmem:[#allocation2 + $0x158] sm:$0xff] %v2866_v32 }
  0x83   : > { %445 = vst [vmem:[#allocation2 + $0x10] sm:$0xff] %v2866_v32 }
  0x84   : > { %446 = vst [vmem:[#allocation2 + $0x58] sm:$0xff] %v2866_v32 }
  0x85   : > { %447 = vst [vmem:[#allocation2 + $0xa0] sm:$0xff] %v2866_v32 }
  0x86 PF: > { %s2264_s15 = sshll.u32 %s2848_s17, 8  ;;  %p2523_p12 = scmp.ne.s32.totalorder %s2848_s17, 1 }
  0x87   : > { %s3100_s6 = scalar_lea.vmem %s3548_s1, %s2264_s15 }
  0x88   : > { %v2453_v33 = vld [vmem:[%s3100_s6 + $0x70] sm:$0xf]  ;;  %v2672_v34 = vld [vmem:[%s3100_s6 + $0x74] sm:$0xf0]  ;;  %v2671_v38 = vld [vmem:[%s3100_s6 + $0x74] sm:$0xf] }
  0x89   : > { %v2517_v35 = vld [vmem:[%s3100_s6 + $0xf0] sm:$0xf]  ;;  %v2454_v36 = vor.u32 %v2672_v34, %v2453_v33  ;;  %v2688_v37 = vld [vmem:[%s3100_s6 + $0xf4] sm:$0xf0]  ;;  %v2455_v39 = vld [vmem:[%s3100_s6 + $0x78] sm:$0xf0] }
  0x8a   : > { %v2518_v40 = vor.u32 %v2688_v37, %v2517_v35  ;;  %v2458_v41 = vor.u32 %v2671_v38, %v2455_v39  ;;  %v2687_v42 = vld [vmem:[%s3100_s6 + $0xf4] sm:$0xf]  ;;  %v2519_v43 = vld [vmem:[%s3100_s6 + $0xf8] sm:$0xf0]  ;;  %v2445_v44 = vld [vmem:[%s3100_s6 + $0x60] sm:$0xf] }
  0x8b   : > { %902 = vmatpush.bf16.msra.mxu0 %v2454_v36  ;;  %v2522_v45 = vor.u32 %v2687_v42, %v2519_v43  ;;  %v2670_v46 = vld [vmem:[%s3100_s6 + $0x64] sm:$0xf0]  ;;  %v2509_v47 = vld [vmem:[%s3100_s6 + $0xe0] sm:$0xf]  ;;  %v2669_v51 = vld [vmem:[%s3100_s6 + $0x64] sm:$0xf] }
  0x8c   : > { %v2686_v48 = vld [vmem:[%s3100_s6 + $0xe4] sm:$0xf0]  ;;  %991 = vmatpush.bf16.msra.mxu1 %v2518_v40  ;;  %1080 = vmatpush.bf16.msra.mxu2 %v2458_v41  ;;  %v2446_v49 = vor.u32 %v2670_v46, %v2445_v44  ;;  %v2447_v52 = vld [vmem:[%s3100_s6 + $0x68] sm:$0xf0]  ;;  %v2685_v53 = vld [vmem:[%s3100_s6 + $0xe4] sm:$0xf] }
  0x8d   : > { %v2510_v50 = vor.u32 %v2686_v48, %v2509_v47  ;;  %1169 = vmatpush.bf16.msra.mxu3 %v2522_v45  ;;  %v2450_v54 = vor.u32 %v2669_v51, %v2447_v52  ;;  %v2511_v55 = vld [vmem:[%s3100_s6 + $0xe8] sm:$0xf0]  ;;  %v2437_v56 = vld [vmem:[%s3100_s6 + $0x50] sm:$0xf]  ;;  %v2668_v57 = vld [vmem:[%s3100_s6 + $0x54] sm:$0xf0] }
  0x8e   : > { %v2514_v58 = vor.u32 %v2685_v53, %v2511_v55  ;;  %v2501_v59 = vld [vmem:[%s3100_s6 + $0xd0] sm:$0xf]  ;;  %v2684_v60 = vld [vmem:[%s3100_s6 + $0xd4] sm:$0xf0]  ;;  %v2667_v61 = vld [vmem:[%s3100_s6 + $0x54] sm:$0xf]  ;;  %v2438_v62 = vor.u32 %v2668_v57, %v2437_v56 }
  0x8f   : > { %903 = vmatpush.bf16.msra.mxu0 %v2446_v49  ;;  %v2439_v63 = vld [vmem:[%s3100_s6 + $0x58] sm:$0xf0]  ;;  %v2683_v0 = vld [vmem:[%s3100_s6 + $0xd4] sm:$0xf]  ;;  %v2502_v2 = vor.u32 %v2684_v60, %v2501_v59  ;;  %v2429_v4 = vld [vmem:[%s3100_s6 + $0x40] sm:$0xf] }
  0x90   : > { %v2503_v1 = vld [vmem:[%s3100_s6 + $0xd8] sm:$0xf0]  ;;  %992 = vmatpush.bf16.msra.mxu1 %v2510_v50  ;;  %1081 = vmatpush.bf16.msra.mxu2 %v2450_v54  ;;  %v2442_v3 = vor.u32 %v2667_v61, %v2439_v63  ;;  %v2666_v5 = vld [vmem:[%s3100_s6 + $0x44] sm:$0xf0]  ;;  %v2493_v6 = vld [vmem:[%s3100_s6 + $0xc0] sm:$0xf] }
  0x91   : > { %1170 = vmatpush.bf16.msra.mxu3 %v2514_v58  ;;  %v2506_v7 = vor.u32 %v2683_v0, %v2503_v1  ;;  %v2682_v8 = vld [vmem:[%s3100_s6 + $0xc4] sm:$0xf0]  ;;  %v2665_v9 = vld [vmem:[%s3100_s6 + $0x44] sm:$0xf]  ;;  %v2431_v10 = vld [vmem:[%s3100_s6 + $0x48] sm:$0xf0]  ;;  %v2430_v13 = vor.u32 %v2666_v5, %v2429_v4 }
  0x92   : > { %v2681_v11 = vld [vmem:[%s3100_s6 + $0xc4] sm:$0xf]  ;;  %v2495_v12 = vld [vmem:[%s3100_s6 + $0xc8] sm:$0xf0]  ;;  %v2494_v14 = vor.u32 %v2682_v8, %v2493_v6  ;;  %v2434_v15 = vor.u32 %v2665_v9, %v2431_v10  ;;  %v2421_v16 = vld [vmem:[%s3100_s6 + $0x30] sm:$0xf] }
  0x93   : > { %904 = vmatpush.bf16.msra.mxu0 %v2438_v62  ;;  %v2664_v17 = vld [vmem:[%s3100_s6 + $0x34] sm:$0xf0]  ;;  %v2485_v18 = vld [vmem:[%s3100_s6 + $0xb0] sm:$0xf]  ;;  %v2498_v19 = vor.u32 %v2681_v11, %v2495_v12  ;;  %v2663_v21 = vld [vmem:[%s3100_s6 + $0x34] sm:$0xf] }
  0x94   : > { %993 = vmatpush.bf16.msra.mxu1 %v2502_v2  ;;  %1082 = vmatpush.bf16.msra.mxu2 %v2442_v3  ;;  %v2680_v20 = vld [vmem:[%s3100_s6 + $0xb4] sm:$0xf0]  ;;  %v2423_v22 = vld [vmem:[%s3100_s6 + $0x38] sm:$0xf0]  ;;  %v2679_v23 = vld [vmem:[%s3100_s6 + $0xb4] sm:$0xf]  ;;  %v2422_v25 = vor.u32 %v2664_v17, %v2421_v16 }
  0x95   : > { %1171 = vmatpush.bf16.msra.mxu3 %v2506_v7  ;;  %v2487_v24 = vld [vmem:[%s3100_s6 + $0xb8] sm:$0xf0]  ;;  %v2486_v26 = vor.u32 %v2680_v20, %v2485_v18  ;;  %v2426_v27 = vor.u32 %v2663_v21, %v2423_v22  ;;  %v2413_v28 = vld [vmem:[%s3100_s6 + $0x20] sm:$0xf]  ;;  %v2662_v29 = vld [vmem:[%s3100_s6 + $0x24] sm:$0xf0] }
  0x96   : > { %v2477_v30 = vld [vmem:[%s3100_s6 + $0xa0] sm:$0xf]  ;;  %v2490_v31 = vor.u32 %v2679_v23, %v2487_v24  ;;  %v2678_v32 = vld [vmem:[%s3100_s6 + $0xa4] sm:$0xf0]  ;;  %v2661_v33 = vld [vmem:[%s3100_s6 + $0x24] sm:$0xf]  ;;  %v2414_v37 = vor.u32 %v2662_v29, %v2413_v28 }
  0x97   : > { %905 = vmatpush.bf16.msra.mxu0 %v2430_v13  ;;  %v2415_v34 = vld [vmem:[%s3100_s6 + $0x28] sm:$0xf0]  ;;  %v2677_v35 = vld [vmem:[%s3100_s6 + $0xa4] sm:$0xf]  ;;  %v2478_v38 = vor.u32 %v2678_v32, %v2477_v30  ;;  %v2405_v40 = vld [vmem:[%s3100_s6 + $0x10] sm:$0xf] }
  0x98   : > { %994 = vmatpush.bf16.msra.mxu1 %v2494_v14  ;;  %1083 = vmatpush.bf16.msra.mxu2 %v2434_v15  ;;  %v2479_v36 = vld [vmem:[%s3100_s6 + $0xa8] sm:$0xf0]  ;;  %v2418_v39 = vor.u32 %v2661_v33, %v2415_v34  ;;  %v2660_v41 = vld [vmem:[%s3100_s6 + $0x14] sm:$0xf0]  ;;  %v2469_v42 = vld [vmem:[%s3100_s6 + $0x90] sm:$0xf] }
  0x99   : > { %1172 = vmatpush.bf16.msra.mxu3 %v2498_v19  ;;  %v2482_v43 = vor.u32 %v2677_v35, %v2479_v36  ;;  %v2676_v44 = vld [vmem:[%s3100_s6 + $0x94] sm:$0xf0]  ;;  %v2659_v45 = vld [vmem:[%s3100_s6 + $0x14] sm:$0xf]  ;;  %v2407_v46 = vld [vmem:[%s3100_s6 + $0x18] sm:$0xf0]  ;;  %v2406_v49 = vor.u32 %v2660_v41, %v2405_v40 }
  0x9a   : > { %v2675_v47 = vld [vmem:[%s3100_s6 + $0x94] sm:$0xf]  ;;  %v2471_v48 = vld [vmem:[%s3100_s6 + $0x98] sm:$0xf0]  ;;  %v2470_v50 = vor.u32 %v2676_v44, %v2469_v42  ;;  %v2410_v51 = vor.u32 %v2659_v45, %v2407_v46  ;;  %v2397_v52 = vld [vmem:[%s3100_s6] sm:$0xf] }
  0x9b   : > { %906 = vmatpush.bf16.msra.mxu0 %v2422_v25  ;;  %v2658_v53 = vld [vmem:[%s3100_s6 + $0x4] sm:$0xf0]  ;;  %v2461_v54 = vld [vmem:[%s3100_s6 + $0x80] sm:$0xf]  ;;  %v2474_v55 = vor.u32 %v2675_v47, %v2471_v48  ;;  %v2657_v57 = vld [vmem:[%s3100_s6 + $0x4] sm:$0xf] }
  0x9c   : > { %995 = vmatpush.bf16.msra.mxu1 %v2486_v26  ;;  %1084 = vmatpush.bf16.msra.mxu2 %v2426_v27  ;;  %v2674_v56 = vld [vmem:[%s3100_s6 + $0x84] sm:$0xf0]  ;;  %v2399_v58 = vld [vmem:[%s3100_s6 + $0x8] sm:$0xf0]  ;;  %v2673_v59 = vld [vmem:[%s3100_s6 + $0x84] sm:$0xf]  ;;  %v2398_v61 = vor.u32 %v2658_v53, %v2397_v52 }
  0x9d   : > { %1173 = vmatpush.bf16.msra.mxu3 %v2490_v31  ;;  %v2463_v60 = vld [vmem:[%s3100_s6 + $0x88] sm:$0xf0]  ;;  %v2269_v62 = vld [vmem:[%s3029_s30] sm:$0xf]  ;;  %v2690_v63 = vld [vmem:[%s3029_s30 + $0x4] sm:$0xf0]  ;;  %v2462_v0 = vor.u32 %v2674_v56, %v2461_v54  ;;  %v2402_v1 = vor.u32 %v2657_v57, %v2399_v58 }
  0x9e   : > { %v2689_v2 = vld [vmem:[%s3029_s30 + $0x4] sm:$0xf]  ;;  %v2271_v3 = vld [vmem:[%s3029_s30 + $0x8] sm:$0xf0]  ;;  %v2466_v4 = vor.u32 %v2673_v59, %v2463_v60  ;;  %v2270_v5 = vor.u32 %v2690_v63, %v2269_v62  ;;  %v2277_v7 = vld [vmem:[%s3029_s30 + $0x10] sm:$0xf] }
  0x9f   : > { %907 = vmatpush.bf16.msra.mxu0 %v2414_v37  ;;  %v2274_v6 = vor.u32 %v2689_v2, %v2271_v3  ;;  %v2692_v8 = vld [vmem:[%s3029_s30 + $0x14] sm:$0xf0]  ;;  %v2691_v9 = vld [vmem:[%s3029_s30 + $0x14] sm:$0xf]  ;;  %v2279_v10 = vld [vmem:[%s3029_s30 + $0x18] sm:$0xf0] }
  0xa0   : > { %996 = vmatpush.bf16.msra.mxu1 %v2478_v38  ;;  %1085 = vmatpush.bf16.msra.mxu2 %v2418_v39  ;;  %v2278_v11 = vor.u32 %v2692_v8, %v2277_v7  ;;  %v2282_v12 = vor.u32 %v2691_v9, %v2279_v10  ;;  %v2285_v13 = vld [vmem:[%s3029_s30 + $0x20] sm:$0xf]  ;;  %v2694_v14 = vld [vmem:[%s3029_s30 + $0x24] sm:$0xf0]  ;;  %v2693_v15 = vld [vmem:[%s3029_s30 + $0x24] sm:$0xf] }
  0xa1   : > { %1174 = vmatpush.bf16.msra.mxu3 %v2482_v43  ;;  %v2287_v16 = vld [vmem:[%s3029_s30 + $0x28] sm:$0xf0]  ;;  %v2286_v17 = vor.u32 %v2694_v14, %v2285_v13  ;;  %v2293_v19 = vld [vmem:[%s3029_s30 + $0x30] sm:$0xf]  ;;  %v2696_v20 = vld [vmem:[%s3029_s30 + $0x34] sm:$0xf0] }
  0xa2   : > { %v2290_v18 = vor.u32 %v2693_v15, %v2287_v16  ;;  %v2695_v21 = vld [vmem:[%s3029_s30 + $0x34] sm:$0xf]  ;;  %v2295_v22 = vld [vmem:[%s3029_s30 + $0x38] sm:$0xf0]  ;;  %v2294_v23 = vor.u32 %v2696_v20, %v2293_v19  ;;  %v2301_v25 = vld [vmem:[%s3029_s30 + $0x40] sm:$0xf] }
  0xa3   : > { %908 = vmatpush.bf16.msra.mxu0 %v2406_v49  ;;  %v2298_v24 = vor.u32 %v2695_v21, %v2295_v22  ;;  %v2698_v26 = vld [vmem:[%s3029_s30 + $0x44] sm:$0xf0]  ;;  %v2697_v27 = vld [vmem:[%s3029_s30 + $0x44] sm:$0xf]  ;;  %v2303_v28 = vld [vmem:[%s3029_s30 + $0x48] sm:$0xf0] }
  0xa4   : > { %997 = vmatpush.bf16.msra.mxu1 %v2470_v50  ;;  %1086 = vmatpush.bf16.msra.mxu2 %v2410_v51  ;;  %v2302_v29 = vor.u32 %v2698_v26, %v2301_v25  ;;  %v2306_v30 = vor.u32 %v2697_v27, %v2303_v28  ;;  %v2309_v31 = vld [vmem:[%s3029_s30 + $0x50] sm:$0xf]  ;;  %v2700_v32 = vld [vmem:[%s3029_s30 + $0x54] sm:$0xf0]  ;;  %v2699_v33 = vld [vmem:[%s3029_s30 + $0x54] sm:$0xf] }
  0xa5   : > { %1175 = vmatpush.bf16.msra.mxu3 %v2474_v55  ;;  %v2311_v34 = vld [vmem:[%s3029_s30 + $0x58] sm:$0xf0]  ;;  %v2310_v35 = vor.u32 %v2700_v32, %v2309_v31  ;;  %v2317_v37 = vld [vmem:[%s3029_s30 + $0x60] sm:$0xf]  ;;  %v2702_v38 = vld [vmem:[%s3029_s30 + $0x64] sm:$0xf0] }
  0xa6   : > { %v2314_v36 = vor.u32 %v2699_v33, %v2311_v34  ;;  %v2701_v39 = vld [vmem:[%s3029_s30 + $0x64] sm:$0xf]  ;;  %v2319_v40 = vld [vmem:[%s3029_s30 + $0x68] sm:$0xf0]  ;;  %v2318_v41 = vor.u32 %v2702_v38, %v2317_v37  ;;  %v2325_v43 = vld [vmem:[%s3029_s30 + $0x70] sm:$0xf] }
  0xa7   : > { %909 = vmatpush.bf16.msra.mxu0 %v2398_v61  ;;  %v2322_v42 = vor.u32 %v2701_v39, %v2319_v40  ;;  %v2704_v44 = vld [vmem:[%s3029_s30 + $0x74] sm:$0xf0]  ;;  %v2703_v45 = vld [vmem:[%s3029_s30 + $0x74] sm:$0xf]  ;;  %v2327_v46 = vld [vmem:[%s3029_s30 + $0x78] sm:$0xf0] }
  0xa8   : > { %998 = vmatpush.bf16.msra.mxu1 %v2462_v0  ;;  %1087 = vmatpush.bf16.msra.mxu2 %v2402_v1  ;;  %v2326_v47 = vor.u32 %v2704_v44, %v2325_v43  ;;  %v2330_v48 = vor.u32 %v2703_v45, %v2327_v46  ;;  %v2333_v49 = vld [vmem:[%s3029_s30 + $0x80] sm:$0xf]  ;;  %v2706_v50 = vld [vmem:[%s3029_s30 + $0x84] sm:$0xf0]  ;;  %v2705_v51 = vld [vmem:[%s3029_s30 + $0x84] sm:$0xf] }
  0xa9   : > { %1176 = vmatpush.bf16.msra.mxu3 %v2466_v4  ;;  %v2335_v52 = vld [vmem:[%s3029_s30 + $0x88] sm:$0xf0]  ;;  %v2334_v53 = vor.u32 %v2706_v50, %v2333_v49  ;;  %v486_v56 = vld [vmem:[#allocation2 + $0xb0] sm:$0xff]  ;;  %v488_v1 = vld [vmem:[#allocation2 + $0xd8] sm:$0xff] }
  0xaa   : > { %910 = vmatmul.bf16.vlgmr.msra.gmra.mxu0 %v2270_v5  ;;  %v2338_v55 = vor.u32 %v2705_v51, %v2335_v52  ;;  %v487_v61 = vld [vmem:[#allocation2 + $0x1b0] sm:$0xff]  ;;  %v2708_v7 = vld [vmem:[%s3029_s30 + $0x94] sm:$0xf0]  ;;  %v2343_v9 = vld [vmem:[%s3029_s30 + $0x98] sm:$0xf0] }
  0xab   : > { %999 = vmatmul.bf16.vlgmr.msra.gmra.mxu1 %v2274_v6  ;;  %1088 = vmatmul.bf16.vlgmr.msra.gmra.mxu2 %v2270_v5  ;;  %v2707_v8 = vld [vmem:[%s3029_s30 + $0x94] sm:$0xf]  ;;  %v2349_v32 = vld [vmem:[%s3029_s30 + $0xa0] sm:$0xf]  ;;  %v2710_v33 = vld [vmem:[%s3029_s30 + $0xa4] sm:$0xf0] }
  0xac   : > { %1177 = vmatmul.bf16.vlgmr.msra.gmra.mxu3 %v2274_v6  ;;  %v2341_v6 = vld [vmem:[%s3029_s30 + $0x90] sm:$0xf]  ;;  %v2346_v15 = vor.u32 %v2707_v8, %v2343_v9  ;;  %v2709_v34 = vld [vmem:[%s3029_s30 + $0xa4] sm:$0xf]  ;;  %v2350_v37 = vor.u32 %v2710_v33, %v2349_v32  ;;  %v493_v38 = vld [vmem:[#allocation2 + $0x48] sm:$0xff] }
  0xad   : > { %v492_v27 = vld [vmem:[#allocation2 + $0x130] sm:$0xff]  ;;  %v494_v43 = vld [vmem:[#allocation2 + $0x180] sm:$0xff] }
  0xae   : > { %v495_v49 = vld [vmem:[#allocation2 + $0x110] sm:$0xff] }
  0xba   : > { %915 = vmatmul.bf16.gmra.mxu0 %v2278_v11 }
  0xbb   : > { %1004 = vmatmul.bf16.gmra.mxu1 %v2282_v12  ;;  %1093 = vmatmul.bf16.gmra.mxu2 %v2278_v11  ;;  %v2342_v11 = vor.u32 %v2708_v7, %v2341_v6 }
  0xbc   : > { %1182 = vmatmul.bf16.gmra.mxu3 %v2282_v12  ;;  %v489_v12 = vld [vmem:[#allocation2 + $0x18] sm:$0xff] }
  0xca   : > { %920 = vmatmul.bf16.gmra.mxu0 %v2286_v17 }
  0xcb   : > { %1009 = vmatmul.bf16.gmra.mxu1 %v2290_v18  ;;  %1098 = vmatmul.bf16.gmra.mxu2 %v2286_v17  ;;  %v490_v17 = vld [vmem:[#allocation2 + $0x50] sm:$0xff] }
  0xcc   : > { %1187 = vmatmul.bf16.gmra.mxu3 %v2290_v18 }
  0xda   : > { %925 = vmatmul.bf16.gmra.mxu0 %v2294_v23 }
  0xdb   : > { %1014 = vmatmul.bf16.gmra.mxu1 %v2298_v24  ;;  %1103 = vmatmul.bf16.gmra.mxu2 %v2294_v23  ;;  %v491_v23 = vld [vmem:[#allocation2 + $0x168] sm:$0xff] }
  0xdc   : > { %1192 = vmatmul.bf16.gmra.mxu3 %v2298_v24 }
  0xea   : > { %930 = vmatmul.bf16.gmra.mxu0 %v2302_v29 }
  0xeb   : > { %1019 = vmatmul.bf16.gmra.mxu1 %v2306_v30  ;;  %1108 = vmatmul.bf16.gmra.mxu2 %v2302_v29 }
  0xec   : > { %1197 = vmatmul.bf16.gmra.mxu3 %v2306_v30 }
  0xfa   : > { %935 = vmatmul.bf16.gmra.mxu0 %v2310_v35 }
  0xfb   : > { %1024 = vmatmul.bf16.gmra.mxu1 %v2314_v36  ;;  %1113 = vmatmul.bf16.gmra.mxu2 %v2310_v35  ;;  %v2351_v35 = vld [vmem:[%s3029_s30 + $0xa8] sm:$0xf0] }
  0xfc   : > { %1202 = vmatmul.bf16.gmra.mxu3 %v2314_v36 }
 0x10a   : > { %940 = vmatmul.bf16.gmra.mxu0 %v2318_v41 }
 0x10b   : > { %1029 = vmatmul.bf16.gmra.mxu1 %v2322_v42  ;;  %1118 = vmatmul.bf16.gmra.mxu2 %v2318_v41  ;;  %v2354_v41 = vor.u32 %v2709_v34, %v2351_v35 }
 0x10c   : > { %1207 = vmatmul.bf16.gmra.mxu3 %v2322_v42 }
 0x11a   : > { %945 = vmatmul.bf16.gmra.mxu0 %v2326_v47 }
 0x11b   : > { %1034 = vmatmul.bf16.gmra.mxu1 %v2330_v48  ;;  %1123 = vmatmul.bf16.gmra.mxu2 %v2326_v47 }
 0x11c   : > { %1212 = vmatmul.bf16.gmra.mxu3 %v2330_v48 }
 0x127   : > { %v911_v54 = vpop.f32.mrf.mxu0 }
 0x128   : > { %v1000_v57 = vpop.f32.mrf.mxu1 }
 0x129   : > { %v1001_v58 = vadd.f32 %v1000_v57, %v911_v54 }
 0x12a   : > { %950 = vmatmul.bf16.gmra.mxu0 %v2334_v53 }
 0x12b   : > { %v1258_v59 = vadd.f32 %v1001_v58, %v486_v56  ;;  %1039 = vmatmul.bf16.gmra.mxu1 %v2338_v55  ;;  %1128 = vmatmul.bf16.gmra.mxu2 %v2334_v53  ;;  %v496_v53 = vld [vmem:[#allocation2 + $0x118] sm:$0xff]  ;;  %v2357_v58 = vld [vmem:[%s3029_s30 + $0xb0] sm:$0xf] }
 0x12c   : > { %1217 = vmatmul.bf16.gmra.mxu3 %v2338_v55 }
 0x12d   : > { %1322 = vst [vmem:[#allocation2 + $0xb0] sm:$0xff] %v1258_v59  ;;  %v2712_v59 = vld [vmem:[%s3029_s30 + $0xb4] sm:$0xf0] }
 0x12e   : > { %v1089_v60 = vpop.f32.mrf.mxu2 }
 0x12f   : > { %v1178_v62 = vpop.f32.mrf.mxu3  ;;  %v913_v63 = vpop.f32.mrf.mxu0 }
 0x130   : > { %v1179_v0 = vadd.f32 %v1178_v62, %v1089_v60  ;;  %v1002_v2 = vpop.f32.mrf.mxu1  ;;  %v2711_v60 = vld [vmem:[%s3029_s30 + $0xb4] sm:$0xf] }
 0x131   : > { %v1003_v3 = vadd.f32 %v1002_v2, %v913_v63  ;;  %v2358_v63 = vor.u32 %v2712_v59, %v2357_v58 }
 0x132   : > { %v1259_v4 = vadd.f32 %v1179_v0, %v487_v61  ;;  %v2359_v61 = vld [vmem:[%s3029_s30 + $0xb8] sm:$0xf0] }
 0x133   : > { %v1260_v5 = vadd.f32 %v1003_v3, %v488_v1  ;;  %v497_v0 = vld [vmem:[#allocation2 + $0x98] sm:$0xff]  ;;  %v2362_v3 = vor.u32 %v2711_v60, %v2359_v61 }
 0x134   : > { %1323 = vst [vmem:[#allocation2 + $0x1b0] sm:$0xff] %v1259_v4 }
 0x135   : > { %1324 = vst [vmem:[#allocation2 + $0xd8] sm:$0xff] %v1260_v5  ;;  %v498_v5 = vld [vmem:[#allocation2 + $0x120] sm:$0xff] }
 0x136   : > { %v1091_v10 = vpop.f32.mrf.mxu2 }
 0x137   : > { %v1180_v13 = vpop.f32.mrf.mxu3  ;;  %v916_v14 = vpop.f32.mrf.mxu0 }
 0x138   : > { %v1181_v16 = vadd.f32 %v1180_v13, %v1091_v10  ;;  %v1005_v18 = vpop.f32.mrf.mxu1 }
 0x139   : > { %v1006_v19 = vadd.f32 %v1005_v18, %v916_v14 }
 0x13a   : > { %v1261_v20 = vadd.f32 %v1181_v16, %v489_v12  ;;  %955 = vmatmul.bf16.gmra.mxu0 %v2342_v11 }
 0x13b   : > { %v1262_v21 = vadd.f32 %v1006_v19, %v490_v17  ;;  %1044 = vmatmul.bf16.gmra.mxu1 %v2346_v15  ;;  %1133 = vmatmul.bf16.gmra.mxu2 %v2342_v11  ;;  %v499_v11 = vld [vmem:[#allocation2 + $0x150] sm:$0xff] }
 0x13c   : > { %1325 = vst [vmem:[#allocation2 + $0x18] sm:$0xff] %v1261_v20  ;;  %1222 = vmatmul.bf16.gmra.mxu3 %v2346_v15  ;;  %v500_v15 = vld [vmem:[#allocation2 + $0x108] sm:$0xff]  ;;  %v2365_v20 = vld [vmem:[%s3029_s30 + $0xc0] sm:$0xf] }
 0x13d   : > { %1326 = vst [vmem:[#allocation2 + $0x50] sm:$0xff] %v1262_v21  ;;  %v2714_v21 = vld [vmem:[%s3029_s30 + $0xc4] sm:$0xf0] }
 0x13e   : > { %v1094_v22 = vpop.f32.mrf.mxu2 }
 0x13f   : > { %v1183_v24 = vpop.f32.mrf.mxu3  ;;  %v918_v25 = vpop.f32.mrf.mxu0 }
 0x140   : > { %v1184_v26 = vadd.f32 %v1183_v24, %v1094_v22  ;;  %v1007_v28 = vpop.f32.mrf.mxu1  ;;  %v2713_v22 = vld [vmem:[%s3029_s30 + $0xc4] sm:$0xf] }
 0x141   : > { %v1008_v29 = vadd.f32 %v1007_v28, %v918_v25  ;;  %v2366_v25 = vor.u32 %v2714_v21, %v2365_v20 }
 0x142   : > { %v1263_v30 = vadd.f32 %v1184_v26, %v491_v23  ;;  %v2367_v23 = vld [vmem:[%s3029_s30 + $0xc8] sm:$0xf0]  ;;  %v501_v26 = vld [vmem:[#allocation2 + $0x60] sm:$0xff] }
 0x143   : > { %v1264_v31 = vadd.f32 %v1008_v29, %v492_v27  ;;  %v2370_v29 = vor.u32 %v2713_v22, %v2367_v23 }
 0x144   : > { %1327 = vst [vmem:[#allocation2 + $0x168] sm:$0xff] %v1263_v30 }
 0x145   : > { %1328 = vst [vmem:[#allocation2 + $0x130] sm:$0xff] %v1264_v31  ;;  %v502_v31 = vld [vmem:[#allocation2 + $0xe0] sm:$0xff] }
 0x146   : > { %v1096_v36 = vpop.f32.mrf.mxu2 }
 0x147   : > { %v1185_v39 = vpop.f32.mrf.mxu3  ;;  %v921_v40 = vpop.f32.mrf.mxu0 }
 0x148   : > { %v1186_v42 = vadd.f32 %v1185_v39, %v1096_v36  ;;  %v1010_v44 = vpop.f32.mrf.mxu1 }
 0x149   : > { %v1011_v45 = vadd.f32 %v1010_v44, %v921_v40 }
 0x14a   : > { %v1265_v46 = vadd.f32 %v1186_v42, %v493_v38  ;;  %960 = vmatmul.bf16.gmra.mxu0 %v2350_v37 }
 0x14b   : > { %v1266_v47 = vadd.f32 %v1011_v45, %v494_v43  ;;  %1049 = vmatmul.bf16.gmra.mxu1 %v2354_v41  ;;  %1138 = vmatmul.bf16.gmra.mxu2 %v2350_v37  ;;  %v503_v37 = vld [vmem:[#allocation2 + $0x188] sm:$0xff] }
 0x14c   : > { %1329 = vst [vmem:[#allocation2 + $0x48] sm:$0xff] %v1265_v46  ;;  %1227 = vmatmul.bf16.gmra.mxu3 %v2354_v41  ;;  %v504_v41 = vld [vmem:[#allocation2 + $0x138] sm:$0xff]  ;;  %v2373_v46 = vld [vmem:[%s3029_s30 + $0xd0] sm:$0xf] }
 0x14d   : > { %1330 = vst [vmem:[#allocation2 + $0x180] sm:$0xff] %v1266_v47  ;;  %v2716_v47 = vld [vmem:[%s3029_s30 + $0xd4] sm:$0xf0] }
 0x14e   : > { %v1099_v48 = vpop.f32.mrf.mxu2 }
 0x14f   : > { %v1188_v50 = vpop.f32.mrf.mxu3  ;;  %v923_v51 = vpop.f32.mrf.mxu0 }
 0x150   : > { %v1189_v52 = vadd.f32 %v1188_v50, %v1099_v48  ;;  %v1012_v54 = vpop.f32.mrf.mxu1  ;;  %v2715_v48 = vld [vmem:[%s3029_s30 + $0xd4] sm:$0xf] }
 0x151   : > { %v1013_v55 = vadd.f32 %v1012_v54, %v923_v51  ;;  %v2374_v51 = vor.u32 %v2716_v47, %v2373_v46 }
 0x152   : > { %v1267_v56 = vadd.f32 %v1189_v52, %v495_v49  ;;  %v2375_v49 = vld [vmem:[%s3029_s30 + $0xd8] sm:$0xf0]  ;;  %v505_v52 = vld [vmem:[#allocation2 + $0x140] sm:$0xff] }
 0x153   : > { %v1268_v57 = vadd.f32 %v1013_v55, %v496_v53  ;;  %v2378_v55 = vor.u32 %v2715_v48, %v2375_v49 }
 0x154   : > { %1331 = vst [vmem:[#allocation2 + $0x110] sm:$0xff] %v1267_v56 }
 0x155   : > { %1332 = vst [vmem:[#allocation2 + $0x118] sm:$0xff] %v1268_v57  ;;  %v506_v57 = vld [vmem:[#allocation2 + $0x80] sm:$0xff] }
 0x156   : > { %v1101_v62 = vpop.f32.mrf.mxu2 }
 0x157   : > { %v1190_v1 = vpop.f32.mrf.mxu3  ;;  %v926_v2 = vpop.f32.mrf.mxu0 }
 0x158   : > { %v1191_v4 = vadd.f32 %v1190_v1, %v1101_v62  ;;  %v1015_v6 = vpop.f32.mrf.mxu1 }
 0x159   : > { %v1016_v7 = vadd.f32 %v1015_v6, %v926_v2 }
 0x15a   : > { %v1269_v8 = vadd.f32 %v1191_v4, %v497_v0  ;;  %965 = vmatmul.bf16.gmra.mxu0 %v2358_v63 }
 0x15b   : > { %v1270_v9 = vadd.f32 %v1016_v7, %v498_v5  ;;  %1054 = vmatmul.bf16.gmra.mxu1 %v2362_v3  ;;  %1143 = vmatmul.bf16.gmra.mxu2 %v2358_v63  ;;  %v507_v63 = vld [vmem:[#allocation2 + $0x1a8] sm:$0xff] }
 0x15c   : > { %1333 = vst [vmem:[#allocation2 + $0x98] sm:$0xff] %v1269_v8  ;;  %1232 = vmatmul.bf16.gmra.mxu3 %v2362_v3  ;;  %v508_v3 = vld [vmem:[#allocation2 + $0x1b8] sm:$0xff]  ;;  %v2381_v8 = vld [vmem:[%s3029_s30 + $0xe0] sm:$0xf] }
 0x15d   : > { %1334 = vst [vmem:[#allocation2 + $0x120] sm:$0xff] %v1270_v9  ;;  %v2718_v9 = vld [vmem:[%s3029_s30 + $0xe4] sm:$0xf0] }
 0x15e   : > { %v1104_v10 = vpop.f32.mrf.mxu2 }
 0x15f   : > { %v1193_v12 = vpop.f32.mrf.mxu3  ;;  %v928_v13 = vpop.f32.mrf.mxu0 }
 0x160   : > { %v1194_v14 = vadd.f32 %v1193_v12, %v1104_v10  ;;  %v1017_v16 = vpop.f32.mrf.mxu1  ;;  %v2717_v10 = vld [vmem:[%s3029_s30 + $0xe4] sm:$0xf] }
 0x161   : > { %v1018_v17 = vadd.f32 %v1017_v16, %v928_v13  ;;  %v2382_v13 = vor.u32 %v2718_v9, %v2381_v8 }
 0x162   : > { %v1271_v18 = vadd.f32 %v1194_v14, %v499_v11  ;;  %v2383_v11 = vld [vmem:[%s3029_s30 + $0xe8] sm:$0xf0] }
 0x163   : > { %v1272_v19 = vadd.f32 %v1018_v17, %v500_v15  ;;  %v509_v14 = vld [vmem:[#allocation2 + $0x28] sm:$0xff]  ;;  %v2386_v17 = vor.u32 %v2717_v10, %v2383_v11  ;;  %v520_v11 = vld [vmem:[#allocation2 + $0x100] sm:$0xff] }
 0x164   : > { %1335 = vst [vmem:[#allocation2 + $0x150] sm:$0xff] %v1271_v18 }
 0x165   : > { %1336 = vst [vmem:[#allocation2 + $0x108] sm:$0xff] %v1272_v19  ;;  %v510_v19 = vld [vmem:[#allocation2 + $0x1e8] sm:$0xff] }
 0x166   : > { %v1106_v24 = vpop.f32.mrf.mxu2 }
 0x167   : > { %v1195_v27 = vpop.f32.mrf.mxu3  ;;  %v931_v28 = vpop.f32.mrf.mxu0 }
 0x168   : > { %v1196_v30 = vadd.f32 %v1195_v27, %v1106_v24  ;;  %v1020_v32 = vpop.f32.mrf.mxu1 }
 0x169   : > { %v1021_v33 = vadd.f32 %v1020_v32, %v931_v28 }
 0x16a   : > { %v1273_v34 = vadd.f32 %v1196_v30, %v501_v26  ;;  %970 = vmatmul.bf16.gmra.mxu0 %v2366_v25 }
 0x16b   : > { %v1274_v35 = vadd.f32 %v1021_v33, %v502_v31  ;;  %1059 = vmatmul.bf16.gmra.mxu1 %v2370_v29  ;;  %1148 = vmatmul.bf16.gmra.mxu2 %v2366_v25  ;;  %v511_v25 = vld [vmem:[#allocation2 + $0xf8] sm:$0xff] }
 0x16c   : > { %1337 = vst [vmem:[#allocation2 + $0x60] sm:$0xff] %v1273_v34  ;;  %1237 = vmatmul.bf16.gmra.mxu3 %v2370_v29  ;;  %v512_v29 = vld [vmem:[#allocation2 + $0x160] sm:$0xff]  ;;  %v2389_v34 = vld [vmem:[%s3029_s30 + $0xf0] sm:$0xf] }
 0x16d   : > { %1338 = vst [vmem:[#allocation2 + $0xe0] sm:$0xff] %v1274_v35  ;;  %v2720_v35 = vld [vmem:[%s3029_s30 + $0xf4] sm:$0xf0] }
 0x16e   : > { %v1109_v36 = vpop.f32.mrf.mxu2 }
 0x16f   : > { %v1198_v38 = vpop.f32.mrf.mxu3  ;;  %v933_v39 = vpop.f32.mrf.mxu0 }
 0x170   : > { %v1199_v40 = vadd.f32 %v1198_v38, %v1109_v36  ;;  %v1022_v42 = vpop.f32.mrf.mxu1  ;;  %v2719_v36 = vld [vmem:[%s3029_s30 + $0xf4] sm:$0xf] }
 0x171   : > { %v1023_v43 = vadd.f32 %v1022_v42, %v933_v39  ;;  %v2390_v39 = vor.u32 %v2720_v35, %v2389_v34 }
 0x172   : > { %v1275_v44 = vadd.f32 %v1199_v40, %v503_v37  ;;  %v2391_v37 = vld [vmem:[%s3029_s30 + $0xf8] sm:$0xf0]  ;;  %v513_v40 = vld [vmem:[#allocation2 + $0x30] sm:$0xff] }
 0x173   : > { %v1276_v45 = vadd.f32 %v1023_v43, %v504_v41  ;;  %v2394_v43 = vor.u32 %v2719_v36, %v2391_v37  ;;  %v525_v37 = vld [vmem:[#allocation2 + $0x128] sm:$0xff] }
 0x174   : > { %1339 = vst [vmem:[#allocation2 + $0x188] sm:$0xff] %v1275_v44 }
 0x175   : > { %1340 = vst [vmem:[#allocation2 + $0x138] sm:$0xff] %v1276_v45  ;;  %v514_v45 = vld [vmem:[#allocation2 + $0x1e0] sm:$0xff] }
 0x176   : > { %v1111_v50 = vpop.f32.mrf.mxu2 }
 0x177   : > { %v1200_v53 = vpop.f32.mrf.mxu3  ;;  %v936_v54 = vpop.f32.mrf.mxu0 }
 0x178   : > { %v1201_v56 = vadd.f32 %v1200_v53, %v1111_v50  ;;  %v1025_v58 = vpop.f32.mrf.mxu1 }
 0x179   : > { %v1026_v59 = vadd.f32 %v1025_v58, %v936_v54 }
 0x17a   : > { %v1277_v60 = vadd.f32 %v1201_v56, %v505_v52  ;;  %975 = vmatmul.bf16.gmra.mxu0 %v2374_v51 }
 0x17b   : > { %v1278_v61 = vadd.f32 %v1026_v59, %v506_v57  ;;  %1064 = vmatmul.bf16.gmra.mxu1 %v2378_v55  ;;  %1153 = vmatmul.bf16.gmra.mxu2 %v2374_v51  ;;  %v515_v51 = vld [vmem:[#allocation2] sm:$0xff] }
 0x17c   : > { %1341 = vst [vmem:[#allocation2 + $0x140] sm:$0xff] %v1277_v60  ;;  %1242 = vmatmul.bf16.gmra.mxu3 %v2378_v55  ;;  %v516_v55 = vld [vmem:[#allocation2 + $0xf0] sm:$0xff] }
 0x17d   : > { %1342 = vst [vmem:[#allocation2 + $0x80] sm:$0xff] %v1278_v61  ;;  %v517_v61 = vld [vmem:[#allocation2 + $0x8] sm:$0xff] }
 0x17e   : > { %v1114_v62 = vpop.f32.mrf.mxu2 }
 0x17f   : > { %v1203_v0 = vpop.f32.mrf.mxu3  ;;  %v938_v1 = vpop.f32.mrf.mxu0 }
 0x180   : > { %v1204_v2 = vadd.f32 %v1203_v0, %v1114_v62  ;;  %v1027_v4 = vpop.f32.mrf.mxu1 }
 0x181   : > { %v1028_v5 = vadd.f32 %v1027_v4, %v938_v1  ;;  %v518_v1 = vld [vmem:[#allocation2 + $0x148] sm:$0xff] }
 0x182   : > { %v1279_v6 = vadd.f32 %v1204_v2, %v507_v63 }
 0x183   : > { %v1280_v7 = vadd.f32 %v1028_v5, %v508_v3 }
 0x184   : > { %1343 = vst [vmem:[#allocation2 + $0x1a8] sm:$0xff] %v1279_v6 }
 0x185   : > { %1344 = vst [vmem:[#allocation2 + $0x1b8] sm:$0xff] %v1280_v7  ;;  %v519_v7 = vld [vmem:[#allocation2 + $0x1d0] sm:$0xff] }
 0x186   : > { %v1116_v12 = vpop.f32.mrf.mxu2 }
 0x187   : > { %v1205_v15 = vpop.f32.mrf.mxu3  ;;  %v941_v16 = vpop.f32.mrf.mxu0 }
 0x188   : > { %v1206_v18 = vadd.f32 %v1205_v15, %v1116_v12  ;;  %v1030_v20 = vpop.f32.mrf.mxu1 }
 0x189   : > { %v1031_v21 = vadd.f32 %v1030_v20, %v941_v16 }
 0x18a   : > { %v1281_v22 = vadd.f32 %v1206_v18, %v509_v14  ;;  %980 = vmatmul.bf16.gmra.mxu0 %v2382_v13 }
 0x18b   : > { %v1282_v23 = vadd.f32 %v1031_v21, %v510_v19  ;;  %1069 = vmatmul.bf16.gmra.mxu1 %v2386_v17  ;;  %1158 = vmatmul.bf16.gmra.mxu2 %v2382_v13  ;;  %v522_v21 = vld [vmem:[#allocation2 + $0x40] sm:$0xff] }
 0x18c   : > { %1345 = vst [vmem:[#allocation2 + $0x28] sm:$0xff] %v1281_v22  ;;  %1247 = vmatmul.bf16.gmra.mxu3 %v2386_v17  ;;  %v521_v17 = vld [vmem:[#allocation2 + $0xc8] sm:$0xff] }
 0x18d   : > { %1346 = vst [vmem:[#allocation2 + $0x1e8] sm:$0xff] %v1282_v23 }
 0x18e   : > { %v1119_v24 = vpop.f32.mrf.mxu2 }
 0x18f   : > { %v1208_v26 = vpop.f32.mrf.mxu3  ;;  %v943_v27 = vpop.f32.mrf.mxu0 }
 0x190   : > { %v1209_v28 = vadd.f32 %v1208_v26, %v1119_v24  ;;  %v1032_v30 = vpop.f32.mrf.mxu1 }
 0x191   : > { %v1033_v31 = vadd.f32 %v1032_v30, %v943_v27  ;;  %v523_v27 = vld [vmem:[#allocation2 + $0x1f8] sm:$0xff] }
 0x192   : > { %v1283_v32 = vadd.f32 %v1209_v28, %v511_v25 }
 0x193   : > { %v1284_v33 = vadd.f32 %v1033_v31, %v512_v29  ;;  %v524_v31 = vld [vmem:[#allocation2 + $0x20] sm:$0xff] }
 0x194   : > { %1347 = vst [vmem:[#allocation2 + $0xf8] sm:$0xff] %v1283_v32 }
 0x195   : > { %1348 = vst [vmem:[#allocation2 + $0x160] sm:$0xff] %v1284_v33 }
 0x196   : > { %v1121_v38 = vpop.f32.mrf.mxu2 }
 0x197   : > { %v1210_v41 = vpop.f32.mrf.mxu3  ;;  %v946_v42 = vpop.f32.mrf.mxu0 }
 0x198   : > { %v1211_v44 = vadd.f32 %v1210_v41, %v1121_v38  ;;  %v1035_v46 = vpop.f32.mrf.mxu1  ;;  %v526_v41 = vld [vmem:[#allocation2 + $0x1a0] sm:$0xff] }
 0x199   : > { %v1036_v47 = vadd.f32 %v1035_v46, %v946_v42 }
 0x19a   : > { %v1285_v48 = vadd.f32 %v1211_v44, %v513_v40  ;;  %985 = vmatmul.bf16.gmra.mxu0 %v2390_v39 }
 0x19b   : > { %v1286_v49 = vadd.f32 %v1036_v47, %v514_v45  ;;  %1074 = vmatmul.bf16.gmra.mxu1 %v2394_v43  ;;  %1163 = vmatmul.bf16.gmra.mxu2 %v2390_v39  ;;  %v527_v47 = vld [vmem:[#allocation2 + $0x1f0] sm:$0xff] }
 0x19c   : > { %1349 = vst [vmem:[#allocation2 + $0x30] sm:$0xff] %v1285_v48  ;;  %1252 = vmatmul.bf16.gmra.mxu3 %v2394_v43 }
 0x19d   : > { %1350 = vst [vmem:[#allocation2 + $0x1e0] sm:$0xff] %v1286_v49 }
 0x19e   : > { %v1124_v50 = vpop.f32.mrf.mxu2 }
 0x19f   : > { %v1213_v52 = vpop.f32.mrf.mxu3  ;;  %v948_v53 = vpop.f32.mrf.mxu0 }
 0x1a0   : > { %v1214_v54 = vadd.f32 %v1213_v52, %v1124_v50  ;;  %v1037_v56 = vpop.f32.mrf.mxu1 }
 0x1a1   : > { %v1038_v57 = vadd.f32 %v1037_v56, %v948_v53 }
 0x1a2   : > { %v1287_v58 = vadd.f32 %v1214_v54, %v515_v51  ;;  %v528_v51 = vld [vmem:[#allocation2 + $0xe8] sm:$0xff] }
 0x1a3   : > { %v1288_v59 = vadd.f32 %v1038_v57, %v516_v55  ;;  %v529_v57 = vld [vmem:[#allocation2 + $0x78] sm:$0xff] }
 0x1a4   : > { %1351 = vst [vmem:[#allocation2] sm:$0xff] %v1287_v58 }
 0x1a5   : > { %1352 = vst [vmem:[#allocation2 + $0xf0] sm:$0xff] %v1288_v59 }
 0x1a6   : > { %v1126_v60 = vpop.f32.mrf.mxu2 }
 0x1a7   : > { %v1215_v62 = vpop.f32.mrf.mxu3  ;;  %v951_v63 = vpop.f32.mrf.mxu0 }
 0x1a8   : > { %v1216_v0 = vadd.f32 %v1215_v62, %v1126_v60  ;;  %v1040_v2 = vpop.f32.mrf.mxu1 }
 0x1a9   : > { %v1041_v3 = vadd.f32 %v1040_v2, %v951_v63 }
 0x1aa   : > { %v1289_v4 = vadd.f32 %v1216_v0, %v517_v61  ;;  %v530_v61 = vld [vmem:[#allocation2 + $0x70] sm:$0xff] }
 0x1ab   : > { %v1290_v5 = vadd.f32 %v1041_v3, %v518_v1  ;;  %v531_v3 = vld [vmem:[#allocation2 + $0x90] sm:$0xff] }
 0x1ac   : > { %1353 = vst [vmem:[#allocation2 + $0x8] sm:$0xff] %v1289_v4 }
 0x1ad   : > { %1354 = vst [vmem:[#allocation2 + $0x148] sm:$0xff] %v1290_v5 }
 0x1ae   : > { %v1129_v6 = vpop.f32.mrf.mxu2 }
 0x1af   : > { %v1218_v8 = vpop.f32.mrf.mxu3  ;;  %v953_v9 = vpop.f32.mrf.mxu0 }
 0x1b0   : > { %v1219_v10 = vadd.f32 %v1218_v8, %v1129_v6  ;;  %v1042_v12 = vpop.f32.mrf.mxu1 }
 0x1b1   : > { %v1043_v13 = vadd.f32 %v1042_v12, %v953_v9 }
 0x1b2   : > { %v1291_v14 = vadd.f32 %v1219_v10, %v519_v7  ;;  %v532_v7 = vld [vmem:[#allocation2 + $0x1d8] sm:$0xff] }
 0x1b3   : > { %v1292_v15 = vadd.f32 %v1043_v13, %v520_v11  ;;  %v533_v13 = vld [vmem:[#allocation2 + $0xd0] sm:$0xff] }
 0x1b4   : > { %1355 = vst [vmem:[#allocation2 + $0x1d0] sm:$0xff] %v1291_v14 }
 0x1b5   : > { %1356 = vst [vmem:[#allocation2 + $0x100] sm:$0xff] %v1292_v15 }
 0x1b6   : > { %v1131_v16 = vpop.f32.mrf.mxu2 }
 0x1b7   : > { %v1220_v18 = vpop.f32.mrf.mxu3  ;;  %v956_v19 = vpop.f32.mrf.mxu0 }
 0x1b8   : > { %v1221_v20 = vadd.f32 %v1220_v18, %v1131_v16  ;;  %v1045_v22 = vpop.f32.mrf.mxu1 }
 0x1b9   : > { %v1046_v23 = vadd.f32 %v1045_v22, %v956_v19 }
 0x1ba   : > { %v1293_v24 = vadd.f32 %v1221_v20, %v521_v17  ;;  %v534_v17 = vld [vmem:[#allocation2 + $0xb8] sm:$0xff] }
 0x1bb   : > { %v1294_v25 = vadd.f32 %v1046_v23, %v522_v21  ;;  %v535_v23 = vld [vmem:[#allocation2 + $0x88] sm:$0xff] }
 0x1bc   : > { %1357 = vst [vmem:[#allocation2 + $0xc8] sm:$0xff] %v1293_v24 }
 0x1bd   : > { %1358 = vst [vmem:[#allocation2 + $0x40] sm:$0xff] %v1294_v25 }
 0x1be   : > { %v1134_v26 = vpop.f32.mrf.mxu2 }
 0x1bf   : > { %v1223_v28 = vpop.f32.mrf.mxu3  ;;  %v958_v29 = vpop.f32.mrf.mxu0 }
 0x1c0   : > { %v1224_v30 = vadd.f32 %v1223_v28, %v1134_v26  ;;  %v1047_v32 = vpop.f32.mrf.mxu1 }
 0x1c1   : > { %v1048_v33 = vadd.f32 %v1047_v32, %v958_v29 }
 0x1c2   : > { %v1295_v34 = vadd.f32 %v1224_v30, %v523_v27  ;;  %v536_v27 = vld [vmem:[#allocation2 + $0xa8] sm:$0xff] }
 0x1c3   : > { %v1296_v35 = vadd.f32 %v1048_v33, %v524_v31  ;;  %v537_v33 = vld [vmem:[#allocation2 + $0x1c8] sm:$0xff] }
 0x1c4   : > { %1359 = vst [vmem:[#allocation2 + $0x1f8] sm:$0xff] %v1295_v34 }
 0x1c5   : > { %1360 = vst [vmem:[#allocation2 + $0x20] sm:$0xff] %v1296_v35 }
 0x1c6   : > { %v1136_v36 = vpop.f32.mrf.mxu2 }
 0x1c7   : > { %v1225_v38 = vpop.f32.mrf.mxu3  ;;  %v961_v39 = vpop.f32.mrf.mxu0 }
 0x1c8   : > { %v1226_v40 = vadd.f32 %v1225_v38, %v1136_v36  ;;  %v1050_v42 = vpop.f32.mrf.mxu1 }
 0x1c9   : > { %v1051_v43 = vadd.f32 %v1050_v42, %v961_v39 }
 0x1ca   : > { %v1297_v44 = vadd.f32 %v1226_v40, %v525_v37  ;;  %v538_v37 = vld [vmem:[#allocation2 + $0x170] sm:$0xff] }
 0x1cb   : > { %v1298_v45 = vadd.f32 %v1051_v43, %v526_v41  ;;  %v539_v43 = vld [vmem:[#allocation2 + $0x178] sm:$0xff] }
 0x1cc   : > { %1361 = vst [vmem:[#allocation2 + $0x128] sm:$0xff] %v1297_v44 }
 0x1cd   : > { %1362 = vst [vmem:[#allocation2 + $0x1a0] sm:$0xff] %v1298_v45 }
 0x1ce   : > { %v1139_v46 = vpop.f32.mrf.mxu2 }
 0x1cf   : > { %v1228_v48 = vpop.f32.mrf.mxu3  ;;  %v963_v49 = vpop.f32.mrf.mxu0 }
 0x1d0   : > { %v1229_v50 = vadd.f32 %v1228_v48, %v1139_v46  ;;  %v1052_v52 = vpop.f32.mrf.mxu1 }
 0x1d1   : > { %v1053_v53 = vadd.f32 %v1052_v52, %v963_v49 }
 0x1d2   : > { %v1299_v54 = vadd.f32 %v1229_v50, %v527_v47  ;;  %v540_v47 = vld [vmem:[#allocation2 + $0x68] sm:$0xff] }
 0x1d3   : > { %v1300_v55 = vadd.f32 %v1053_v53, %v528_v51  ;;  %v541_v53 = vld [vmem:[#allocation2 + $0x190] sm:$0xff] }
 0x1d4   : > { %1363 = vst [vmem:[#allocation2 + $0x1f0] sm:$0xff] %v1299_v54 }
 0x1d5   : > { %1364 = vst [vmem:[#allocation2 + $0xe8] sm:$0xff] %v1300_v55 }
 0x1d6   : > { %v1141_v56 = vpop.f32.mrf.mxu2 }
 0x1d7   : > { %v1230_v58 = vpop.f32.mrf.mxu3  ;;  %v966_v59 = vpop.f32.mrf.mxu0 }
 0x1d8   : > { %v1231_v60 = vadd.f32 %v1230_v58, %v1141_v56  ;;  %v1055_v62 = vpop.f32.mrf.mxu1 }
 0x1d9   : > { %v1056_v63 = vadd.f32 %v1055_v62, %v966_v59 }
 0x1da   : > { %v1301_v0 = vadd.f32 %v1231_v60, %v529_v57  ;;  %v542_v57 = vld [vmem:[#allocation2 + $0x198] sm:$0xff] }
 0x1db   : > { %v1302_v1 = vadd.f32 %v1056_v63, %v530_v61  ;;  %v543_v63 = vld [vmem:[#allocation2 + $0x38] sm:$0xff] }
 0x1dc   : > { %1365 = vst [vmem:[#allocation2 + $0x78] sm:$0xff] %v1301_v0 }
 0x1dd   : > { %1366 = vst [vmem:[#allocation2 + $0x70] sm:$0xff] %v1302_v1 }
 0x1de   : > { %v1144_v2 = vpop.f32.mrf.mxu2 }
 0x1df   : > { %v1233_v4 = vpop.f32.mrf.mxu3  ;;  %v968_v5 = vpop.f32.mrf.mxu0 }
 0x1e0   : > { %v1234_v6 = vadd.f32 %v1233_v4, %v1144_v2  ;;  %v1057_v8 = vpop.f32.mrf.mxu1 }
 0x1e1   : > { %v1058_v9 = vadd.f32 %v1057_v8, %v968_v5 }
 0x1e2   : > { %v1303_v10 = vadd.f32 %v1234_v6, %v531_v3  ;;  %v544_v3 = vld [vmem:[#allocation2 + $0xc0] sm:$0xff] }
 0x1e3   : > { %v1304_v11 = vadd.f32 %v1058_v9, %v532_v7  ;;  %v545_v9 = vld [vmem:[#allocation2 + $0x1c0] sm:$0xff] }
 0x1e4   : > { %1367 = vst [vmem:[#allocation2 + $0x90] sm:$0xff] %v1303_v10 }
 0x1e5   : > { %1368 = vst [vmem:[#allocation2 + $0x1d8] sm:$0xff] %v1304_v11 }
 0x1e6   : > { %v1146_v12 = vpop.f32.mrf.mxu2 }
 0x1e7   : > { %v1235_v14 = vpop.f32.mrf.mxu3  ;;  %v971_v15 = vpop.f32.mrf.mxu0 }
 0x1e8   : > { %v1236_v16 = vadd.f32 %v1235_v14, %v1146_v12  ;;  %v1060_v18 = vpop.f32.mrf.mxu1 }
 0x1e9   : > { %v1061_v19 = vadd.f32 %v1060_v18, %v971_v15 }
 0x1ea   : > { %v1305_v20 = vadd.f32 %v1236_v16, %v533_v13  ;;  %v546_v13 = vld [vmem:[#allocation2 + $0x158] sm:$0xff] }
 0x1eb   : > { %v1306_v21 = vadd.f32 %v1061_v19, %v534_v17  ;;  %v547_v19 = vld [vmem:[#allocation2 + $0x10] sm:$0xff] }
 0x1ec   : > { %1369 = vst [vmem:[#allocation2 + $0xd0] sm:$0xff] %v1305_v20 }
 0x1ed   : > { %1370 = vst [vmem:[#allocation2 + $0xb8] sm:$0xff] %v1306_v21 }
 0x1ee   : > { %v1149_v22 = vpop.f32.mrf.mxu2 }
 0x1ef   : > { %v1238_v24 = vpop.f32.mrf.mxu3  ;;  %v973_v25 = vpop.f32.mrf.mxu0 }
 0x1f0   : > { %v1239_v26 = vadd.f32 %v1238_v24, %v1149_v22  ;;  %v1062_v28 = vpop.f32.mrf.mxu1 }
 0x1f1   : > { %v1063_v29 = vadd.f32 %v1062_v28, %v973_v25 }
 0x1f2   : > { %v1307_v30 = vadd.f32 %v1239_v26, %v535_v23  ;;  %v548_v23 = vld [vmem:[#allocation2 + $0x58] sm:$0xff] }
 0x1f3   : > { %v1308_v31 = vadd.f32 %v1063_v29, %v536_v27  ;;  %v549_v29 = vld [vmem:[#allocation2 + $0xa0] sm:$0xff] }
 0x1f4   : > { %1371 = vst [vmem:[#allocation2 + $0x88] sm:$0xff] %v1307_v30 }
 0x1f5   : > { %1372 = vst [vmem:[#allocation2 + $0xa8] sm:$0xff] %v1308_v31 }
 0x1f6   : > { %v1151_v32 = vpop.f32.mrf.mxu2 }
 0x1f7   : > { %v1240_v34 = vpop.f32.mrf.mxu3  ;;  %v976_v35 = vpop.f32.mrf.mxu0 }
 0x1f8   : > { %v1241_v36 = vadd.f32 %v1240_v34, %v1151_v32  ;;  %v1065_v38 = vpop.f32.mrf.mxu1 }
 0x1f9   : > { %v1066_v39 = vadd.f32 %v1065_v38, %v976_v35 }
 0x1fa   : > { %v1309_v40 = vadd.f32 %v1241_v36, %v537_v33 }
 0x1fb   : > { %v1310_v41 = vadd.f32 %v1066_v39, %v538_v37 }
 0x1fc   : > { %1373 = vst [vmem:[#allocation2 + $0x1c8] sm:$0xff] %v1309_v40 }
 0x1fd   : > { %1374 = vst [vmem:[#allocation2 + $0x170] sm:$0xff] %v1310_v41 }
 0x1fe   : > { %v1154_v42 = vpop.f32.mrf.mxu2 }
 0x1ff   : > { %v1243_v44 = vpop.f32.mrf.mxu3  ;;  %v978_v45 = vpop.f32.mrf.mxu0 }
 0x200   : > { %v1244_v46 = vadd.f32 %v1243_v44, %v1154_v42  ;;  %v1067_v48 = vpop.f32.mrf.mxu1 }
 0x201   : > { %v1068_v49 = vadd.f32 %v1067_v48, %v978_v45 }
 0x202   : > { %v1311_v50 = vadd.f32 %v1244_v46, %v539_v43 }
 0x203   : > { %v1312_v51 = vadd.f32 %v1068_v49, %v540_v47 }
 0x204   : > { %1375 = vst [vmem:[#allocation2 + $0x178] sm:$0xff] %v1311_v50 }
 0x205   : > { %1376 = vst [vmem:[#allocation2 + $0x68] sm:$0xff] %v1312_v51 }
 0x206   : > { %v1156_v52 = vpop.f32.mrf.mxu2 }
 0x207   : > { %v1245_v54 = vpop.f32.mrf.mxu3  ;;  %v981_v55 = vpop.f32.mrf.mxu0 }
 0x208   : > { %v1246_v56 = vadd.f32 %v1245_v54, %v1156_v52  ;;  %v1070_v58 = vpop.f32.mrf.mxu1 }
 0x209   : > { %v1071_v59 = vadd.f32 %v1070_v58, %v981_v55 }
 0x20a   : > { %v1313_v60 = vadd.f32 %v1246_v56, %v541_v53 }
 0x20b   : > { %v1314_v61 = vadd.f32 %v1071_v59, %v542_v57 }
 0x20c   : > { %1377 = vst [vmem:[#allocation2 + $0x190] sm:$0xff] %v1313_v60 }
 0x20d   : > { %1378 = vst [vmem:[#allocation2 + $0x198] sm:$0xff] %v1314_v61 }
 0x20e   : > { %v1159_v62 = vpop.f32.mrf.mxu2 }
 0x20f   : > { %v1248_v0 = vpop.f32.mrf.mxu3  ;;  %v983_v1 = vpop.f32.mrf.mxu0 }
 0x210   : > { %v1249_v2 = vadd.f32 %v1248_v0, %v1159_v62  ;;  %v1072_v4 = vpop.f32.mrf.mxu1 }
 0x211   : > { %v1073_v5 = vadd.f32 %v1072_v4, %v983_v1 }
 0x212   : > { %v1315_v6 = vadd.f32 %v1249_v2, %v543_v63 }
 0x213   : > { %v1316_v7 = vadd.f32 %v1073_v5, %v544_v3 }
 0x214   : > { %1379 = vst [vmem:[#allocation2 + $0x38] sm:$0xff] %v1315_v6 }
 0x215   : > { %1380 = vst [vmem:[#allocation2 + $0xc0] sm:$0xff] %v1316_v7 }
 0x216   : > { %v1161_v8 = vpop.f32.mrf.mxu2 }
 0x217   : > { %v1250_v10 = vpop.f32.mrf.mxu3  ;;  %v986_v11 = vpop.f32.mrf.mxu0 }
 0x218   : > { %v1251_v12 = vadd.f32 %v1250_v10, %v1161_v8  ;;  %v1075_v14 = vpop.f32.mrf.mxu1 }
 0x219   : > { %v1076_v15 = vadd.f32 %v1075_v14, %v986_v11 }
 0x21a   : > { %v1317_v16 = vadd.f32 %v1251_v12, %v545_v9 }
 0x21b   : > { %v1318_v17 = vadd.f32 %v1076_v15, %v546_v13 }
 0x21c   : > { %1381 = vst [vmem:[#allocation2 + $0x1c0] sm:$0xff] %v1317_v16 }
 0x21d   : > { %1382 = vst [vmem:[#allocation2 + $0x158] sm:$0xff] %v1318_v17 }
 0x21e   : > { %v1164_v18 = vpop.f32.mrf.mxu2 }
 0x21f   : > { %v1253_v20 = vpop.f32.mrf.mxu3  ;;  %v988_v21 = vpop.f32.mrf.mxu0 }
 0x220   : > { %v1254_v22 = vadd.f32 %v1253_v20, %v1164_v18  ;;  %v1077_v24 = vpop.f32.mrf.mxu1 }
 0x221   : > { %v1078_v25 = vadd.f32 %v1077_v24, %v988_v21 }
 0x222   : > { %v1319_v26 = vadd.f32 %v1254_v22, %v547_v19 }
 0x223   : > { %v1320_v27 = vadd.f32 %v1078_v25, %v548_v23 }
 0x224   : > { %1383 = vst [vmem:[#allocation2 + $0x10] sm:$0xff] %v1319_v26 }
 0x225   : > { %1384 = vst [vmem:[#allocation2 + $0x58] sm:$0xff] %v1320_v27 }
 0x226   : > { %v1166_v28 = vpop.f32.mrf.mxu2 }
 0x227   : > { %v1255_v30 = vpop.f32.mrf.mxu3 }
 0x228   : > { %v1256_v31 = vadd.f32 %v1255_v30, %v1166_v28  ;;  %1389 = sbr.rel (%p2523_p12) target bundleno = 981 (0x3d5), region = 82 }
 0x22a   : > { %v1321_v32 = vadd.f32 %v1256_v31, %v549_v29 }
 0x22c   : > { %1385 = vst [vmem:[#allocation2 + $0xa0] sm:$0xff] %v1321_v32 }
 0x22d   : > { %v2582_v33 = vld [vmem:[%s3549_s2 + $0x70] sm:$0xf]  ;;  %v2736_v34 = vld [vmem:[%s3549_s2 + $0x74] sm:$0xf0]  ;;  %v2735_v38 = vld [vmem:[%s3549_s2 + $0x74] sm:$0xf] }
 0x22e   : > { %v2646_v35 = vld [vmem:[%s3549_s2 + $0xf0] sm:$0xf]  ;;  %v2583_v36 = vor.u32 %v2736_v34, %v2582_v33  ;;  %v2752_v37 = vld [vmem:[%s3549_s2 + $0xf4] sm:$0xf0]  ;;  %v2584_v39 = vld [vmem:[%s3549_s2 + $0x78] sm:$0xf0] }
 0x22f   : > { %v2647_v40 = vor.u32 %v2752_v37, %v2646_v35  ;;  %v2587_v41 = vor.u32 %v2735_v38, %v2584_v39  ;;  %v2751_v42 = vld [vmem:[%s3549_s2 + $0xf4] sm:$0xf]  ;;  %v2648_v43 = vld [vmem:[%s3549_s2 + $0xf8] sm:$0xf0]  ;;  %v2574_v44 = vld [vmem:[%s3549_s2 + $0x60] sm:$0xf] }
 0x230   : > { %1684 = vmatpush.bf16.msra.mxu0 %v2583_v36  ;;  %v2651_v45 = vor.u32 %v2751_v42, %v2648_v43  ;;  %v2734_v46 = vld [vmem:[%s3549_s2 + $0x64] sm:$0xf0]  ;;  %v2638_v47 = vld [vmem:[%s3549_s2 + $0xe0] sm:$0xf]  ;;  %v2733_v51 = vld [vmem:[%s3549_s2 + $0x64] sm:$0xf] }
 0x231   : > { %v2750_v48 = vld [vmem:[%s3549_s2 + $0xe4] sm:$0xf0]  ;;  %1773 = vmatpush.bf16.msra.mxu1 %v2647_v40  ;;  %1862 = vmatpush.bf16.msra.mxu2 %v2587_v41  ;;  %v2575_v49 = vor.u32 %v2734_v46, %v2574_v44  ;;  %v2576_v52 = vld [vmem:[%s3549_s2 + $0x68] sm:$0xf0]  ;;  %v2749_v53 = vld [vmem:[%s3549_s2 + $0xe4] sm:$0xf] }
 0x232   : > { %v2639_v50 = vor.u32 %v2750_v48, %v2638_v47  ;;  %1951 = vmatpush.bf16.msra.mxu3 %v2651_v45  ;;  %v2579_v54 = vor.u32 %v2733_v51, %v2576_v52  ;;  %v2640_v55 = vld [vmem:[%s3549_s2 + $0xe8] sm:$0xf0]  ;;  %v2566_v56 = vld [vmem:[%s3549_s2 + $0x50] sm:$0xf]  ;;  %v2732_v57 = vld [vmem:[%s3549_s2 + $0x54] sm:$0xf0] }
 0x233   : > { %v2643_v58 = vor.u32 %v2749_v53, %v2640_v55  ;;  %v2630_v59 = vld [vmem:[%s3549_s2 + $0xd0] sm:$0xf]  ;;  %v2748_v60 = vld [vmem:[%s3549_s2 + $0xd4] sm:$0xf0]  ;;  %v2731_v61 = vld [vmem:[%s3549_s2 + $0x54] sm:$0xf]  ;;  %v2567_v62 = vor.u32 %v2732_v57, %v2566_v56 }
 0x234   : > { %1685 = vmatpush.bf16.msra.mxu0 %v2575_v49  ;;  %v2568_v63 = vld [vmem:[%s3549_s2 + $0x58] sm:$0xf0]  ;;  %v2747_v0 = vld [vmem:[%s3549_s2 + $0xd4] sm:$0xf]  ;;  %v2631_v2 = vor.u32 %v2748_v60, %v2630_v59  ;;  %v2558_v4 = vld [vmem:[%s3549_s2 + $0x40] sm:$0xf] }
 0x235   : > { %v2632_v1 = vld [vmem:[%s3549_s2 + $0xd8] sm:$0xf0]  ;;  %1774 = vmatpush.bf16.msra.mxu1 %v2639_v50  ;;  %1863 = vmatpush.bf16.msra.mxu2 %v2579_v54  ;;  %v2571_v3 = vor.u32 %v2731_v61, %v2568_v63  ;;  %v2730_v5 = vld [vmem:[%s3549_s2 + $0x44] sm:$0xf0]  ;;  %v2622_v6 = vld [vmem:[%s3549_s2 + $0xc0] sm:$0xf] }
 0x236   : > { %1952 = vmatpush.bf16.msra.mxu3 %v2643_v58  ;;  %v2635_v7 = vor.u32 %v2747_v0, %v2632_v1  ;;  %v2746_v8 = vld [vmem:[%s3549_s2 + $0xc4] sm:$0xf0]  ;;  %v2729_v9 = vld [vmem:[%s3549_s2 + $0x44] sm:$0xf]  ;;  %v2560_v10 = vld [vmem:[%s3549_s2 + $0x48] sm:$0xf0]  ;;  %v2559_v13 = vor.u32 %v2730_v5, %v2558_v4 }
 0x237   : > { %v2745_v11 = vld [vmem:[%s3549_s2 + $0xc4] sm:$0xf]  ;;  %v2624_v12 = vld [vmem:[%s3549_s2 + $0xc8] sm:$0xf0]  ;;  %v2623_v14 = vor.u32 %v2746_v8, %v2622_v6  ;;  %v2563_v15 = vor.u32 %v2729_v9, %v2560_v10  ;;  %v2550_v16 = vld [vmem:[%s3549_s2 + $0x30] sm:$0xf] }
 0x238   : > { %1686 = vmatpush.bf16.msra.mxu0 %v2567_v62  ;;  %v2728_v17 = vld [vmem:[%s3549_s2 + $0x34] sm:$0xf0]  ;;  %v2614_v18 = vld [vmem:[%s3549_s2 + $0xb0] sm:$0xf]  ;;  %v2627_v19 = vor.u32 %v2745_v11, %v2624_v12  ;;  %v2727_v21 = vld [vmem:[%s3549_s2 + $0x34] sm:$0xf] }
 0x239   : > { %1775 = vmatpush.bf16.msra.mxu1 %v2631_v2  ;;  %1864 = vmatpush.bf16.msra.mxu2 %v2571_v3  ;;  %v2744_v20 = vld [vmem:[%s3549_s2 + $0xb4] sm:$0xf0]  ;;  %v2552_v22 = vld [vmem:[%s3549_s2 + $0x38] sm:$0xf0]  ;;  %v2743_v23 = vld [vmem:[%s3549_s2 + $0xb4] sm:$0xf]  ;;  %v2551_v25 = vor.u32 %v2728_v17, %v2550_v16 }
 0x23a   : > { %1953 = vmatpush.bf16.msra.mxu3 %v2635_v7  ;;  %v2616_v24 = vld [vmem:[%s3549_s2 + $0xb8] sm:$0xf0]  ;;  %v2615_v26 = vor.u32 %v2744_v20, %v2614_v18  ;;  %v2555_v27 = vor.u32 %v2727_v21, %v2552_v22  ;;  %v2542_v28 = vld [vmem:[%s3549_s2 + $0x20] sm:$0xf]  ;;  %v2726_v29 = vld [vmem:[%s3549_s2 + $0x24] sm:$0xf0] }
 0x23b   : > { %v2606_v30 = vld [vmem:[%s3549_s2 + $0xa0] sm:$0xf]  ;;  %v2619_v31 = vor.u32 %v2743_v23, %v2616_v24  ;;  %v2742_v32 = vld [vmem:[%s3549_s2 + $0xa4] sm:$0xf0]  ;;  %v2725_v33 = vld [vmem:[%s3549_s2 + $0x24] sm:$0xf]  ;;  %v2543_v37 = vor.u32 %v2726_v29, %v2542_v28 }
 0x23c   : > { %1687 = vmatpush.bf16.msra.mxu0 %v2559_v13  ;;  %v2544_v34 = vld [vmem:[%s3549_s2 + $0x28] sm:$0xf0]  ;;  %v2741_v35 = vld [vmem:[%s3549_s2 + $0xa4] sm:$0xf]  ;;  %v2607_v38 = vor.u32 %v2742_v32, %v2606_v30  ;;  %v2534_v40 = vld [vmem:[%s3549_s2 + $0x10] sm:$0xf] }
 0x23d   : > { %1776 = vmatpush.bf16.msra.mxu1 %v2623_v14  ;;  %1865 = vmatpush.bf16.msra.mxu2 %v2563_v15  ;;  %v2608_v36 = vld [vmem:[%s3549_s2 + $0xa8] sm:$0xf0]  ;;  %v2547_v39 = vor.u32 %v2725_v33, %v2544_v34  ;;  %v2724_v41 = vld [vmem:[%s3549_s2 + $0x14] sm:$0xf0]  ;;  %v2598_v42 = vld [vmem:[%s3549_s2 + $0x90] sm:$0xf] }
 0x23e   : > { %1954 = vmatpush.bf16.msra.mxu3 %v2627_v19  ;;  %v2611_v43 = vor.u32 %v2741_v35, %v2608_v36  ;;  %v2740_v44 = vld [vmem:[%s3549_s2 + $0x94] sm:$0xf0]  ;;  %v2723_v45 = vld [vmem:[%s3549_s2 + $0x14] sm:$0xf]  ;;  %v2536_v46 = vld [vmem:[%s3549_s2 + $0x18] sm:$0xf0]  ;;  %v2535_v49 = vor.u32 %v2724_v41, %v2534_v40 }
 0x23f   : > { %v2739_v47 = vld [vmem:[%s3549_s2 + $0x94] sm:$0xf]  ;;  %v2600_v48 = vld [vmem:[%s3549_s2 + $0x98] sm:$0xf0]  ;;  %v2599_v50 = vor.u32 %v2740_v44, %v2598_v42  ;;  %v2539_v51 = vor.u32 %v2723_v45, %v2536_v46  ;;  %v2526_v52 = vld [vmem:[%s3549_s2] sm:$0xf] }
 0x240   : > { %1688 = vmatpush.bf16.msra.mxu0 %v2551_v25  ;;  %v2722_v53 = vld [vmem:[%s3549_s2 + $0x4] sm:$0xf0]  ;;  %v2590_v54 = vld [vmem:[%s3549_s2 + $0x80] sm:$0xf]  ;;  %v2603_v55 = vor.u32 %v2739_v47, %v2600_v48  ;;  %v2721_v57 = vld [vmem:[%s3549_s2 + $0x4] sm:$0xf] }
 0x241   : > { %1777 = vmatpush.bf16.msra.mxu1 %v2615_v26  ;;  %1866 = vmatpush.bf16.msra.mxu2 %v2555_v27  ;;  %v2738_v56 = vld [vmem:[%s3549_s2 + $0x84] sm:$0xf0]  ;;  %v2528_v58 = vld [vmem:[%s3549_s2 + $0x8] sm:$0xf0]  ;;  %v2737_v59 = vld [vmem:[%s3549_s2 + $0x84] sm:$0xf]  ;;  %v2527_v61 = vor.u32 %v2722_v53, %v2526_v52 }
 0x242   : > { %1955 = vmatpush.bf16.msra.mxu3 %v2619_v31  ;;  %v2592_v60 = vld [vmem:[%s3549_s2 + $0x88] sm:$0xf0]  ;;  %v1390_v62 = vld [vmem:[#allocation2 + $0xb0] sm:$0xff]  ;;  %v1392_v63 = vld [vmem:[#allocation2 + $0xd8] sm:$0xff]  ;;  %v2591_v0 = vor.u32 %v2738_v56, %v2590_v54  ;;  %v2531_v1 = vor.u32 %v2721_v57, %v2528_v58 }
 0x243   : > { %v1391_v2 = vld [vmem:[#allocation2 + $0x1b0] sm:$0xff]  ;;  %v1393_v3 = vld [vmem:[#allocation2 + $0x18] sm:$0xff]  ;;  %v2595_v4 = vor.u32 %v2737_v59, %v2592_v60  ;;  %v1454_v5 = vpack.c.bf16 %v1392_v63, %v1390_v62  ;;  %v1395_v9 = vld [vmem:[#allocation2 + $0x168] sm:$0xff] }
 0x244   : > { %1689 = vmatpush.bf16.msra.mxu0 %v2543_v37  ;;  %v1455_v6 = vpack.c.bf16 %v1393_v3, %v1391_v2  ;;  %v1394_v7 = vld [vmem:[#allocation2 + $0x50] sm:$0xff]  ;;  %v1397_v10 = vld [vmem:[#allocation2 + $0x48] sm:$0xff]  ;;  %v1398_v13 = vld [vmem:[#allocation2 + $0x180] sm:$0xff] }
 0x245   : > { %1778 = vmatpush.bf16.msra.mxu1 %v2607_v38  ;;  %1867 = vmatpush.bf16.msra.mxu2 %v2547_v39  ;;  %v1396_v8 = vld [vmem:[#allocation2 + $0x130] sm:$0xff]  ;;  %v1457_v12 = vpack.c.bf16 %v1397_v10, %v1395_v9  ;;  %v1400_v14 = vld [vmem:[#allocation2 + $0x118] sm:$0xff]  ;;  %v1402_v19 = vld [vmem:[#allocation2 + $0x120] sm:$0xff] }
 0x246   : > { %1956 = vmatpush.bf16.msra.mxu3 %v2611_v43  ;;  %v1456_v11 = vpack.c.bf16 %v1396_v8, %v1394_v7  ;;  %v1399_v15 = vld [vmem:[#allocation2 + $0x110] sm:$0xff]  ;;  %v1401_v16 = vld [vmem:[#allocation2 + $0x98] sm:$0xff]  ;;  %v1458_v17 = vpack.c.bf16 %v1400_v14, %v1398_v13  ;;  %v1404_v20 = vld [vmem:[#allocation2 + $0x108] sm:$0xff] }
 0x247   : > { %v1459_v18 = vpack.c.bf16 %v1401_v16, %v1399_v15  ;;  %v1403_v21 = vld [vmem:[#allocation2 + $0x150] sm:$0xff]  ;;  %v1405_v22 = vld [vmem:[#allocation2 + $0x60] sm:$0xff]  ;;  %v1460_v23 = vpack.c.bf16 %v1404_v20, %v1402_v19  ;;  %v1408_v26 = vld [vmem:[#allocation2 + $0x138] sm:$0xff] }
 0x248   : > { %1690 = vmatpush.bf16.msra.mxu0 %v2535_v49  ;;  %v1461_v24 = vpack.c.bf16 %v1405_v22, %v1403_v21  ;;  %v1406_v25 = vld [vmem:[#allocation2 + $0xe0] sm:$0xff]  ;;  %v1407_v27 = vld [vmem:[#allocation2 + $0x188] sm:$0xff]  ;;  %v1412_v32 = vld [vmem:[#allocation2 + $0x1b8] sm:$0xff] }
 0x249   : > { %1779 = vmatpush.bf16.msra.mxu1 %v2599_v50  ;;  %1868 = vmatpush.bf16.msra.mxu2 %v2539_v51  ;;  %v1409_v28 = vld [vmem:[#allocation2 + $0x140] sm:$0xff]  ;;  %v1462_v29 = vpack.c.bf16 %v1408_v26, %v1406_v25  ;;  %v1411_v33 = vld [vmem:[#allocation2 + $0x1a8] sm:$0xff]  ;;  %v1415_v39 = vld [vmem:[#allocation2 + $0xf8] sm:$0xff] }
 0x24a   : > { %1957 = vmatpush.bf16.msra.mxu3 %v2603_v55  ;;  %v1463_v30 = vpack.c.bf16 %v1409_v28, %v1407_v27  ;;  %v1410_v31 = vld [vmem:[#allocation2 + $0x80] sm:$0xff]  ;;  %v1413_v34 = vld [vmem:[#allocation2 + $0x28] sm:$0xff]  ;;  %v1417_v40 = vld [vmem:[#allocation2 + $0x30] sm:$0xff] }
 0x24b   : > { %v1464_v35 = vpack.c.bf16 %v1412_v32, %v1410_v31  ;;  %v1465_v36 = vpack.c.bf16 %v1413_v34, %v1411_v33  ;;  %v1414_v37 = vld [vmem:[#allocation2 + $0x1e8] sm:$0xff]  ;;  %v1416_v38 = vld [vmem:[#allocation2 + $0x160] sm:$0xff]  ;;  %v1467_v42 = vpack.c.bf16 %v1417_v40, %v1415_v39  ;;  %v1420_v44 = vld [vmem:[#allocation2 + $0xf0] sm:$0xff] }
 0x24c   : > { %1691 = vmatpush.bf16.msra.mxu0 %v2527_v61  ;;  %v1466_v41 = vpack.c.bf16 %v1416_v38, %v1414_v37  ;;  %v1418_v43 = vld [vmem:[#allocation2 + $0x1e0] sm:$0xff]  ;;  %v1421_v46 = vld [vmem:[#allocation2 + $0x8] sm:$0xff]  ;;  %v1423_v52 = vld [vmem:[#allocation2 + $0x1d0] sm:$0xff] }
 0x24d   : > { %1780 = vmatpush.bf16.msra.mxu1 %v2591_v0  ;;  %1869 = vmatpush.bf16.msra.mxu2 %v2531_v1  ;;  %v1419_v45 = vld [vmem:[#allocation2] sm:$0xff]  ;;  %v1468_v47 = vpack.c.bf16 %v1420_v44, %v1418_v43  ;;  %v1422_v50 = vld [vmem:[#allocation2 + $0x148] sm:$0xff]  ;;  %v1427_v9 = vld [vmem:[#allocation2 + $0x1f8] sm:$0xff] }
 0x24e   : > { %1958 = vmatpush.bf16.msra.mxu3 %v2595_v4  ;;  %v1469_v48 = vpack.c.bf16 %v1421_v46, %v1419_v45  ;;  %v1518_v49 = vld [vmem:[%s3550_s3] sm:$0x3]  ;;  %v1425_v53 = vld [vmem:[#allocation2 + $0xc8] sm:$0xff]  ;;  %v1431_v37 = vld [vmem:[#allocation2 + $0x1f0] sm:$0xff] }
 0x24f   : > { %1692 = vmatmul.bf16.vlgmr.msra.gmra.mxu0 %v1454_v5  ;;  %v1424_v51 = vld [vmem:[#allocation2 + $0x100] sm:$0xff]  ;;  %v3426_v54 = vperm.slane %v1518_v49, 0  ;;  %v1471_v57 = vpack.c.bf16 %v1425_v53, %v1423_v52  ;;  %v3429_v60 = vperm.slane %v1518_v49, 1  ;;  %v1429_v10 = vld [vmem:[#allocation2 + $0x128] sm:$0xff]  ;;  %v1433_v38 = vld [vmem:[#allocation2 + $0x78] sm:$0xff] }
 0x250   : > { %1781 = vmatmul.bf16.vlgmr.msra.gmra.mxu1 %v1455_v6  ;;  %1870 = vmatmul.bf16.vlgmr.msra.gmra.mxu2 %v1454_v5  ;;  %v1470_v55 = vpack.c.bf16 %v1424_v51, %v1422_v50  ;;  %v1426_v7 = vld [vmem:[#allocation2 + $0x40] sm:$0xff]  ;;  %v1475_v46 = vpack.c.bf16 %v1433_v38, %v1431_v37 }
 0x251   : > { %1959 = vmatmul.bf16.vlgmr.msra.gmra.mxu3 %v1455_v6  ;;  %v1428_v8 = vld [vmem:[#allocation2 + $0x20] sm:$0xff] }
 0x252   : > { %v1472_v13 = vpack.c.bf16 %v1428_v8, %v1426_v7 }
 0x25f   : > { %1697 = vmatmul.bf16.gmra.mxu0 %v1456_v11 }
 0x260   : > { %1786 = vmatmul.bf16.gmra.mxu1 %v1457_v12  ;;  %1875 = vmatmul.bf16.gmra.mxu2 %v1456_v11 }
 0x261   : > { %1964 = vmatmul.bf16.gmra.mxu3 %v1457_v12 }
 0x26f   : > { %1702 = vmatmul.bf16.gmra.mxu0 %v1458_v17 }
 0x270   : > { %1791 = vmatmul.bf16.gmra.mxu1 %v1459_v18  ;;  %1880 = vmatmul.bf16.gmra.mxu2 %v1458_v17 }
 0x271   : > { %1969 = vmatmul.bf16.gmra.mxu3 %v1459_v18  ;;  %v1473_v18 = vpack.c.bf16 %v1429_v10, %v1427_v9 }
 0x27f   : > { %1707 = vmatmul.bf16.gmra.mxu0 %v1460_v23 }
 0x280   : > { %1796 = vmatmul.bf16.gmra.mxu1 %v1461_v24  ;;  %1885 = vmatmul.bf16.gmra.mxu2 %v1460_v23 }
 0x281   : > { %1974 = vmatmul.bf16.gmra.mxu3 %v1461_v24 }
 0x28f   : > { %1712 = vmatmul.bf16.gmra.mxu0 %v1462_v29 }
 0x290   : > { %1801 = vmatmul.bf16.gmra.mxu1 %v1463_v30  ;;  %1890 = vmatmul.bf16.gmra.mxu2 %v1462_v29 }
 0x291   : > { %1979 = vmatmul.bf16.gmra.mxu3 %v1463_v30 }
 0x29f   : > { %1717 = vmatmul.bf16.gmra.mxu0 %v1464_v35 }
 0x2a0   : > { %1806 = vmatmul.bf16.gmra.mxu1 %v1465_v36  ;;  %1895 = vmatmul.bf16.gmra.mxu2 %v1464_v35  ;;  %v1430_v35 = vld [vmem:[#allocation2 + $0x1a0] sm:$0xff] }
 0x2a1   : > { %1984 = vmatmul.bf16.gmra.mxu3 %v1465_v36  ;;  %v1432_v36 = vld [vmem:[#allocation2 + $0xe8] sm:$0xff] }
 0x2af   : > { %1722 = vmatmul.bf16.gmra.mxu0 %v1466_v41 }
 0x2b0   : > { %1811 = vmatmul.bf16.gmra.mxu1 %v1467_v42  ;;  %1900 = vmatmul.bf16.gmra.mxu2 %v1466_v41  ;;  %v1474_v41 = vpack.c.bf16 %v1432_v36, %v1430_v35 }
 0x2b1   : > { %1989 = vmatmul.bf16.gmra.mxu3 %v1467_v42 }
 0x2bf   : > { %1727 = vmatmul.bf16.gmra.mxu0 %v1468_v47 }
 0x2c0   : > { %1816 = vmatmul.bf16.gmra.mxu1 %v1469_v48  ;;  %1905 = vmatmul.bf16.gmra.mxu2 %v1468_v47 }
 0x2c1   : > { %1994 = vmatmul.bf16.gmra.mxu3 %v1469_v48 }
 0x2cc   : > { %v1693_v56 = vpop.f32.mrf.mxu0 }
 0x2cd   : > { %v1782_v58 = vpop.f32.mrf.mxu1  ;;  %v1694_v59 = vadd.f32 %v1693_v56, %v3426_v54 }
 0x2cf   : > { %1732 = vmatmul.bf16.gmra.mxu0 %v1470_v55  ;;  %v1783_v61 = vadd.f32 %v1782_v58, %v1694_v59 }
 0x2d0   : > { %1821 = vmatmul.bf16.gmra.mxu1 %v1471_v57  ;;  %1910 = vmatmul.bf16.gmra.mxu2 %v1470_v55 }
 0x2d1   : > { %1999 = vmatmul.bf16.gmra.mxu3 %v1471_v57  ;;  %v2040_v3 = vmax.f32 %v1783_v61, 0.0 }
 0x2d3   : > { %v1871_v62 = vpop.f32.mrf.mxu2 }
 0x2d4   : > { %v1872_v63 = vadd.f32 %v1871_v62, %v3429_v60  ;;  %v1960_v0 = vpop.f32.mrf.mxu3  ;;  %v1695_v1 = vpop.f32.mrf.mxu0 }
 0x2d5   : > { %v1784_v2 = vpop.f32.mrf.mxu1  ;;  %v1696_v6 = vadd.f32 %v1695_v1, %v3426_v54  ;;  %v1434_v1 = vld [vmem:[#allocation2 + $0x70] sm:$0xff] }
 0x2d6   : > { %v1961_v4 = vadd.f32 %v1960_v0, %v1872_v63 }
 0x2d7   : > { %v1785_v14 = vadd.f32 %v1784_v2, %v1696_v6  ;;  %v1436_v2 = vld [vmem:[#allocation2 + $0x1d8] sm:$0xff] }
 0x2d8   : > { %v2041_v5 = vmax.f32 %v1961_v4, 0.0  ;;  %v1437_v4 = vld [vmem:[#allocation2 + $0xd0] sm:$0xff]  ;;  %v1476_v7 = vpack.c.bf16 %v1436_v2, %v1434_v1 }
 0x2d9   : > { %v2042_v22 = vmax.f32 %v1785_v14, 0.0 }
 0x2da   : > { %v2104_v11 = vpack.c.bf16 %v2041_v5, %v2040_v3  ;;  %v1435_v3 = vld [vmem:[#allocation2 + $0x90] sm:$0xff] }
 0x2db   : > { %v1873_v12 = vpop.f32.mrf.mxu2 }
 0x2dc   : > { %2136 = vst [vmem:[%s3027_s29] sm:$0xff] %v2104_v11  ;;  %v1874_v15 = vadd.f32 %v1873_v12, %v3429_v60  ;;  %v1962_v16 = vpop.f32.mrf.mxu3  ;;  %v1698_v17 = vpop.f32.mrf.mxu0  ;;  %v1477_v12 = vpack.c.bf16 %v1437_v4, %v1435_v3 }
 0x2dd   : > { %v1787_v19 = vpop.f32.mrf.mxu1  ;;  %v1699_v21 = vadd.f32 %v1698_v17, %v3426_v54 }
 0x2de   : > { %v1963_v20 = vadd.f32 %v1962_v16, %v1874_v15 }
 0x2df   : > { %1737 = vmatmul.bf16.gmra.mxu0 %v1472_v13  ;;  %v1788_v25 = vadd.f32 %v1787_v19, %v1699_v21 }
 0x2e0   : > { %v2043_v23 = vmax.f32 %v1963_v20, 0.0  ;;  %1826 = vmatmul.bf16.gmra.mxu1 %v1473_v18  ;;  %1915 = vmatmul.bf16.gmra.mxu2 %v1472_v13 }
 0x2e1   : > { %2004 = vmatmul.bf16.gmra.mxu3 %v1473_v18  ;;  %v2044_v31 = vmax.f32 %v1788_v25, 0.0 }
 0x2e2   : > { %v2105_v24 = vpack.c.bf16 %v2043_v23, %v2042_v22 }
 0x2e3   : > { %v1876_v26 = vpop.f32.mrf.mxu2 }
 0x2e4   : > { %2137 = vst [vmem:[%s3027_s29 + $0x8] sm:$0xff] %v2105_v24  ;;  %v1877_v27 = vadd.f32 %v1876_v26, %v3429_v60  ;;  %v1965_v28 = vpop.f32.mrf.mxu3  ;;  %v1700_v29 = vpop.f32.mrf.mxu0 }
 0x2e5   : > { %v1789_v30 = vpop.f32.mrf.mxu1  ;;  %v1701_v34 = vadd.f32 %v1700_v29, %v3426_v54  ;;  %v1438_v29 = vld [vmem:[#allocation2 + $0xb8] sm:$0xff] }
 0x2e6   : > { %v1966_v32 = vadd.f32 %v1965_v28, %v1877_v27 }
 0x2e7   : > { %v1790_v42 = vadd.f32 %v1789_v30, %v1701_v34  ;;  %v1440_v30 = vld [vmem:[#allocation2 + $0xa8] sm:$0xff] }
 0x2e8   : > { %v2045_v33 = vmax.f32 %v1966_v32, 0.0  ;;  %v1441_v32 = vld [vmem:[#allocation2 + $0x1c8] sm:$0xff]  ;;  %v1478_v35 = vpack.c.bf16 %v1440_v30, %v1438_v29 }
 0x2e9   : > { %v2046_v50 = vmax.f32 %v1790_v42, 0.0 }
 0x2ea   : > { %v2106_v39 = vpack.c.bf16 %v2045_v33, %v2044_v31  ;;  %v1439_v31 = vld [vmem:[#allocation2 + $0x88] sm:$0xff] }
 0x2eb   : > { %v1878_v40 = vpop.f32.mrf.mxu2 }
 0x2ec   : > { %2138 = vst [vmem:[%s3027_s29 + $0x10] sm:$0xff] %v2106_v39  ;;  %v1879_v43 = vadd.f32 %v1878_v40, %v3429_v60  ;;  %v1967_v44 = vpop.f32.mrf.mxu3  ;;  %v1703_v45 = vpop.f32.mrf.mxu0  ;;  %v1479_v40 = vpack.c.bf16 %v1441_v32, %v1439_v31 }
 0x2ed   : > { %v1792_v47 = vpop.f32.mrf.mxu1  ;;  %v1704_v49 = vadd.f32 %v1703_v45, %v3426_v54 }
 0x2ee   : > { %v1968_v48 = vadd.f32 %v1967_v44, %v1879_v43 }
 0x2ef   : > { %1742 = vmatmul.bf16.gmra.mxu0 %v1474_v41  ;;  %v1793_v53 = vadd.f32 %v1792_v47, %v1704_v49 }
 0x2f0   : > { %v2047_v51 = vmax.f32 %v1968_v48, 0.0  ;;  %1831 = vmatmul.bf16.gmra.mxu1 %v1475_v46  ;;  %1920 = vmatmul.bf16.gmra.mxu2 %v1474_v41 }
 0x2f1   : > { %2009 = vmatmul.bf16.gmra.mxu3 %v1475_v46  ;;  %v2048_v61 = vmax.f32 %v1793_v53, 0.0 }
 0x2f2   : > { %v2107_v52 = vpack.c.bf16 %v2047_v51, %v2046_v50 }
 0x2f3   : > { %v1881_v55 = vpop.f32.mrf.mxu2 }
 0x2f4   : > { %2139 = vst [vmem:[%s3027_s29 + $0x18] sm:$0xff] %v2107_v52  ;;  %v1882_v56 = vadd.f32 %v1881_v55, %v3429_v60  ;;  %v1970_v57 = vpop.f32.mrf.mxu3  ;;  %v1705_v58 = vpop.f32.mrf.mxu0 }
 0x2f5   : > { %v1794_v59 = vpop.f32.mrf.mxu1  ;;  %v1706_v0 = vadd.f32 %v1705_v58, %v3426_v54  ;;  %v1442_v58 = vld [vmem:[#allocation2 + $0x170] sm:$0xff] }
 0x2f6   : > { %v1971_v62 = vadd.f32 %v1970_v57, %v1882_v56 }
 0x2f7   : > { %v1795_v8 = vadd.f32 %v1794_v59, %v1706_v0  ;;  %v1444_v59 = vld [vmem:[#allocation2 + $0x68] sm:$0xff] }
 0x2f8   : > { %v2049_v63 = vmax.f32 %v1971_v62, 0.0  ;;  %v1445_v62 = vld [vmem:[#allocation2 + $0x190] sm:$0xff]  ;;  %v1480_v1 = vpack.c.bf16 %v1444_v59, %v1442_v58 }
 0x2f9   : > { %v2050_v16 = vmax.f32 %v1795_v8, 0.0 }
 0x2fa   : > { %v2108_v5 = vpack.c.bf16 %v2049_v63, %v2048_v61  ;;  %v1443_v61 = vld [vmem:[#allocation2 + $0x178] sm:$0xff] }
 0x2fb   : > { %v1883_v6 = vpop.f32.mrf.mxu2 }
 0x2fc   : > { %2140 = vst [vmem:[%s3027_s29 + $0x20] sm:$0xff] %v2108_v5  ;;  %v1884_v9 = vadd.f32 %v1883_v6, %v3429_v60  ;;  %v1972_v10 = vpop.f32.mrf.mxu3  ;;  %v1708_v11 = vpop.f32.mrf.mxu0  ;;  %v1481_v6 = vpack.c.bf16 %v1445_v62, %v1443_v61 }
 0x2fd   : > { %v1797_v13 = vpop.f32.mrf.mxu1  ;;  %v1709_v15 = vadd.f32 %v1708_v11, %v3426_v54 }
 0x2fe   : > { %v1973_v14 = vadd.f32 %v1972_v10, %v1884_v9 }
 0x2ff   : > { %1747 = vmatmul.bf16.gmra.mxu0 %v1476_v7  ;;  %v1798_v19 = vadd.f32 %v1797_v13, %v1709_v15 }
 0x300   : > { %v2051_v17 = vmax.f32 %v1973_v14, 0.0  ;;  %1836 = vmatmul.bf16.gmra.mxu1 %v1477_v12  ;;  %1925 = vmatmul.bf16.gmra.mxu2 %v1476_v7 }
 0x301   : > { %2014 = vmatmul.bf16.gmra.mxu3 %v1477_v12  ;;  %v2052_v25 = vmax.f32 %v1798_v19, 0.0 }
 0x302   : > { %v2109_v18 = vpack.c.bf16 %v2051_v17, %v2050_v16 }
 0x303   : > { %v1886_v20 = vpop.f32.mrf.mxu2 }
 0x304   : > { %2141 = vst [vmem:[%s3027_s29 + $0x28] sm:$0xff] %v2109_v18  ;;  %v1887_v21 = vadd.f32 %v1886_v20, %v3429_v60  ;;  %v1975_v22 = vpop.f32.mrf.mxu3  ;;  %v1710_v23 = vpop.f32.mrf.mxu0 }
 0x305   : > { %v1799_v24 = vpop.f32.mrf.mxu1  ;;  %v1711_v28 = vadd.f32 %v1710_v23, %v3426_v54  ;;  %v1446_v23 = vld [vmem:[#allocation2 + $0x198] sm:$0xff] }
 0x306   : > { %v1976_v26 = vadd.f32 %v1975_v22, %v1887_v21 }
 0x307   : > { %v1800_v36 = vadd.f32 %v1799_v24, %v1711_v28  ;;  %v1448_v24 = vld [vmem:[#allocation2 + $0xc0] sm:$0xff] }
 0x308   : > { %v2053_v27 = vmax.f32 %v1976_v26, 0.0  ;;  %v1449_v26 = vld [vmem:[#allocation2 + $0x1c0] sm:$0xff]  ;;  %v1482_v29 = vpack.c.bf16 %v1448_v24, %v1446_v23 }
 0x309   : > { %v2054_v44 = vmax.f32 %v1800_v36, 0.0 }
 0x30a   : > { %v2110_v33 = vpack.c.bf16 %v2053_v27, %v2052_v25  ;;  %v1447_v25 = vld [vmem:[#allocation2 + $0x38] sm:$0xff] }
 0x30b   : > { %v1888_v34 = vpop.f32.mrf.mxu2 }
 0x30c   : > { %2142 = vst [vmem:[%s3027_s29 + $0x30] sm:$0xff] %v2110_v33  ;;  %v1889_v37 = vadd.f32 %v1888_v34, %v3429_v60  ;;  %v1977_v38 = vpop.f32.mrf.mxu3  ;;  %v1713_v39 = vpop.f32.mrf.mxu0  ;;  %v1483_v34 = vpack.c.bf16 %v1449_v26, %v1447_v25 }
 0x30d   : > { %v1802_v41 = vpop.f32.mrf.mxu1  ;;  %v1714_v43 = vadd.f32 %v1713_v39, %v3426_v54 }
 0x30e   : > { %v1978_v42 = vadd.f32 %v1977_v38, %v1889_v37 }
 0x30f   : > { %1752 = vmatmul.bf16.gmra.mxu0 %v1478_v35  ;;  %v1803_v47 = vadd.f32 %v1802_v41, %v1714_v43 }
 0x310   : > { %v2055_v45 = vmax.f32 %v1978_v42, 0.0  ;;  %1841 = vmatmul.bf16.gmra.mxu1 %v1479_v40  ;;  %1930 = vmatmul.bf16.gmra.mxu2 %v1478_v35 }
 0x311   : > { %2019 = vmatmul.bf16.gmra.mxu3 %v1479_v40  ;;  %v2056_v53 = vmax.f32 %v1803_v47, 0.0 }
 0x312   : > { %v2111_v46 = vpack.c.bf16 %v2055_v45, %v2054_v44 }
 0x313   : > { %v1891_v48 = vpop.f32.mrf.mxu2 }
 0x314   : > { %2143 = vst [vmem:[%s3027_s29 + $0x38] sm:$0xff] %v2111_v46  ;;  %v1892_v49 = vadd.f32 %v1891_v48, %v3429_v60  ;;  %v1980_v50 = vpop.f32.mrf.mxu3  ;;  %v1715_v51 = vpop.f32.mrf.mxu0 }
 0x315   : > { %v1804_v52 = vpop.f32.mrf.mxu1  ;;  %v1716_v57 = vadd.f32 %v1715_v51, %v3426_v54  ;;  %v1450_v51 = vld [vmem:[#allocation2 + $0x158] sm:$0xff] }
 0x316   : > { %v1981_v55 = vadd.f32 %v1980_v50, %v1892_v49 }
 0x317   : > { %v1805_v2 = vadd.f32 %v1804_v52, %v1716_v57  ;;  %v1452_v52 = vld [vmem:[#allocation2 + $0x58] sm:$0xff] }
 0x318   : > { %v2057_v56 = vmax.f32 %v1981_v55, 0.0  ;;  %v1453_v55 = vld [vmem:[#allocation2 + $0xa0] sm:$0xff]  ;;  %v1484_v58 = vpack.c.bf16 %v1452_v52, %v1450_v51 }
 0x319   : > { %v2058_v10 = vmax.f32 %v1805_v2, 0.0 }
 0x31a   : > { %v2112_v63 = vpack.c.bf16 %v2057_v56, %v2056_v53  ;;  %v1451_v53 = vld [vmem:[#allocation2 + $0x10] sm:$0xff] }
 0x31b   : > { %v1893_v0 = vpop.f32.mrf.mxu2 }
 0x31c   : > { %2144 = vst [vmem:[%s3027_s29 + $0x40] sm:$0xff] %v2112_v63  ;;  %v1894_v3 = vadd.f32 %v1893_v0, %v3429_v60  ;;  %v1982_v4 = vpop.f32.mrf.mxu3  ;;  %v1718_v5 = vpop.f32.mrf.mxu0  ;;  %v1485_v0 = vpack.c.bf16 %v1453_v55, %v1451_v53 }
 0x31d   : > { %v1807_v7 = vpop.f32.mrf.mxu1  ;;  %v1719_v9 = vadd.f32 %v1718_v5, %v3426_v54 }
 0x31e   : > { %v1983_v8 = vadd.f32 %v1982_v4, %v1894_v3 }
 0x31f   : > { %1757 = vmatmul.bf16.gmra.mxu0 %v1480_v1  ;;  %v1808_v13 = vadd.f32 %v1807_v7, %v1719_v9 }
 0x320   : > { %v2059_v11 = vmax.f32 %v1983_v8, 0.0  ;;  %1846 = vmatmul.bf16.gmra.mxu1 %v1481_v6  ;;  %1935 = vmatmul.bf16.gmra.mxu2 %v1480_v1 }
 0x321   : > { %2024 = vmatmul.bf16.gmra.mxu3 %v1481_v6  ;;  %v2060_v19 = vmax.f32 %v1808_v13, 0.0 }
 0x322   : > { %v2113_v12 = vpack.c.bf16 %v2059_v11, %v2058_v10 }
 0x323   : > { %v1896_v14 = vpop.f32.mrf.mxu2 }
 0x324   : > { %2145 = vst [vmem:[%s3027_s29 + $0x48] sm:$0xff] %v2113_v12  ;;  %v1897_v15 = vadd.f32 %v1896_v14, %v3429_v60  ;;  %v1985_v16 = vpop.f32.mrf.mxu3  ;;  %v1720_v17 = vpop.f32.mrf.mxu0 }
 0x325   : > { %v1809_v18 = vpop.f32.mrf.mxu1  ;;  %v1721_v22 = vadd.f32 %v1720_v17, %v3426_v54 }
 0x326   : > { %v1986_v20 = vadd.f32 %v1985_v16, %v1897_v15 }
 0x327   : > { %v1810_v30 = vadd.f32 %v1809_v18, %v1721_v22 }
 0x328   : > { %v2061_v21 = vmax.f32 %v1986_v20, 0.0 }
 0x329   : > { %v2062_v38 = vmax.f32 %v1810_v30, 0.0 }
 0x32a   : > { %v2114_v27 = vpack.c.bf16 %v2061_v21, %v2060_v19 }
 0x32b   : > { %v1898_v28 = vpop.f32.mrf.mxu2 }
 0x32c   : > { %2146 = vst [vmem:[%s3027_s29 + $0x50] sm:$0xff] %v2114_v27  ;;  %v1899_v31 = vadd.f32 %v1898_v28, %v3429_v60  ;;  %v1987_v32 = vpop.f32.mrf.mxu3  ;;  %v1723_v33 = vpop.f32.mrf.mxu0 }
 0x32d   : > { %v1812_v35 = vpop.f32.mrf.mxu1  ;;  %v1724_v37 = vadd.f32 %v1723_v33, %v3426_v54 }
 0x32e   : > { %v1988_v36 = vadd.f32 %v1987_v32, %v1899_v31 }
 0x32f   : > { %1762 = vmatmul.bf16.gmra.mxu0 %v1482_v29  ;;  %v1813_v41 = vadd.f32 %v1812_v35, %v1724_v37 }
 0x330   : > { %v2063_v39 = vmax.f32 %v1988_v36, 0.0  ;;  %1851 = vmatmul.bf16.gmra.mxu1 %v1483_v34  ;;  %1940 = vmatmul.bf16.gmra.mxu2 %v1482_v29 }
 0x331   : > { %2029 = vmatmul.bf16.gmra.mxu3 %v1483_v34  ;;  %v2064_v47 = vmax.f32 %v1813_v41, 0.0 }
 0x332   : > { %v2115_v40 = vpack.c.bf16 %v2063_v39, %v2062_v38 }
 0x333   : > { %v1901_v42 = vpop.f32.mrf.mxu2 }
 0x334   : > { %2147 = vst [vmem:[%s3027_s29 + $0x58] sm:$0xff] %v2115_v40  ;;  %v1902_v43 = vadd.f32 %v1901_v42, %v3429_v60  ;;  %v1990_v44 = vpop.f32.mrf.mxu3  ;;  %v1725_v45 = vpop.f32.mrf.mxu0 }
 0x335   : > { %v1814_v46 = vpop.f32.mrf.mxu1  ;;  %v1726_v50 = vadd.f32 %v1725_v45, %v3426_v54 }
 0x336   : > { %v1991_v48 = vadd.f32 %v1990_v44, %v1902_v43 }
 0x337   : > { %v1815_v59 = vadd.f32 %v1814_v46, %v1726_v50 }
 0x338   : > { %v2065_v49 = vmax.f32 %v1991_v48, 0.0 }
 0x339   : > { %v2066_v4 = vmax.f32 %v1815_v59, 0.0 }
 0x33a   : > { %v2116_v56 = vpack.c.bf16 %v2065_v49, %v2064_v47 }
 0x33b   : > { %v1903_v57 = vpop.f32.mrf.mxu2 }
 0x33c   : > { %2148 = vst [vmem:[%s3027_s29 + $0x60] sm:$0xff] %v2116_v56  ;;  %v1904_v61 = vadd.f32 %v1903_v57, %v3429_v60  ;;  %v1992_v62 = vpop.f32.mrf.mxu3  ;;  %v1728_v63 = vpop.f32.mrf.mxu0 }
 0x33d   : > { %v1817_v1 = vpop.f32.mrf.mxu1  ;;  %v1729_v3 = vadd.f32 %v1728_v63, %v3426_v54 }
 0x33e   : > { %v1993_v2 = vadd.f32 %v1992_v62, %v1904_v61 }
 0x33f   : > { %1767 = vmatmul.bf16.gmra.mxu0 %v1484_v58  ;;  %v1818_v7 = vadd.f32 %v1817_v1, %v1729_v3 }
 0x340   : > { %v2067_v5 = vmax.f32 %v1993_v2, 0.0  ;;  %1856 = vmatmul.bf16.gmra.mxu1 %v1485_v0  ;;  %1945 = vmatmul.bf16.gmra.mxu2 %v1484_v58 }
 0x341   : > { %2034 = vmatmul.bf16.gmra.mxu3 %v1485_v0  ;;  %v2068_v13 = vmax.f32 %v1818_v7, 0.0 }
 0x342   : > { %v2117_v6 = vpack.c.bf16 %v2067_v5, %v2066_v4 }
 0x343   : > { %v1906_v8 = vpop.f32.mrf.mxu2 }
 0x344   : > { %2149 = vst [vmem:[%s3027_s29 + $0x68] sm:$0xff] %v2117_v6  ;;  %v1907_v9 = vadd.f32 %v1906_v8, %v3429_v60  ;;  %v1995_v10 = vpop.f32.mrf.mxu3  ;;  %v1730_v11 = vpop.f32.mrf.mxu0 }
 0x345   : > { %v1819_v12 = vpop.f32.mrf.mxu1  ;;  %v1731_v16 = vadd.f32 %v1730_v11, %v3426_v54 }
 0x346   : > { %v1996_v14 = vadd.f32 %v1995_v10, %v1907_v9 }
 0x347   : > { %v1820_v19 = vadd.f32 %v1819_v12, %v1731_v16 }
 0x348   : > { %v2069_v15 = vmax.f32 %v1996_v14, 0.0 }
 0x349   : > { %v2070_v26 = vmax.f32 %v1820_v19, 0.0 }
 0x34a   : > { %v2118_v17 = vpack.c.bf16 %v2069_v15, %v2068_v13 }
 0x34b   : > { %v1908_v18 = vpop.f32.mrf.mxu2 }
 0x34c   : > { %2150 = vst [vmem:[%s3027_s29 + $0x70] sm:$0xff] %v2118_v17  ;;  %v1909_v20 = vadd.f32 %v1908_v18, %v3429_v60  ;;  %v1997_v21 = vpop.f32.mrf.mxu3  ;;  %v1733_v22 = vpop.f32.mrf.mxu0 }
 0x34d   : > { %v1822_v23 = vpop.f32.mrf.mxu1  ;;  %v1734_v25 = vadd.f32 %v1733_v22, %v3426_v54 }
 0x34e   : > { %v1998_v24 = vadd.f32 %v1997_v21, %v1909_v20 }
 0x34f   : > { %v1823_v29 = vadd.f32 %v1822_v23, %v1734_v25 }
 0x350   : > { %v2071_v27 = vmax.f32 %v1998_v24, 0.0 }
 0x351   : > { %v2072_v35 = vmax.f32 %v1823_v29, 0.0 }
 0x352   : > { %v2119_v28 = vpack.c.bf16 %v2071_v27, %v2070_v26 }
 0x353   : > { %v1911_v30 = vpop.f32.mrf.mxu2 }
 0x354   : > { %2151 = vst [vmem:[%s3027_s29 + $0x78] sm:$0xff] %v2119_v28  ;;  %v1912_v31 = vadd.f32 %v1911_v30, %v3429_v60  ;;  %v2000_v32 = vpop.f32.mrf.mxu3  ;;  %v1735_v33 = vpop.f32.mrf.mxu0 }
 0x355   : > { %v1824_v34 = vpop.f32.mrf.mxu1  ;;  %v1736_v38 = vadd.f32 %v1735_v33, %v3426_v54 }
 0x356   : > { %v2001_v36 = vadd.f32 %v2000_v32, %v1912_v31 }
 0x357   : > { %v1825_v41 = vadd.f32 %v1824_v34, %v1736_v38 }
 0x358   : > { %v2073_v37 = vmax.f32 %v2001_v36, 0.0 }
 0x359   : > { %v2074_v48 = vmax.f32 %v1825_v41, 0.0 }
 0x35a   : > { %v2120_v39 = vpack.c.bf16 %v2073_v37, %v2072_v35 }
 0x35b   : > { %v1913_v40 = vpop.f32.mrf.mxu2 }
 0x35c   : > { %2152 = vst [vmem:[%s3027_s29 + $0x80] sm:$0xff] %v2120_v39  ;;  %v1914_v42 = vadd.f32 %v1913_v40, %v3429_v60  ;;  %v2002_v43 = vpop.f32.mrf.mxu3  ;;  %v1738_v44 = vpop.f32.mrf.mxu0 }
 0x35d   : > { %v1827_v45 = vpop.f32.mrf.mxu1  ;;  %v1739_v47 = vadd.f32 %v1738_v44, %v3426_v54 }
 0x35e   : > { %v2003_v46 = vadd.f32 %v2002_v43, %v1914_v42 }
 0x35f   : > { %v1828_v51 = vadd.f32 %v1827_v45, %v1739_v47 }
 0x360   : > { %v2075_v49 = vmax.f32 %v2003_v46, 0.0 }
 0x361   : > { %v2076_v58 = vmax.f32 %v1828_v51, 0.0 }
 0x362   : > { %v2121_v50 = vpack.c.bf16 %v2075_v49, %v2074_v48 }
 0x363   : > { %v1916_v52 = vpop.f32.mrf.mxu2 }
 0x364   : > { %2153 = vst [vmem:[%s3027_s29 + $0x88] sm:$0xff] %v2121_v50  ;;  %v1917_v53 = vadd.f32 %v1916_v52, %v3429_v60  ;;  %v2005_v55 = vpop.f32.mrf.mxu3  ;;  %v1740_v56 = vpop.f32.mrf.mxu0 }
 0x365   : > { %v1829_v57 = vpop.f32.mrf.mxu1  ;;  %v1741_v62 = vadd.f32 %v1740_v56, %v3426_v54 }
 0x366   : > { %v2006_v59 = vadd.f32 %v2005_v55, %v1917_v53 }
 0x367   : > { %v1830_v1 = vadd.f32 %v1829_v57, %v1741_v62 }
 0x368   : > { %v2077_v61 = vmax.f32 %v2006_v59, 0.0 }
 0x369   : > { %v2078_v8 = vmax.f32 %v1830_v1, 0.0 }
 0x36a   : > { %v2122_v63 = vpack.c.bf16 %v2077_v61, %v2076_v58 }
 0x36b   : > { %v1918_v0 = vpop.f32.mrf.mxu2 }
 0x36c   : > { %2154 = vst [vmem:[%s3027_s29 + $0x90] sm:$0xff] %v2122_v63  ;;  %v1919_v2 = vadd.f32 %v1918_v0, %v3429_v60  ;;  %v2007_v3 = vpop.f32.mrf.mxu3  ;;  %v1743_v4 = vpop.f32.mrf.mxu0 }
 0x36d   : > { %v1832_v5 = vpop.f32.mrf.mxu1  ;;  %v1744_v7 = vadd.f32 %v1743_v4, %v3426_v54 }
 0x36e   : > { %v2008_v6 = vadd.f32 %v2007_v3, %v1919_v2 }
 0x36f   : > { %v1833_v11 = vadd.f32 %v1832_v5, %v1744_v7 }
 0x370   : > { %v2079_v9 = vmax.f32 %v2008_v6, 0.0 }
 0x371   : > { %v2080_v17 = vmax.f32 %v1833_v11, 0.0 }
 0x372   : > { %v2123_v10 = vpack.c.bf16 %v2079_v9, %v2078_v8 }
 0x373   : > { %v1921_v12 = vpop.f32.mrf.mxu2 }
 0x374   : > { %2155 = vst [vmem:[%s3027_s29 + $0x98] sm:$0xff] %v2123_v10  ;;  %v1922_v13 = vadd.f32 %v1921_v12, %v3429_v60  ;;  %v2010_v14 = vpop.f32.mrf.mxu3  ;;  %v1745_v15 = vpop.f32.mrf.mxu0 }
 0x375   : > { %v1834_v16 = vpop.f32.mrf.mxu1  ;;  %v1746_v20 = vadd.f32 %v1745_v15, %v3426_v54 }
 0x376   : > { %v2011_v18 = vadd.f32 %v2010_v14, %v1922_v13 }
 0x377   : > { %v1835_v23 = vadd.f32 %v1834_v16, %v1746_v20 }
 0x378   : > { %v2081_v19 = vmax.f32 %v2011_v18, 0.0 }
 0x379   : > { %v2082_v30 = vmax.f32 %v1835_v23, 0.0 }
 0x37a   : > { %v2124_v21 = vpack.c.bf16 %v2081_v19, %v2080_v17 }
 0x37b   : > { %v1923_v22 = vpop.f32.mrf.mxu2 }
 0x37c   : > { %2156 = vst [vmem:[%s3027_s29 + $0xa0] sm:$0xff] %v2124_v21  ;;  %v1924_v24 = vadd.f32 %v1923_v22, %v3429_v60  ;;  %v2012_v25 = vpop.f32.mrf.mxu3  ;;  %v1748_v26 = vpop.f32.mrf.mxu0 }
 0x37d   : > { %v1837_v27 = vpop.f32.mrf.mxu1  ;;  %v1749_v29 = vadd.f32 %v1748_v26, %v3426_v54 }
 0x37e   : > { %v2013_v28 = vadd.f32 %v2012_v25, %v1924_v24 }
 0x37f   : > { %v1838_v33 = vadd.f32 %v1837_v27, %v1749_v29 }
 0x380   : > { %v2083_v31 = vmax.f32 %v2013_v28, 0.0 }
 0x381   : > { %v2084_v39 = vmax.f32 %v1838_v33, 0.0 }
 0x382   : > { %v2125_v32 = vpack.c.bf16 %v2083_v31, %v2082_v30 }
 0x383   : > { %v1926_v34 = vpop.f32.mrf.mxu2 }
 0x384   : > { %2157 = vst [vmem:[%s3027_s29 + $0xa8] sm:$0xff] %v2125_v32  ;;  %v1927_v35 = vadd.f32 %v1926_v34, %v3429_v60  ;;  %v2015_v36 = vpop.f32.mrf.mxu3  ;;  %v1750_v37 = vpop.f32.mrf.mxu0 }
 0x385   : > { %v1839_v38 = vpop.f32.mrf.mxu1  ;;  %v1751_v42 = vadd.f32 %v1750_v37, %v3426_v54 }
 0x386   : > { %v2016_v40 = vadd.f32 %v2015_v36, %v1927_v35 }
 0x387   : > { %v1840_v45 = vadd.f32 %v1839_v38, %v1751_v42 }
 0x388   : > { %v2085_v41 = vmax.f32 %v2016_v40, 0.0 }
 0x389   : > { %v2086_v52 = vmax.f32 %v1840_v45, 0.0 }
 0x38a   : > { %v2126_v43 = vpack.c.bf16 %v2085_v41, %v2084_v39 }
 0x38b   : > { %v1928_v44 = vpop.f32.mrf.mxu2 }
 0x38c   : > { %2158 = vst [vmem:[%s3027_s29 + $0xb0] sm:$0xff] %v2126_v43  ;;  %v1929_v46 = vadd.f32 %v1928_v44, %v3429_v60  ;;  %v2017_v47 = vpop.f32.mrf.mxu3  ;;  %v1753_v48 = vpop.f32.mrf.mxu0 }
 0x38d   : > { %v1842_v49 = vpop.f32.mrf.mxu1  ;;  %v1754_v51 = vadd.f32 %v1753_v48, %v3426_v54 }
 0x38e   : > { %v2018_v50 = vadd.f32 %v2017_v47, %v1929_v46 }
 0x38f   : > { %v1843_v56 = vadd.f32 %v1842_v49, %v1754_v51 }
 0x390   : > { %v2087_v53 = vmax.f32 %v2018_v50, 0.0 }
 0x391   : > { %v2088_v63 = vmax.f32 %v1843_v56, 0.0 }
 0x392   : > { %v2127_v55 = vpack.c.bf16 %v2087_v53, %v2086_v52 }
 0x393   : > { %v1931_v57 = vpop.f32.mrf.mxu2 }
 0x394   : > { %2159 = vst [vmem:[%s3027_s29 + $0xb8] sm:$0xff] %v2127_v55  ;;  %v1932_v58 = vadd.f32 %v1931_v57, %v3429_v60  ;;  %v2020_v59 = vpop.f32.mrf.mxu3  ;;  %v1755_v61 = vpop.f32.mrf.mxu0 }
 0x395   : > { %v1844_v62 = vpop.f32.mrf.mxu1  ;;  %v1756_v2 = vadd.f32 %v1755_v61, %v3426_v54 }
 0x396   : > { %v2021_v0 = vadd.f32 %v2020_v59, %v1932_v58 }
 0x397   : > { %v1845_v5 = vadd.f32 %v1844_v62, %v1756_v2 }
 0x398   : > { %v2089_v1 = vmax.f32 %v2021_v0, 0.0 }
 0x399   : > { %v2090_v12 = vmax.f32 %v1845_v5, 0.0 }
 0x39a   : > { %v2128_v3 = vpack.c.bf16 %v2089_v1, %v2088_v63 }
 0x39b   : > { %v1933_v4 = vpop.f32.mrf.mxu2 }
 0x39c   : > { %2160 = vst [vmem:[%s3027_s29 + $0xc0] sm:$0xff] %v2128_v3  ;;  %v1934_v6 = vadd.f32 %v1933_v4, %v3429_v60  ;;  %v2022_v7 = vpop.f32.mrf.mxu3  ;;  %v1758_v8 = vpop.f32.mrf.mxu0 }
 0x39d   : > { %v1847_v9 = vpop.f32.mrf.mxu1  ;;  %v1759_v11 = vadd.f32 %v1758_v8, %v3426_v54 }
 0x39e   : > { %v2023_v10 = vadd.f32 %v2022_v7, %v1934_v6 }
 0x39f   : > { %v1848_v15 = vadd.f32 %v1847_v9, %v1759_v11 }
 0x3a0   : > { %v2091_v13 = vmax.f32 %v2023_v10, 0.0 }
 0x3a1   : > { %v2092_v21 = vmax.f32 %v1848_v15, 0.0 }
 0x3a2   : > { %v2129_v14 = vpack.c.bf16 %v2091_v13, %v2090_v12 }
 0x3a3   : > { %v1936_v16 = vpop.f32.mrf.mxu2 }
 0x3a4   : > { %2161 = vst [vmem:[%s3027_s29 + $0xc8] sm:$0xff] %v2129_v14  ;;  %v1937_v17 = vadd.f32 %v1936_v16, %v3429_v60  ;;  %v2025_v18 = vpop.f32.mrf.mxu3  ;;  %v1760_v19 = vpop.f32.mrf.mxu0 }
 0x3a5   : > { %v1849_v20 = vpop.f32.mrf.mxu1  ;;  %v1761_v24 = vadd.f32 %v1760_v19, %v3426_v54 }
 0x3a6   : > { %v2026_v22 = vadd.f32 %v2025_v18, %v1937_v17 }
 0x3a7   : > { %v1850_v27 = vadd.f32 %v1849_v20, %v1761_v24 }
 0x3a8   : > { %v2093_v23 = vmax.f32 %v2026_v22, 0.0 }
 0x3a9   : > { %v2094_v34 = vmax.f32 %v1850_v27, 0.0 }
 0x3aa   : > { %v2130_v25 = vpack.c.bf16 %v2093_v23, %v2092_v21 }
 0x3ab   : > { %v1938_v26 = vpop.f32.mrf.mxu2 }
 0x3ac   : > { %2162 = vst [vmem:[%s3027_s29 + $0xd0] sm:$0xff] %v2130_v25  ;;  %v1939_v28 = vadd.f32 %v1938_v26, %v3429_v60  ;;  %v2027_v29 = vpop.f32.mrf.mxu3  ;;  %v1763_v30 = vpop.f32.mrf.mxu0 }
 0x3ad   : > { %v1852_v31 = vpop.f32.mrf.mxu1  ;;  %v1764_v33 = vadd.f32 %v1763_v30, %v3426_v54 }
 0x3ae   : > { %v2028_v32 = vadd.f32 %v2027_v29, %v1939_v28 }
 0x3af   : > { %v1853_v37 = vadd.f32 %v1852_v31, %v1764_v33 }
 0x3b0   : > { %v2095_v35 = vmax.f32 %v2028_v32, 0.0 }
 0x3b1   : > { %v2096_v42 = vmax.f32 %v1853_v37, 0.0 }
 0x3b2   : > { %v2131_v36 = vpack.c.bf16 %v2095_v35, %v2094_v34 }
 0x3b3   : > { %v1941_v38 = vpop.f32.mrf.mxu2 }
 0x3b4   : > { %2163 = vst [vmem:[%s3027_s29 + $0xd8] sm:$0xff] %v2131_v36  ;;  %v1942_v39 = vadd.f32 %v1941_v38, %v3429_v60  ;;  %v2030_v40 = vpop.f32.mrf.mxu3  ;;  %v1765_v41 = vpop.f32.mrf.mxu0 }
 0x3b5   : > { %v1854_v44 = vpop.f32.mrf.mxu1  ;;  %v1766_v46 = vadd.f32 %v1765_v41, %v3426_v54 }
 0x3b6   : > { %v2031_v43 = vadd.f32 %v2030_v40, %v1942_v39 }
 0x3b7   : > { %v1855_v49 = vadd.f32 %v1854_v44, %v1766_v46 }
 0x3b8   : > { %v2097_v45 = vmax.f32 %v2031_v43, 0.0 }
 0x3b9   : > { %v2098_v56 = vmax.f32 %v1855_v49, 0.0 }
 0x3ba   : > { %v2132_v47 = vpack.c.bf16 %v2097_v45, %v2096_v42 }
 0x3bb   : > { %v1943_v48 = vpop.f32.mrf.mxu2 }
 0x3bc   : > { %2164 = vst [vmem:[%s3027_s29 + $0xe0] sm:$0xff] %v2132_v47  ;;  %v1944_v50 = vadd.f32 %v1943_v48, %v3429_v60  ;;  %v2032_v51 = vpop.f32.mrf.mxu3  ;;  %v1768_v52 = vpop.f32.mrf.mxu0 }
 0x3bd   : > { %v1769_v55 = vadd.f32 %v1768_v52, %v3426_v54  ;;  %v1857_v58 = vpop.f32.mrf.mxu1 }
 0x3be   : > { %v2033_v53 = vadd.f32 %v2032_v51, %v1944_v50 }
 0x3bf   : > { %v1858_v61 = vadd.f32 %v1857_v58, %v1769_v55 }
 0x3c0   : > { %v2099_v57 = vmax.f32 %v2033_v53, 0.0 }
 0x3c1   : > { %v2100_v2 = vmax.f32 %v1858_v61, 0.0 }
 0x3c2   : > { %v2133_v59 = vpack.c.bf16 %v2099_v57, %v2098_v56 }
 0x3c3   : > { %v1946_v62 = vpop.f32.mrf.mxu2 }
 0x3c4   : > { %2165 = vst [vmem:[%s3027_s29 + $0xe8] sm:$0xff] %v2133_v59  ;;  %v1947_v63 = vadd.f32 %v1946_v62, %v3429_v60  ;;  %v2035_v0 = vpop.f32.mrf.mxu3  ;;  %v1770_v1 = vpop.f32.mrf.mxu0 }
 0x3c5   : > { %v1771_v5 = vadd.f32 %v1770_v1, %v3426_v54  ;;  %v1859_v7 = vpop.f32.mrf.mxu1 }
 0x3c6   : > { %v2036_v3 = vadd.f32 %v2035_v0, %v1947_v63 }
 0x3c7   : > { %v1860_v9 = vadd.f32 %v1859_v7, %v1771_v5 }
 0x3c8   : > { %v2101_v4 = vmax.f32 %v2036_v3, 0.0 }
 0x3c9   : > { %v2102_v13 = vmax.f32 %v1860_v9, 0.0 }
 0x3ca   : > { %v2134_v6 = vpack.c.bf16 %v2101_v4, %v2100_v2 }
 0x3cb   : > { %v1948_v8 = vpop.f32.mrf.mxu2 }
 0x3cc   : > { %2166 = vst [vmem:[%s3027_s29 + $0xf0] sm:$0xff] %v2134_v6  ;;  %v1949_v10 = vadd.f32 %v1948_v8, %v3429_v60  ;;  %v2037_v11 = vpop.f32.mrf.mxu3 }
 0x3ce   : > { %v2038_v12 = vadd.f32 %v2037_v11, %v1949_v10 }
 0x3d0   : > { %v2103_v14 = vmax.f32 %v2038_v12, 0.0 }
 0x3d2   : > { %v2135_v15 = vpack.c.bf16 %v2103_v14, %v2102_v13 }
 0x3d4   : > { %2167 = vst [vmem:[%s3027_s29 + $0xf8] sm:$0xff] %v2135_v15 }
 0x3d5 PF: > { %s14_s21 = sadd.s32 1, %s2864_s21   ;;  %s3552_s15 = smov %s2844_s16 }
 0x3d6   : > { %p11_p13 = scmp.ge.s32.totalorder %s14_s21, 6   ;;  %s3553_s16 = smov %s2943_s28 }
 0x3d7   : > { %s3554_s17 = smov %s2856_s19  ;;  %s3555_s18 = smov %s2860_s20 }
 0x3d8   : > { %s3556_s19 = smov %s3559_s22  ;;  %s3557_s20 = smov %s3563_s23 }
 0x3d9   :  { %13 = sbr.rel (!%p11_p13) target bundleno = 4 (0x4), region = 118 }

</bundles_post_ra>
